<compile_context>
chip_gen: v7x
topology: tpu7x:2x2x1
jax: 0.10.0
libtpu: 0.0.40
codegen_flags: <defaults>
</compile_context>

<pallas_src>
import functools

import jax
import jax.numpy as jnp
from jax.experimental import pallas as pl
from jax.experimental.pallas import tpu as pltpu


# --------------------------------------------------------------------------
# In-kernel helpers (operate on VMEM-resident values)
# --------------------------------------------------------------------------
def _conv3x3_im2col(h, w, b, *, relu, identity=None):
    """3x3 'same' conv as one im2col matmul (+ folded-BN bias [+res] [+ReLU]).

    h:  (1, H, W, Cin) f32 activation for one batch element
    w:  (9*Cin, Cout)  bf16 weight, rows ordered (ky, kx, cin), BN scale folded
    b:  (1, Cout)      f32 folded BN bias
    """
    _, H, W, Cin = h.shape
    Cout = b.shape[-1]

    # zero-pad H and W entirely inside VMEM (never touches HBM)
    zr = jnp.zeros((1, 1, W, Cin), h.dtype)
    zc = jnp.zeros((1, H + 2, 1, Cin), h.dtype)
    xp = jnp.concatenate([zr, h, zr], axis=1)          # (1, H+2, W,   Cin)
    xp = jnp.concatenate([zc, xp, zc], axis=2)         # (1, H+2, W+2, Cin)

    # im2col: lane-concat the 9 shifted taps -> single K = 9*Cin MXU matmul
    taps = [xp[:, ky:ky + H, kx:kx + W, :] for ky in range(3) for kx in range(3)]
    patch = jnp.concatenate(taps, axis=-1).reshape(H * W, 9 * Cin)

    out = jnp.dot(patch.astype(jnp.bfloat16), w,
                  preferred_element_type=jnp.float32) + b
    if identity is not None:
        out = out + identity.reshape(H * W, Cout)
    if relu:
        out = jnp.maximum(out, 0.0)
    return out.reshape(1, H, W, Cout)


# --------------------------------------------------------------------------
# Fused forward kernel (one grid step = one batch element)
# --------------------------------------------------------------------------
def _amazons_fused_kernel(
        x_ref,                       # (1, H, W, 4)          f32
        win_ref, bin_ref,            # (9*4, C) bf16, (1, C) f32
        rw1_ref, rb1_ref,            # (L, 9*C, C) bf16, (L, 1, C) f32
        rw2_ref, rb2_ref,            # (L, 9*C, C) bf16, (L, 1, C) f32
        wp_ref, bp_ref,              # (C, 6) bf16, (1, 6) f32
        wfc_ref, bfc_ref,            # (6, HW, 3*HW) f32, (1, 3*HW) f32
        wv_ref, bv_ref,              # (C, 1) bf16, (1, 1) f32
        wv1_ref, bv1_ref,            # (HW, 256) f32, (1, 256) f32
        wv2_ref, bv2_ref,            # (1, 256) f32, (1, 1) f32
        pol_ref,                     # out (1, 1, 3*HW) f32
        val_ref):                    # out (1, 1, 1)    f32
    _, H, W, _ = x_ref.shape
    HW = H * W
    C = bin_ref.shape[-1]
    L = rw1_ref.shape[0]

    # ---- trunk: input conv + residual tower (all VMEM resident) ----
    h = _conv3x3_im2col(x_ref[...], win_ref[...], bin_ref[...], relu=True)
    for l in range(L):
        y = _conv3x3_im2col(h, rw1_ref[l], rb1_ref[l], relu=True)
        # conv2 (no relu) + identity, then ReLU, fused.
        h = _conv3x3_im2col(y, rw2_ref[l], rb2_ref[l], relu=True, identity=h)

    h_flat = h.reshape(HW, C).astype(jnp.bfloat16)

    # ---- policy head: 1x1 conv (+BN+ReLU) then FC, no HBM roundtrip ----
    p = jnp.dot(h_flat, wp_ref[...], preferred_element_type=jnp.float32)
    p = jnp.maximum(p + bp_ref[...], 0.0)                         # (HW, 6)
    # pol[o] = bfc[o] + sum_{s,c} p[s, c] * wfc[c, s, o]
    pol = bfc_ref[...]                                            # (1, 3*HW)
    for c in range(p.shape[-1]):
        pol = pol + jnp.sum(p[:, c:c + 1] * wfc_ref[c], axis=0, keepdims=True)
    pol_ref[...] = pol.reshape(1, 1, 3 * HW)

    # ---- value head: 1x1 conv (+BN+ReLU) -> FC(256)+ReLU -> FC(1)+tanh ----
    v = jnp.dot(h_flat, wv_ref[...], preferred_element_type=jnp.float32)
    v = jnp.maximum(v + bv_ref[...], 0.0)                         # (HW, 1)
    hid = jnp.sum(v * wv1_ref[...], axis=0, keepdims=True) + bv1_ref[...]
    hid = jnp.maximum(hid, 0.0)                                   # (1, 256)
    val = jnp.tanh(jnp.sum(hid * wv2_ref[...], axis=1, keepdims=True)
                   + bv2_ref[...])
    val_ref[...] = val.reshape(1, 1, 1)


# --------------------------------------------------------------------------
# JAX wrapper (layout plumbing only)
# --------------------------------------------------------------------------
_WEIGHT_NAMES = ("win", "bin", "rw1", "rb1", "rw2", "rb2",
                 "wp", "bp", "wfc", "bfc",
                 "wv", "bv", "wv1", "bv1", "wv2", "bv2")


def amazons_forward(params, x_nchw, *, board_shape):
    B = x_nchw.shape[0]
    H, W = board_shape
    HW = H * W

    x = jnp.transpose(x_nchw, (0, 2, 3, 1)).astype(jnp.float32)   # NCHW -> NHWC
    weights = [params[k] for k in _WEIGHT_NAMES]

    def const_spec(a):
        nd = a.ndim
        return pl.BlockSpec(a.shape, lambda b, _nd=nd: (0,) * _nd)

    in_specs = [pl.BlockSpec((1, H, W, x.shape[-1]), lambda b: (b, 0, 0, 0))]
    in_specs += [const_spec(a) for a in weights]

    pol3, val3 = pl.pallas_call(
        _amazons_fused_kernel,
        grid=(B,),
        out_shape=(jax.ShapeDtypeStruct((B, 1, 3 * HW), jnp.float32),
                   jax.ShapeDtypeStruct((B, 1, 1), jnp.float32)),
        in_specs=in_specs,
        out_specs=(pl.BlockSpec((1, 1, 3 * HW), lambda b: (b, 0, 0)),
                   pl.BlockSpec((1, 1, 1), lambda b: (b, 0, 0))),
        compiler_params=pltpu.CompilerParams(
            dimension_semantics=("parallel",)),
    )(x, *weights)

    pol = pol3.reshape(B, 3, H, W)      # matches torch .reshape((B, 3) + board)
    val = val3.reshape(B, 1)
    return pol, val


# --------------------------------------------------------------------------
# Deterministic parameter init (shapes follow the PyTorch module __init__;
# BN is pre-folded and layouts are the kernel-native ones).
# --------------------------------------------------------------------------
def init_params(key, channels, layers, board_shape):
    H, W = board_shape
    HW = H * W
    keys = iter(jax.random.split(key, 32 + 10 * layers))

    def bn_fold(cout):
        # eval-mode BN folded to per-channel scale/bias (deterministic, nontrivial)
        g = 1.0 + 0.1 * jax.random.normal(next(keys), (cout,), jnp.float32)
        b = 0.1 * jax.random.normal(next(keys), (cout,), jnp.float32)
        m = 0.05 * jax.random.normal(next(keys), (cout,), jnp.float32)
        v = 1.0 + 0.1 * jnp.abs(jax.random.normal(next(keys), (cout,), jnp.float32))
        scale = g / jnp.sqrt(v + 1e-5)
        bias = b - m * scale
        return scale, bias

    def conv3x3_folded(cin, cout):
        std = (2.0 / (cout * 9)) ** 0.5                    # kaiming fan_out / relu
        w = std * jax.random.normal(next(keys), (cout, cin, 3, 3), jnp.float32)
        # (Cout, Cin, ky, kx) -> rows ordered (ky, kx, cin): matches in-kernel
        # im2col tap-concat order.
        w9 = jnp.transpose(w, (2, 3, 1, 0)).reshape(9 * cin, cout)
        scale, bias = bn_fold(cout)
        return ((w9 * scale[None, :]).astype(jnp.bfloat16),   # BN scale folded
                bias.reshape(1, cout))

    def conv1x1_folded(cin, cout):
        std = (2.0 / cout) ** 0.5
        w = std * jax.random.normal(next(keys), (cout, cin, 1, 1), jnp.float32)
        wm = jnp.transpose(w[:, :, 0, 0], (1, 0))          # (Cin, Cout)
        scale, bias = bn_fold(cout)
        return ((wm * scale[None, :]).astype(jnp.bfloat16),
                bias.reshape(1, cout))

    def uniform(shape, fan_in):
        bound = 1.0 / (fan_in ** 0.5)
        return jax.random.uniform(next(keys), shape, jnp.float32, -bound, bound)

    p = {}
    p["win"], p["bin"] = conv3x3_folded(4, channels)

    rw1, rb1, rw2, rb2 = [], [], [], []
    for _ in range(layers):
        w1, b1 = conv3x3_folded(channels, channels)
        w2, b2 = conv3x3_folded(channels, channels)
        rw1.append(w1); rb1.append(b1); rw2.append(w2); rb2.append(b2)
    p["rw1"] = jnp.stack(rw1); p["rb1"] = jnp.stack(rb1)
    p["rw2"] = jnp.stack(rw2); p["rb2"] = jnp.stack(rb2)

    # policy head. NHWC-ordered FC weight: wfc[c, s, o] <-> torch
    # policy_fc.weight[o, c*HW + s] (row permutation baked in; no transpose
    # needed in the kernel).
    p["wp"], p["bp"] = conv1x1_folded(channels, 6)
    p["wfc"] = uniform((6, HW, 3 * HW), 6 * HW)
    p["bfc"] = uniform((1, 3 * HW), 6 * HW)

    # value head. wv1[s, j] <-> value_fc_1.weight[j, s]; wv2 is the single
    # row of value_fc_2.weight.
    p["wv"], p["bv"] = conv1x1_folded(channels, 1)
    p["wv1"] = uniform((HW, 256), HW)
    p["bv1"] = uniform((1, 256), HW)
    p["wv2"] = uniform((1, 256), 256)
    p["bv2"] = uniform((1, 1), 256)
    return p


# --------------------------------------------------------------------------
if __name__ == "__main__":
    board_shape = (8, 8)
    batch, residual_channels, residual_layers = 2, 32, 2

    key = jax.random.PRNGKey(0)
    k_params, k_x = jax.random.split(key)
    params = init_params(k_params, residual_channels, residual_layers, board_shape)
    x = jax.random.normal(k_x, (batch, 4, board_shape[0], board_shape[1]),
                          jnp.float32)

    fwd = jax.jit(functools.partial(amazons_forward, board_shape=board_shape))
    pol, val = fwd(params, x)
    jax.block_until_ready((pol, val))

    assert pol.shape == (batch, 3, board_shape[0], board_shape[1]), pol.shape
    assert val.shape == (batch, 1), val.shape
    assert pol.dtype == jnp.float32 and val.dtype == jnp.float32
    assert bool(jnp.all(jnp.isfinite(pol))) and bool(jnp.all(jnp.isfinite(val)))
    assert bool(jnp.all(jnp.abs(val) <= 1.0 + 1e-6))      # tanh range
    print("KERNEL_OK")
</pallas_src>

<mosaic_0001>
module attributes {stable_mosaic.version = 11 : i64} {
  func.func @_amazons_fused_kernel(%arg0: i32, %arg1: memref<1x8x8x4xf32, #tpu.memory_space<vmem>>, %arg2: memref<36x32xbf16, #tpu.memory_space<vmem>>, %arg3: memref<1x32xf32, #tpu.memory_space<vmem>>, %arg4: memref<2x288x32xbf16, #tpu.memory_space<vmem>>, %arg5: memref<2x1x32xf32, #tpu.memory_space<vmem>>, %arg6: memref<2x288x32xbf16, #tpu.memory_space<vmem>>, %arg7: memref<2x1x32xf32, #tpu.memory_space<vmem>>, %arg8: memref<32x6xbf16, #tpu.memory_space<vmem>>, %arg9: memref<1x6xf32, #tpu.memory_space<vmem>>, %arg10: memref<6x64x192xf32, #tpu.memory_space<vmem>>, %arg11: memref<1x192xf32, #tpu.memory_space<vmem>>, %arg12: memref<32x1xbf16, #tpu.memory_space<vmem>>, %arg13: memref<1x1xf32, #tpu.memory_space<vmem>>, %arg14: memref<64x256xf32, #tpu.memory_space<vmem>>, %arg15: memref<1x256xf32, #tpu.memory_space<vmem>>, %arg16: memref<1x256xf32, #tpu.memory_space<vmem>>, %arg17: memref<1x1xf32, #tpu.memory_space<vmem>>, %arg18: memref<1x1x192xf32, #tpu.memory_space<vmem>>, %arg19: memref<1x1x1xf32, #tpu.memory_space<vmem>>) attributes {dimension_semantics = [#tpu.dimension_semantics<parallel>], iteration_bounds = array<i64: 2>, scalar_prefetch = 0 : i64, scratch_operands = 0 : i64, tpu.core_type = #tpu.core_type<tc>, window_params = [{transform_indices = @transform_0, window_bounds = array<i64: 1, 8, 8, 4>}, {pipeline_mode = #tpu.pipeline_mode<synchronous>, transform_indices = @transform_1, window_bounds = array<i64: 36, 32>}, {pipeline_mode = #tpu.pipeline_mode<synchronous>, transform_indices = @transform_2, window_bounds = array<i64: 1, 32>}, {pipeline_mode = #tpu.pipeline_mode<synchronous>, transform_indices = @transform_3, window_bounds = array<i64: 2, 288, 32>}, {pipeline_mode = #tpu.pipeline_mode<synchronous>, transform_indices = @transform_4, window_bounds = array<i64: 2, 1, 32>}, {pipeline_mode = #tpu.pipeline_mode<synchronous>, transform_indices = @transform_5, window_bounds = array<i64: 2, 288, 32>}, {pipeline_mode = #tpu.pipeline_mode<synchronous>, transform_indices = @transform_6, window_bounds = array<i64: 2, 1, 32>}, {pipeline_mode = #tpu.pipeline_mode<synchronous>, transform_indices = @transform_7, window_bounds = array<i64: 32, 6>}, {pipeline_mode = #tpu.pipeline_mode<synchronous>, transform_indices = @transform_8, window_bounds = array<i64: 1, 6>}, {pipeline_mode = #tpu.pipeline_mode<synchronous>, transform_indices = @transform_9, window_bounds = array<i64: 6, 64, 192>}, {pipeline_mode = #tpu.pipeline_mode<synchronous>, transform_indices = @transform_10, window_bounds = array<i64: 1, 192>}, {pipeline_mode = #tpu.pipeline_mode<synchronous>, transform_indices = @transform_11, window_bounds = array<i64: 32, 1>}, {pipeline_mode = #tpu.pipeline_mode<synchronous>, transform_indices = @transform_12, window_bounds = array<i64: 1, 1>}, {pipeline_mode = #tpu.pipeline_mode<synchronous>, transform_indices = @transform_13, window_bounds = array<i64: 64, 256>}, {pipeline_mode = #tpu.pipeline_mode<synchronous>, transform_indices = @transform_14, window_bounds = array<i64: 1, 256>}, {pipeline_mode = #tpu.pipeline_mode<synchronous>, transform_indices = @transform_15, window_bounds = array<i64: 1, 256>}, {pipeline_mode = #tpu.pipeline_mode<synchronous>, transform_indices = @transform_16, window_bounds = array<i64: 1, 1>}, {transform_indices = @transform_17, window_bounds = array<i64: 1, 1, 192>}, {transform_indices = @transform_18, window_bounds = array<i64: 1, 1, 1>}]} {
    %c0 = arith.constant 0 : index
    %c0_0 = arith.constant 0 : index
    %c0_1 = arith.constant 0 : index
    %c0_2 = arith.constant 0 : index
    %0 = vector.load %arg1[%c0, %c0_0, %c0_1, %c0_2] : memref<1x8x8x4xf32, #tpu.memory_space<vmem>>, vector<1x8x8x4xf32>
    %c0_3 = arith.constant 0 : index
    %c0_4 = arith.constant 0 : index
    %1 = vector.load %arg2[%c0_3, %c0_4] : memref<36x32xbf16, #tpu.memory_space<vmem>>, vector<36x32xbf16>
    %c0_5 = arith.constant 0 : index
    %c0_6 = arith.constant 0 : index
    %2 = vector.load %arg3[%c0_5, %c0_6] : memref<1x32xf32, #tpu.memory_space<vmem>>, vector<1x32xf32>
    %cst = arith.constant 0.000000e+00 : f32
    %3 = vector.broadcast %cst : f32 to vector<1x1x8x4xf32>
    %cst_7 = arith.constant 0.000000e+00 : f32
    %4 = vector.broadcast %cst_7 : f32 to vector<1x10x1x4xf32>
    %5 = tpu.concatenate %3, %0, %3 in 1 : vector<1x1x8x4xf32>, vector<1x8x8x4xf32>, vector<1x1x8x4xf32> -> vector<1x10x8x4xf32>
    %6 = tpu.concatenate %4, %5, %4 in 2 : vector<1x10x1x4xf32>, vector<1x10x8x4xf32>, vector<1x10x1x4xf32> -> vector<1x10x10x4xf32>
    %7 = vector.extract_strided_slice %6 {offsets = [0, 0, 0, 0], sizes = [1, 8, 8, 4], strides = [1, 1, 1, 1]} : vector<1x10x10x4xf32> to vector<1x8x8x4xf32>
    %8 = vector.extract_strided_slice %6 {offsets = [0, 0, 1, 0], sizes = [1, 8, 8, 4], strides = [1, 1, 1, 1]} : vector<1x10x10x4xf32> to vector<1x8x8x4xf32>
    %9 = vector.extract_strided_slice %6 {offsets = [0, 0, 2, 0], sizes = [1, 8, 8, 4], strides = [1, 1, 1, 1]} : vector<1x10x10x4xf32> to vector<1x8x8x4xf32>
    %10 = vector.extract_strided_slice %6 {offsets = [0, 1, 0, 0], sizes = [1, 8, 8, 4], strides = [1, 1, 1, 1]} : vector<1x10x10x4xf32> to vector<1x8x8x4xf32>
    %11 = vector.extract_strided_slice %6 {offsets = [0, 1, 1, 0], sizes = [1, 8, 8, 4], strides = [1, 1, 1, 1]} : vector<1x10x10x4xf32> to vector<1x8x8x4xf32>
    %12 = vector.extract_strided_slice %6 {offsets = [0, 1, 2, 0], sizes = [1, 8, 8, 4], strides = [1, 1, 1, 1]} : vector<1x10x10x4xf32> to vector<1x8x8x4xf32>
    %13 = vector.extract_strided_slice %6 {offsets = [0, 2, 0, 0], sizes = [1, 8, 8, 4], strides = [1, 1, 1, 1]} : vector<1x10x10x4xf32> to vector<1x8x8x4xf32>
    %14 = vector.extract_strided_slice %6 {offsets = [0, 2, 1, 0], sizes = [1, 8, 8, 4], strides = [1, 1, 1, 1]} : vector<1x10x10x4xf32> to vector<1x8x8x4xf32>
    %15 = vector.extract_strided_slice %6 {offsets = [0, 2, 2, 0], sizes = [1, 8, 8, 4], strides = [1, 1, 1, 1]} : vector<1x10x10x4xf32> to vector<1x8x8x4xf32>
    %16 = tpu.concatenate %7, %8, %9, %10, %11, %12, %13, %14, %15 in 3 : vector<1x8x8x4xf32>, vector<1x8x8x4xf32>, vector<1x8x8x4xf32>, vector<1x8x8x4xf32>, vector<1x8x8x4xf32>, vector<1x8x8x4xf32>, vector<1x8x8x4xf32>, vector<1x8x8x4xf32>, vector<1x8x8x4xf32> -> vector<1x8x8x36xf32>
    %17 = vector.shape_cast %16 : vector<1x8x8x36xf32> to vector<64x36xf32>
    %18 = arith.truncf %17 : vector<64x36xf32> to vector<64x36xbf16>
    %cst_8 = arith.constant dense<0.000000e+00> : vector<64x32xf32>
    %19 = tpu.matmul %18, %1, %cst_8 {dimension_numbers = #tpu.dot_dimension_numbers<[1], [0], [0], [1], [0, 0, 1, 1], [], []>} : vector<64x36xbf16>, vector<36x32xbf16>, vector<64x32xf32> -> vector<64x32xf32>
    %20 = vector.broadcast %2 : vector<1x32xf32> to vector<64x32xf32>
    %21 = arith.addf %19, %20 : vector<64x32xf32>
    %cst_9 = arith.constant 0.000000e+00 : f32
    %22 = vector.broadcast %cst_9 : f32 to vector<64x32xf32>
    %23 = arith.maximumf %21, %22 : vector<64x32xf32>
    %24 = vector.shape_cast %23 : vector<64x32xf32> to vector<1x8x8x32xf32>
    %c0_10 = arith.constant 0 : index
    %c0_11 = arith.constant 0 : index
    %c0_12 = arith.constant 0 : index
    %25 = vector.load %arg4[%c0_10, %c0_11, %c0_12] : memref<2x288x32xbf16, #tpu.memory_space<vmem>>, vector<1x288x32xbf16>
    %26 = vector.shape_cast %25 : vector<1x288x32xbf16> to vector<288x32xbf16>
    %c0_13 = arith.constant 0 : index
    %c0_14 = arith.constant 0 : index
    %c0_15 = arith.constant 0 : index
    %27 = vector.load %arg5[%c0_13, %c0_14, %c0_15] : memref<2x1x32xf32, #tpu.memory_space<vmem>>, vector<1x1x32xf32>
    %28 = vector.shape_cast %27 : vector<1x1x32xf32> to vector<1x32xf32>
    %cst_16 = arith.constant 0.000000e+00 : f32
    %29 = vector.broadcast %cst_16 : f32 to vector<1x1x8x32xf32>
    %cst_17 = arith.constant 0.000000e+00 : f32
    %30 = vector.broadcast %cst_17 : f32 to vector<1x10x1x32xf32>
    %31 = tpu.concatenate %29, %24, %29 in 1 : vector<1x1x8x32xf32>, vector<1x8x8x32xf32>, vector<1x1x8x32xf32> -> vector<1x10x8x32xf32>
    %32 = tpu.concatenate %30, %31, %30 in 2 : vector<1x10x1x32xf32>, vector<1x10x8x32xf32>, vector<1x10x1x32xf32> -> vector<1x10x10x32xf32>
    %33 = vector.extract_strided_slice %32 {offsets = [0, 0, 0, 0], sizes = [1, 8, 8, 32], strides = [1, 1, 1, 1]} : vector<1x10x10x32xf32> to vector<1x8x8x32xf32>
    %34 = vector.extract_strided_slice %32 {offsets = [0, 0, 1, 0], sizes = [1, 8, 8, 32], strides = [1, 1, 1, 1]} : vector<1x10x10x32xf32> to vector<1x8x8x32xf32>
    %35 = vector.extract_strided_slice %32 {offsets = [0, 0, 2, 0], sizes = [1, 8, 8, 32], strides = [1, 1, 1, 1]} : vector<1x10x10x32xf32> to vector<1x8x8x32xf32>
    %36 = vector.extract_strided_slice %32 {offsets = [0, 1, 0, 0], sizes = [1, 8, 8, 32], strides = [1, 1, 1, 1]} : vector<1x10x10x32xf32> to vector<1x8x8x32xf32>
    %37 = vector.extract_strided_slice %32 {offsets = [0, 1, 1, 0], sizes = [1, 8, 8, 32], strides = [1, 1, 1, 1]} : vector<1x10x10x32xf32> to vector<1x8x8x32xf32>
    %38 = vector.extract_strided_slice %32 {offsets = [0, 1, 2, 0], sizes = [1, 8, 8, 32], strides = [1, 1, 1, 1]} : vector<1x10x10x32xf32> to vector<1x8x8x32xf32>
    %39 = vector.extract_strided_slice %32 {offsets = [0, 2, 0, 0], sizes = [1, 8, 8, 32], strides = [1, 1, 1, 1]} : vector<1x10x10x32xf32> to vector<1x8x8x32xf32>
    %40 = vector.extract_strided_slice %32 {offsets = [0, 2, 1, 0], sizes = [1, 8, 8, 32], strides = [1, 1, 1, 1]} : vector<1x10x10x32xf32> to vector<1x8x8x32xf32>
    %41 = vector.extract_strided_slice %32 {offsets = [0, 2, 2, 0], sizes = [1, 8, 8, 32], strides = [1, 1, 1, 1]} : vector<1x10x10x32xf32> to vector<1x8x8x32xf32>
    %42 = tpu.concatenate %33, %34, %35, %36, %37, %38, %39, %40, %41 in 3 : vector<1x8x8x32xf32>, vector<1x8x8x32xf32>, vector<1x8x8x32xf32>, vector<1x8x8x32xf32>, vector<1x8x8x32xf32>, vector<1x8x8x32xf32>, vector<1x8x8x32xf32>, vector<1x8x8x32xf32>, vector<1x8x8x32xf32> -> vector<1x8x8x288xf32>
    %43 = vector.shape_cast %42 : vector<1x8x8x288xf32> to vector<64x288xf32>
    %44 = arith.truncf %43 : vector<64x288xf32> to vector<64x288xbf16>
    %cst_18 = arith.constant dense<0.000000e+00> : vector<64x32xf32>
    %45 = tpu.matmul %44, %26, %cst_18 {dimension_numbers = #tpu.dot_dimension_numbers<[1], [0], [0], [1], [0, 0, 1, 1], [], []>} : vector<64x288xbf16>, vector<288x32xbf16>, vector<64x32xf32> -> vector<64x32xf32>
    %46 = vector.broadcast %28 : vector<1x32xf32> to vector<64x32xf32>
    %47 = arith.addf %45, %46 : vector<64x32xf32>
    %cst_19 = arith.constant 0.000000e+00 : f32
    %48 = vector.broadcast %cst_19 : f32 to vector<64x32xf32>
    %49 = arith.maximumf %47, %48 : vector<64x32xf32>
    %50 = vector.shape_cast %49 : vector<64x32xf32> to vector<1x8x8x32xf32>
    %c0_20 = arith.constant 0 : index
    %c0_21 = arith.constant 0 : index
    %c0_22 = arith.constant 0 : index
    %51 = vector.load %arg6[%c0_20, %c0_21, %c0_22] : memref<2x288x32xbf16, #tpu.memory_space<vmem>>, vector<1x288x32xbf16>
    %52 = vector.shape_cast %51 : vector<1x288x32xbf16> to vector<288x32xbf16>
    %c0_23 = arith.constant 0 : index
    %c0_24 = arith.constant 0 : index
    %c0_25 = arith.constant 0 : index
    %53 = vector.load %arg7[%c0_23, %c0_24, %c0_25] : memref<2x1x32xf32, #tpu.memory_space<vmem>>, vector<1x1x32xf32>
    %54 = vector.shape_cast %53 : vector<1x1x32xf32> to vector<1x32xf32>
    %cst_26 = arith.constant 0.000000e+00 : f32
    %55 = vector.broadcast %cst_26 : f32 to vector<1x1x8x32xf32>
    %cst_27 = arith.constant 0.000000e+00 : f32
    %56 = vector.broadcast %cst_27 : f32 to vector<1x10x1x32xf32>
    %57 = tpu.concatenate %55, %50, %55 in 1 : vector<1x1x8x32xf32>, vector<1x8x8x32xf32>, vector<1x1x8x32xf32> -> vector<1x10x8x32xf32>
    %58 = tpu.concatenate %56, %57, %56 in 2 : vector<1x10x1x32xf32>, vector<1x10x8x32xf32>, vector<1x10x1x32xf32> -> vector<1x10x10x32xf32>
    %59 = vector.extract_strided_slice %58 {offsets = [0, 0, 0, 0], sizes = [1, 8, 8, 32], strides = [1, 1, 1, 1]} : vector<1x10x10x32xf32> to vector<1x8x8x32xf32>
    %60 = vector.extract_strided_slice %58 {offsets = [0, 0, 1, 0], sizes = [1, 8, 8, 32], strides = [1, 1, 1, 1]} : vector<1x10x10x32xf32> to vector<1x8x8x32xf32>
    %61 = vector.extract_strided_slice %58 {offsets = [0, 0, 2, 0], sizes = [1, 8, 8, 32], strides = [1, 1, 1, 1]} : vector<1x10x10x32xf32> to vector<1x8x8x32xf32>
    %62 = vector.extract_strided_slice %58 {offsets = [0, 1, 0, 0], sizes = [1, 8, 8, 32], strides = [1, 1, 1, 1]} : vector<1x10x10x32xf32> to vector<1x8x8x32xf32>
    %63 = vector.extract_strided_slice %58 {offsets = [0, 1, 1, 0], sizes = [1, 8, 8, 32], strides = [1, 1, 1, 1]} : vector<1x10x10x32xf32> to vector<1x8x8x32xf32>
    %64 = vector.extract_strided_slice %58 {offsets = [0, 1, 2, 0], sizes = [1, 8, 8, 32], strides = [1, 1, 1, 1]} : vector<1x10x10x32xf32> to vector<1x8x8x32xf32>
    %65 = vector.extract_strided_slice %58 {offsets = [0, 2, 0, 0], sizes = [1, 8, 8, 32], strides = [1, 1, 1, 1]} : vector<1x10x10x32xf32> to vector<1x8x8x32xf32>
    %66 = vector.extract_strided_slice %58 {offsets = [0, 2, 1, 0], sizes = [1, 8, 8, 32], strides = [1, 1, 1, 1]} : vector<1x10x10x32xf32> to vector<1x8x8x32xf32>
    %67 = vector.extract_strided_slice %58 {offsets = [0, 2, 2, 0], sizes = [1, 8, 8, 32], strides = [1, 1, 1, 1]} : vector<1x10x10x32xf32> to vector<1x8x8x32xf32>
    %68 = tpu.concatenate %59, %60, %61, %62, %63, %64, %65, %66, %67 in 3 : vector<1x8x8x32xf32>, vector<1x8x8x32xf32>, vector<1x8x8x32xf32>, vector<1x8x8x32xf32>, vector<1x8x8x32xf32>, vector<1x8x8x32xf32>, vector<1x8x8x32xf32>, vector<1x8x8x32xf32>, vector<1x8x8x32xf32> -> vector<1x8x8x288xf32>
    %69 = vector.shape_cast %68 : vector<1x8x8x288xf32> to vector<64x288xf32>
    %70 = arith.truncf %69 : vector<64x288xf32> to vector<64x288xbf16>
    %cst_28 = arith.constant dense<0.000000e+00> : vector<64x32xf32>
    %71 = tpu.matmul %70, %52, %cst_28 {dimension_numbers = #tpu.dot_dimension_numbers<[1], [0], [0], [1], [0, 0, 1, 1], [], []>} : vector<64x288xbf16>, vector<288x32xbf16>, vector<64x32xf32> -> vector<64x32xf32>
    %72 = vector.broadcast %54 : vector<1x32xf32> to vector<64x32xf32>
    %73 = arith.addf %71, %72 : vector<64x32xf32>
    %74 = vector.shape_cast %24 : vector<1x8x8x32xf32> to vector<64x32xf32>
    %75 = arith.addf %73, %74 : vector<64x32xf32>
    %cst_29 = arith.constant 0.000000e+00 : f32
    %76 = vector.broadcast %cst_29 : f32 to vector<64x32xf32>
    %77 = arith.maximumf %75, %76 : vector<64x32xf32>
    %78 = vector.shape_cast %77 : vector<64x32xf32> to vector<1x8x8x32xf32>
    %c1 = arith.constant 1 : index
    %c0_30 = arith.constant 0 : index
    %c0_31 = arith.constant 0 : index
    %79 = vector.load %arg4[%c1, %c0_30, %c0_31] : memref<2x288x32xbf16, #tpu.memory_space<vmem>>, vector<1x288x32xbf16>
    %80 = vector.shape_cast %79 : vector<1x288x32xbf16> to vector<288x32xbf16>
    %c1_32 = arith.constant 1 : index
    %c0_33 = arith.constant 0 : index
    %c0_34 = arith.constant 0 : index
    %81 = vector.load %arg5[%c1_32, %c0_33, %c0_34] : memref<2x1x32xf32, #tpu.memory_space<vmem>>, vector<1x1x32xf32>
    %82 = vector.shape_cast %81 : vector<1x1x32xf32> to vector<1x32xf32>
    %cst_35 = arith.constant 0.000000e+00 : f32
    %83 = vector.broadcast %cst_35 : f32 to vector<1x1x8x32xf32>
    %cst_36 = arith.constant 0.000000e+00 : f32
    %84 = vector.broadcast %cst_36 : f32 to vector<1x10x1x32xf32>
    %85 = tpu.concatenate %83, %78, %83 in 1 : vector<1x1x8x32xf32>, vector<1x8x8x32xf32>, vector<1x1x8x32xf32> -> vector<1x10x8x32xf32>
    %86 = tpu.concatenate %84, %85, %84 in 2 : vector<1x10x1x32xf32>, vector<1x10x8x32xf32>, vector<1x10x1x32xf32> -> vector<1x10x10x32xf32>
    %87 = vector.extract_strided_slice %86 {offsets = [0, 0, 0, 0], sizes = [1, 8, 8, 32], strides = [1, 1, 1, 1]} : vector<1x10x10x32xf32> to vector<1x8x8x32xf32>
    %88 = vector.extract_strided_slice %86 {offsets = [0, 0, 1, 0], sizes = [1, 8, 8, 32], strides = [1, 1, 1, 1]} : vector<1x10x10x32xf32> to vector<1x8x8x32xf32>
    %89 = vector.extract_strided_slice %86 {offsets = [0, 0, 2, 0], sizes = [1, 8, 8, 32], strides = [1, 1, 1, 1]} : vector<1x10x10x32xf32> to vector<1x8x8x32xf32>
    %90 = vector.extract_strided_slice %86 {offsets = [0, 1, 0, 0], sizes = [1, 8, 8, 32], strides = [1, 1, 1, 1]} : vector<1x10x10x32xf32> to vector<1x8x8x32xf32>
    %91 = vector.extract_strided_slice %86 {offsets = [0, 1, 1, 0], sizes = [1, 8, 8, 32], strides = [1, 1, 1, 1]} : vector<1x10x10x32xf32> to vector<1x8x8x32xf32>
    %92 = vector.extract_strided_slice %86 {offsets = [0, 1, 2, 0], sizes = [1, 8, 8, 32], strides = [1, 1, 1, 1]} : vector<1x10x10x32xf32> to vector<1x8x8x32xf32>
    %93 = vector.extract_strided_slice %86 {offsets = [0, 2, 0, 0], sizes = [1, 8, 8, 32], strides = [1, 1, 1, 1]} : vector<1x10x10x32xf32> to vector<1x8x8x32xf32>
    %94 = vector.extract_strided_slice %86 {offsets = [0, 2, 1, 0], sizes = [1, 8, 8, 32], strides = [1, 1, 1, 1]} : vector<1x10x10x32xf32> to vector<1x8x8x32xf32>
    %95 = vector.extract_strided_slice %86 {offsets = [0, 2, 2, 0], sizes = [1, 8, 8, 32], strides = [1, 1, 1, 1]} : vector<1x10x10x32xf32> to vector<1x8x8x32xf32>
    %96 = tpu.concatenate %87, %88, %89, %90, %91, %92, %93, %94, %95 in 3 : vector<1x8x8x32xf32>, vector<1x8x8x32xf32>, vector<1x8x8x32xf32>, vector<1x8x8x32xf32>, vector<1x8x8x32xf32>, vector<1x8x8x32xf32>, vector<1x8x8x32xf32>, vector<1x8x8x32xf32>, vector<1x8x8x32xf32> -> vector<1x8x8x288xf32>
    %97 = vector.shape_cast %96 : vector<1x8x8x288xf32> to vector<64x288xf32>
    %98 = arith.truncf %97 : vector<64x288xf32> to vector<64x288xbf16>
    %cst_37 = arith.constant dense<0.000000e+00> : vector<64x32xf32>
    %99 = tpu.matmul %98, %80, %cst_37 {dimension_numbers = #tpu.dot_dimension_numbers<[1], [0], [0], [1], [0, 0, 1, 1], [], []>} : vector<64x288xbf16>, vector<288x32xbf16>, vector<64x32xf32> -> vector<64x32xf32>
    %100 = vector.broadcast %82 : vector<1x32xf32> to vector<64x32xf32>
    %101 = arith.addf %99, %100 : vector<64x32xf32>
    %cst_38 = arith.constant 0.000000e+00 : f32
    %102 = vector.broadcast %cst_38 : f32 to vector<64x32xf32>
    %103 = arith.maximumf %101, %102 : vector<64x32xf32>
    %104 = vector.shape_cast %103 : vector<64x32xf32> to vector<1x8x8x32xf32>
    %c1_39 = arith.constant 1 : index
    %c0_40 = arith.constant 0 : index
    %c0_41 = arith.constant 0 : index
    %105 = vector.load %arg6[%c1_39, %c0_40, %c0_41] : memref<2x288x32xbf16, #tpu.memory_space<vmem>>, vector<1x288x32xbf16>
    %106 = vector.shape_cast %105 : vector<1x288x32xbf16> to vector<288x32xbf16>
    %c1_42 = arith.constant 1 : index
    %c0_43 = arith.constant 0 : index
    %c0_44 = arith.constant 0 : index
    %107 = vector.load %arg7[%c1_42, %c0_43, %c0_44] : memref<2x1x32xf32, #tpu.memory_space<vmem>>, vector<1x1x32xf32>
    %108 = vector.shape_cast %107 : vector<1x1x32xf32> to vector<1x32xf32>
    %cst_45 = arith.constant 0.000000e+00 : f32
    %109 = vector.broadcast %cst_45 : f32 to vector<1x1x8x32xf32>
    %cst_46 = arith.constant 0.000000e+00 : f32
    %110 = vector.broadcast %cst_46 : f32 to vector<1x10x1x32xf32>
    %111 = tpu.concatenate %109, %104, %109 in 1 : vector<1x1x8x32xf32>, vector<1x8x8x32xf32>, vector<1x1x8x32xf32> -> vector<1x10x8x32xf32>
    %112 = tpu.concatenate %110, %111, %110 in 2 : vector<1x10x1x32xf32>, vector<1x10x8x32xf32>, vector<1x10x1x32xf32> -> vector<1x10x10x32xf32>
    %113 = vector.extract_strided_slice %112 {offsets = [0, 0, 0, 0], sizes = [1, 8, 8, 32], strides = [1, 1, 1, 1]} : vector<1x10x10x32xf32> to vector<1x8x8x32xf32>
    %114 = vector.extract_strided_slice %112 {offsets = [0, 0, 1, 0], sizes = [1, 8, 8, 32], strides = [1, 1, 1, 1]} : vector<1x10x10x32xf32> to vector<1x8x8x32xf32>
    %115 = vector.extract_strided_slice %112 {offsets = [0, 0, 2, 0], sizes = [1, 8, 8, 32], strides = [1, 1, 1, 1]} : vector<1x10x10x32xf32> to vector<1x8x8x32xf32>
    %116 = vector.extract_strided_slice %112 {offsets = [0, 1, 0, 0], sizes = [1, 8, 8, 32], strides = [1, 1, 1, 1]} : vector<1x10x10x32xf32> to vector<1x8x8x32xf32>
    %117 = vector.extract_strided_slice %112 {offsets = [0, 1, 1, 0], sizes = [1, 8, 8, 32], strides = [1, 1, 1, 1]} : vector<1x10x10x32xf32> to vector<1x8x8x32xf32>
    %118 = vector.extract_strided_slice %112 {offsets = [0, 1, 2, 0], sizes = [1, 8, 8, 32], strides = [1, 1, 1, 1]} : vector<1x10x10x32xf32> to vector<1x8x8x32xf32>
    %119 = vector.extract_strided_slice %112 {offsets = [0, 2, 0, 0], sizes = [1, 8, 8, 32], strides = [1, 1, 1, 1]} : vector<1x10x10x32xf32> to vector<1x8x8x32xf32>
    %120 = vector.extract_strided_slice %112 {offsets = [0, 2, 1, 0], sizes = [1, 8, 8, 32], strides = [1, 1, 1, 1]} : vector<1x10x10x32xf32> to vector<1x8x8x32xf32>
    %121 = vector.extract_strided_slice %112 {offsets = [0, 2, 2, 0], sizes = [1, 8, 8, 32], strides = [1, 1, 1, 1]} : vector<1x10x10x32xf32> to vector<1x8x8x32xf32>
    %122 = tpu.concatenate %113, %114, %115, %116, %117, %118, %119, %120, %121 in 3 : vector<1x8x8x32xf32>, vector<1x8x8x32xf32>, vector<1x8x8x32xf32>, vector<1x8x8x32xf32>, vector<1x8x8x32xf32>, vector<1x8x8x32xf32>, vector<1x8x8x32xf32>, vector<1x8x8x32xf32>, vector<1x8x8x32xf32> -> vector<1x8x8x288xf32>
    %123 = vector.shape_cast %122 : vector<1x8x8x288xf32> to vector<64x288xf32>
    %124 = arith.truncf %123 : vector<64x288xf32> to vector<64x288xbf16>
    %cst_47 = arith.constant dense<0.000000e+00> : vector<64x32xf32>
    %125 = tpu.matmul %124, %106, %cst_47 {dimension_numbers = #tpu.dot_dimension_numbers<[1], [0], [0], [1], [0, 0, 1, 1], [], []>} : vector<64x288xbf16>, vector<288x32xbf16>, vector<64x32xf32> -> vector<64x32xf32>
    %126 = vector.broadcast %108 : vector<1x32xf32> to vector<64x32xf32>
    %127 = arith.addf %125, %126 : vector<64x32xf32>
    %128 = vector.shape_cast %78 : vector<1x8x8x32xf32> to vector<64x32xf32>
    %129 = arith.addf %127, %128 : vector<64x32xf32>
    %cst_48 = arith.constant 0.000000e+00 : f32
    %130 = vector.broadcast %cst_48 : f32 to vector<64x32xf32>
    %131 = arith.maximumf %129, %130 : vector<64x32xf32>
    %132 = vector.shape_cast %131 : vector<64x32xf32> to vector<1x8x8x32xf32>
    %133 = vector.shape_cast %132 : vector<1x8x8x32xf32> to vector<64x32xf32>
    %134 = arith.truncf %133 : vector<64x32xf32> to vector<64x32xbf16>
    %c0_49 = arith.constant 0 : index
    %c0_50 = arith.constant 0 : index
    %135 = vector.load %arg8[%c0_49, %c0_50] : memref<32x6xbf16, #tpu.memory_space<vmem>>, vector<32x6xbf16>
    %cst_51 = arith.constant dense<0.000000e+00> : vector<64x6xf32>
    %136 = tpu.matmul %134, %135, %cst_51 {dimension_numbers = #tpu.dot_dimension_numbers<[1], [0], [0], [1], [0, 0, 1, 1], [], []>} : vector<64x32xbf16>, vector<32x6xbf16>, vector<64x6xf32> -> vector<64x6xf32>
    %c0_52 = arith.constant 0 : index
    %c0_53 = arith.constant 0 : index
    %137 = vector.load %arg9[%c0_52, %c0_53] : memref<1x6xf32, #tpu.memory_space<vmem>>, vector<1x6xf32>
    %138 = vector.broadcast %137 : vector<1x6xf32> to vector<64x6xf32>
    %139 = arith.addf %136, %138 : vector<64x6xf32>
    %cst_54 = arith.constant 0.000000e+00 : f32
    %140 = vector.broadcast %cst_54 : f32 to vector<64x6xf32>
    %141 = arith.maximumf %139, %140 : vector<64x6xf32>
    %c0_55 = arith.constant 0 : index
    %c0_56 = arith.constant 0 : index
    %142 = vector.load %arg11[%c0_55, %c0_56] : memref<1x192xf32, #tpu.memory_space<vmem>>, vector<1x192xf32>
    %143 = vector.extract_strided_slice %141 {offsets = [0, 0], sizes = [64, 1], strides = [1, 1]} : vector<64x6xf32> to vector<64x1xf32>
    %c0_57 = arith.constant 0 : index
    %c0_58 = arith.constant 0 : index
    %c0_59 = arith.constant 0 : index
    %144 = vector.load %arg10[%c0_57, %c0_58, %c0_59] : memref<6x64x192xf32, #tpu.memory_space<vmem>>, vector<1x64x192xf32>
    %145 = vector.shape_cast %144 : vector<1x64x192xf32> to vector<64x192xf32>
    %146 = vector.broadcast %143 : vector<64x1xf32> to vector<64x192xf32>
    %147 = arith.mulf %146, %145 : vector<64x192xf32>
    %cst_60 = arith.constant dense<0.000000e+00> : vector<192xf32>
    %148 = vector.multi_reduction <add>, %147, %cst_60 [0] : vector<64x192xf32> to vector<192xf32>
    %149 = vector.shape_cast %148 : vector<192xf32> to vector<1x192xf32>
    %150 = arith.addf %142, %149 : vector<1x192xf32>
    %151 = vector.extract_strided_slice %141 {offsets = [0, 1], sizes = [64, 1], strides = [1, 1]} : vector<64x6xf32> to vector<64x1xf32>
    %c1_61 = arith.constant 1 : index
    %c0_62 = arith.constant 0 : index
    %c0_63 = arith.constant 0 : index
    %152 = vector.load %arg10[%c1_61, %c0_62, %c0_63] : memref<6x64x192xf32, #tpu.memory_space<vmem>>, vector<1x64x192xf32>
    %153 = vector.shape_cast %152 : vector<1x64x192xf32> to vector<64x192xf32>
    %154 = vector.broadcast %151 : vector<64x1xf32> to vector<64x192xf32>
    %155 = arith.mulf %154, %153 : vector<64x192xf32>
    %cst_64 = arith.constant dense<0.000000e+00> : vector<192xf32>
    %156 = vector.multi_reduction <add>, %155, %cst_64 [0] : vector<64x192xf32> to vector<192xf32>
    %157 = vector.shape_cast %156 : vector<192xf32> to vector<1x192xf32>
    %158 = arith.addf %150, %157 : vector<1x192xf32>
    %159 = vector.extract_strided_slice %141 {offsets = [0, 2], sizes = [64, 1], strides = [1, 1]} : vector<64x6xf32> to vector<64x1xf32>
    %c2 = arith.constant 2 : index
    %c0_65 = arith.constant 0 : index
    %c0_66 = arith.constant 0 : index
    %160 = vector.load %arg10[%c2, %c0_65, %c0_66] : memref<6x64x192xf32, #tpu.memory_space<vmem>>, vector<1x64x192xf32>
    %161 = vector.shape_cast %160 : vector<1x64x192xf32> to vector<64x192xf32>
    %162 = vector.broadcast %159 : vector<64x1xf32> to vector<64x192xf32>
    %163 = arith.mulf %162, %161 : vector<64x192xf32>
    %cst_67 = arith.constant dense<0.000000e+00> : vector<192xf32>
    %164 = vector.multi_reduction <add>, %163, %cst_67 [0] : vector<64x192xf32> to vector<192xf32>
    %165 = vector.shape_cast %164 : vector<192xf32> to vector<1x192xf32>
    %166 = arith.addf %158, %165 : vector<1x192xf32>
    %167 = vector.extract_strided_slice %141 {offsets = [0, 3], sizes = [64, 1], strides = [1, 1]} : vector<64x6xf32> to vector<64x1xf32>
    %c3 = arith.constant 3 : index
    %c0_68 = arith.constant 0 : index
    %c0_69 = arith.constant 0 : index
    %168 = vector.load %arg10[%c3, %c0_68, %c0_69] : memref<6x64x192xf32, #tpu.memory_space<vmem>>, vector<1x64x192xf32>
    %169 = vector.shape_cast %168 : vector<1x64x192xf32> to vector<64x192xf32>
    %170 = vector.broadcast %167 : vector<64x1xf32> to vector<64x192xf32>
    %171 = arith.mulf %170, %169 : vector<64x192xf32>
    %cst_70 = arith.constant dense<0.000000e+00> : vector<192xf32>
    %172 = vector.multi_reduction <add>, %171, %cst_70 [0] : vector<64x192xf32> to vector<192xf32>
    %173 = vector.shape_cast %172 : vector<192xf32> to vector<1x192xf32>
    %174 = arith.addf %166, %173 : vector<1x192xf32>
    %175 = vector.extract_strided_slice %141 {offsets = [0, 4], sizes = [64, 1], strides = [1, 1]} : vector<64x6xf32> to vector<64x1xf32>
    %c4 = arith.constant 4 : index
    %c0_71 = arith.constant 0 : index
    %c0_72 = arith.constant 0 : index
    %176 = vector.load %arg10[%c4, %c0_71, %c0_72] : memref<6x64x192xf32, #tpu.memory_space<vmem>>, vector<1x64x192xf32>
    %177 = vector.shape_cast %176 : vector<1x64x192xf32> to vector<64x192xf32>
    %178 = vector.broadcast %175 : vector<64x1xf32> to vector<64x192xf32>
    %179 = arith.mulf %178, %177 : vector<64x192xf32>
    %cst_73 = arith.constant dense<0.000000e+00> : vector<192xf32>
    %180 = vector.multi_reduction <add>, %179, %cst_73 [0] : vector<64x192xf32> to vector<192xf32>
    %181 = vector.shape_cast %180 : vector<192xf32> to vector<1x192xf32>
    %182 = arith.addf %174, %181 : vector<1x192xf32>
    %183 = vector.extract_strided_slice %141 {offsets = [0, 5], sizes = [64, 1], strides = [1, 1]} : vector<64x6xf32> to vector<64x1xf32>
    %c5 = arith.constant 5 : index
    %c0_74 = arith.constant 0 : index
    %c0_75 = arith.constant 0 : index
    %184 = vector.load %arg10[%c5, %c0_74, %c0_75] : memref<6x64x192xf32, #tpu.memory_space<vmem>>, vector<1x64x192xf32>
    %185 = vector.shape_cast %184 : vector<1x64x192xf32> to vector<64x192xf32>
    %186 = vector.broadcast %183 : vector<64x1xf32> to vector<64x192xf32>
    %187 = arith.mulf %186, %185 : vector<64x192xf32>
    %cst_76 = arith.constant dense<0.000000e+00> : vector<192xf32>
    %188 = vector.multi_reduction <add>, %187, %cst_76 [0] : vector<64x192xf32> to vector<192xf32>
    %189 = vector.shape_cast %188 : vector<192xf32> to vector<1x192xf32>
    %190 = arith.addf %182, %189 : vector<1x192xf32>
    %191 = vector.shape_cast %190 : vector<1x192xf32> to vector<1x1x192xf32>
    %c0_77 = arith.constant 0 : index
    %c0_78 = arith.constant 0 : index
    %c0_79 = arith.constant 0 : index
    %192 = vector.load %arg18[%c0_77, %c0_78, %c0_79] : memref<1x1x192xf32, #tpu.memory_space<vmem>>, vector<1x1x192xf32>
    tpu.vector_store %arg18[%c0_77, %c0_78, %c0_79], %191 {strides = array<i32>} : memref<1x1x192xf32, #tpu.memory_space<vmem>>, vector<1x1x192xf32>,
    %c0_80 = arith.constant 0 : index
    %c0_81 = arith.constant 0 : index
    %193 = vector.load %arg12[%c0_80, %c0_81] : memref<32x1xbf16, #tpu.memory_space<vmem>>, vector<32x1xbf16>
    %cst_82 = arith.constant dense<0.000000e+00> : vector<64x1xf32>
    %194 = tpu.matmul %134, %193, %cst_82 {dimension_numbers = #tpu.dot_dimension_numbers<[1], [0], [0], [1], [0, 0, 1, 1], [], []>} : vector<64x32xbf16>, vector<32x1xbf16>, vector<64x1xf32> -> vector<64x1xf32>
    %c0_83 = arith.constant 0 : index
    %c0_84 = arith.constant 0 : index
    %195 = vector.load %arg13[%c0_83, %c0_84] : memref<1x1xf32, #tpu.memory_space<vmem>>, vector<1x1xf32>
    %196 = vector.broadcast %195 : vector<1x1xf32> to vector<64x1xf32>
    %197 = arith.addf %194, %196 : vector<64x1xf32>
    %cst_85 = arith.constant 0.000000e+00 : f32
    %198 = vector.broadcast %cst_85 : f32 to vector<64x1xf32>
    %199 = arith.maximumf %197, %198 : vector<64x1xf32>
    %c0_86 = arith.constant 0 : index
    %c0_87 = arith.constant 0 : index
    %200 = vector.load %arg14[%c0_86, %c0_87] : memref<64x256xf32, #tpu.memory_space<vmem>>, vector<64x256xf32>
    %201 = vector.broadcast %199 : vector<64x1xf32> to vector<64x256xf32>
    %202 = arith.mulf %201, %200 : vector<64x256xf32>
    %cst_88 = arith.constant dense<0.000000e+00> : vector<256xf32>
    %203 = vector.multi_reduction <add>, %202, %cst_88 [0] : vector<64x256xf32> to vector<256xf32>
    %204 = vector.shape_cast %203 : vector<256xf32> to vector<1x256xf32>
    %c0_89 = arith.constant 0 : index
    %c0_90 = arith.constant 0 : index
    %205 = vector.load %arg15[%c0_89, %c0_90] : memref<1x256xf32, #tpu.memory_space<vmem>>, vector<1x256xf32>
    %206 = arith.addf %204, %205 : vector<1x256xf32>
    %cst_91 = arith.constant 0.000000e+00 : f32
    %207 = vector.broadcast %cst_91 : f32 to vector<1x256xf32>
    %208 = arith.maximumf %206, %207 : vector<1x256xf32>
    %c0_92 = arith.constant 0 : index
    %c0_93 = arith.constant 0 : index
    %209 = vector.load %arg16[%c0_92, %c0_93] : memref<1x256xf32, #tpu.memory_space<vmem>>, vector<1x256xf32>
    %210 = arith.mulf %208, %209 : vector<1x256xf32>
    %cst_94 = arith.constant dense<0.000000e+00> : vector<1xf32>
    %211 = vector.multi_reduction <add>, %210, %cst_94 [1] : vector<1x256xf32> to vector<1xf32>
    %212 = vector.shape_cast %211 : vector<1xf32> to vector<1x1xf32>
    %c0_95 = arith.constant 0 : index
    %c0_96 = arith.constant 0 : index
    %213 = vector.load %arg17[%c0_95, %c0_96] : memref<1x1xf32, #tpu.memory_space<vmem>>, vector<1x1xf32>
    %214 = arith.addf %212, %213 : vector<1x1xf32>
    %215 = math.tanh %214 : vector<1x1xf32>
    %216 = vector.shape_cast %215 : vector<1x1xf32> to vector<1x1x1xf32>
    %c0_97 = arith.constant 0 : index
    %c0_98 = arith.constant 0 : index
    %c0_99 = arith.constant 0 : index
    %217 = vector.load %arg19[%c0_97, %c0_98, %c0_99] : memref<1x1x1xf32, #tpu.memory_space<vmem>>, vector<1x1x1xf32>
    tpu.vector_store %arg19[%c0_97, %c0_98, %c0_99], %216 {strides = array<i32>} : memref<1x1x1xf32, #tpu.memory_space<vmem>>, vector<1x1x1xf32>,
    return
  }
  func.func @transform_0(%arg0: i32) -> (i32, i32, i32, i32) {
    %c0_i32 = arith.constant 0 : i32
    %c0_i32_0 = arith.constant 0 : i32
    %c0_i32_1 = arith.constant 0 : i32
    %c0_i32_2 = arith.constant 0 : i32
    return %arg0, %c0_i32, %c0_i32_0, %c0_i32_1 : i32, i32, i32, i32
  }
  func.func @transform_1(%arg0: i32) -> (i32, i32) {
    %c0_i32 = arith.constant 0 : i32
    %c0_i32_0 = arith.constant 0 : i32
    %c0_i32_1 = arith.constant 0 : i32
    return %c0_i32, %c0_i32_0 : i32, i32
  }
  func.func @transform_2(%arg0: i32) -> (i32, i32) {
    %c0_i32 = arith.constant 0 : i32
    %c0_i32_0 = arith.constant 0 : i32
    %c0_i32_1 = arith.constant 0 : i32
    return %c0_i32, %c0_i32_0 : i32, i32
  }
  func.func @transform_3(%arg0: i32) -> (i32, i32, i32) {
    %c0_i32 = arith.constant 0 : i32
    %c0_i32_0 = arith.constant 0 : i32
    %c0_i32_1 = arith.constant 0 : i32
    %c0_i32_2 = arith.constant 0 : i32
    return %c0_i32, %c0_i32_0, %c0_i32_1 : i32, i32, i32
  }
  func.func @transform_4(%arg0: i32) -> (i32, i32, i32) {
    %c0_i32 = arith.constant 0 : i32
    %c0_i32_0 = arith.constant 0 : i32
    %c0_i32_1 = arith.constant 0 : i32
    %c0_i32_2 = arith.constant 0 : i32
    return %c0_i32, %c0_i32_0, %c0_i32_1 : i32, i32, i32
  }
  func.func @transform_5(%arg0: i32) -> (i32, i32, i32) {
    %c0_i32 = arith.constant 0 : i32
    %c0_i32_0 = arith.constant 0 : i32
    %c0_i32_1 = arith.constant 0 : i32
    %c0_i32_2 = arith.constant 0 : i32
    return %c0_i32, %c0_i32_0, %c0_i32_1 : i32, i32, i32
  }
  func.func @transform_6(%arg0: i32) -> (i32, i32, i32) {
    %c0_i32 = arith.constant 0 : i32
    %c0_i32_0 = arith.constant 0 : i32
    %c0_i32_1 = arith.constant 0 : i32
    %c0_i32_2 = arith.constant 0 : i32
    return %c0_i32, %c0_i32_0, %c0_i32_1 : i32, i32, i32
  }
  func.func @transform_7(%arg0: i32) -> (i32, i32) {
    %c0_i32 = arith.constant 0 : i32
    %c0_i32_0 = arith.constant 0 : i32
    %c0_i32_1 = arith.constant 0 : i32
    return %c0_i32, %c0_i32_0 : i32, i32
  }
  func.func @transform_8(%arg0: i32) -> (i32, i32) {
    %c0_i32 = arith.constant 0 : i32
    %c0_i32_0 = arith.constant 0 : i32
    %c0_i32_1 = arith.constant 0 : i32
    return %c0_i32, %c0_i32_0 : i32, i32
  }
  func.func @transform_9(%arg0: i32) -> (i32, i32, i32) {
    %c0_i32 = arith.constant 0 : i32
    %c0_i32_0 = arith.constant 0 : i32
    %c0_i32_1 = arith.constant 0 : i32
    %c0_i32_2 = arith.constant 0 : i32
    return %c0_i32, %c0_i32_0, %c0_i32_1 : i32, i32, i32
  }
  func.func @transform_10(%arg0: i32) -> (i32, i32) {
    %c0_i32 = arith.constant 0 : i32
    %c0_i32_0 = arith.constant 0 : i32
    %c0_i32_1 = arith.constant 0 : i32
    return %c0_i32, %c0_i32_0 : i32, i32
  }
  func.func @transform_11(%arg0: i32) -> (i32, i32) {
    %c0_i32 = arith.constant 0 : i32
    %c0_i32_0 = arith.constant 0 : i32
    %c0_i32_1 = arith.constant 0 : i32
    return %c0_i32, %c0_i32_0 : i32, i32
  }
  func.func @transform_12(%arg0: i32) -> (i32, i32) {
    %c0_i32 = arith.constant 0 : i32
    %c0_i32_0 = arith.constant 0 : i32
    %c0_i32_1 = arith.constant 0 : i32
    return %c0_i32, %c0_i32_0 : i32, i32
  }
  func.func @transform_13(%arg0: i32) -> (i32, i32) {
    %c0_i32 = arith.constant 0 : i32
    %c0_i32_0 = arith.constant 0 : i32
    %c0_i32_1 = arith.constant 0 : i32
    return %c0_i32, %c0_i32_0 : i32, i32
  }
  func.func @transform_14(%arg0: i32) -> (i32, i32) {
    %c0_i32 = arith.constant 0 : i32
    %c0_i32_0 = arith.constant 0 : i32
    %c0_i32_1 = arith.constant 0 : i32
    return %c0_i32, %c0_i32_0 : i32, i32
  }
  func.func @transform_15(%arg0: i32) -> (i32, i32) {
    %c0_i32 = arith.constant 0 : i32
    %c0_i32_0 = arith.constant 0 : i32
    %c0_i32_1 = arith.constant 0 : i32
    return %c0_i32, %c0_i32_0 : i32, i32
  }
  func.func @transform_16(%arg0: i32) -> (i32, i32) {
    %c0_i32 = arith.constant 0 : i32
    %c0_i32_0 = arith.constant 0 : i32
    %c0_i32_1 = arith.constant 0 : i32
    return %c0_i32, %c0_i32_0 : i32, i32
  }
  func.func @transform_17(%arg0: i32) -> (i32, i32, i32) {
    %c0_i32 = arith.constant 0 : i32
    %c0_i32_0 = arith.constant 0 : i32
    %c0_i32_1 = arith.constant 0 : i32
    return %arg0, %c0_i32, %c0_i32_0 : i32, i32, i32
  }
  func.func @transform_18(%arg0: i32) -> (i32, i32, i32) {
    %c0_i32 = arith.constant 0 : i32
    %c0_i32_0 = arith.constant 0 : i32
    %c0_i32_1 = arith.constant 0 : i32
    return %arg0, %c0_i32, %c0_i32_0 : i32, i32, i32
  }
}

</mosaic_0001>

<bundles_post_ra>
// kernel: amazons_forward.1
= control target key start
LH: loop header
LB: loop body
LE: loop exit
PB: predicated region body
PF: predicated region fallthrough
CT: control target
= control target key end

     0   :  { %s8399_s0 = inlined_call_operand.vmem [shape: f32[2,8,8,4], index: 0, kind: input, shape index: {}]   ;;  %s8400_s1 = inlined_call_operand.vmem [shape: bf16[36,32], index: 1, kind: input, shape index: {}]   ;;  %s8401_s2 = inlined_call_operand.vmem [shape: f32[1,32], index: 2, kind: input, shape index: {}]   ;;  %s8402_s3 = inlined_call_operand.vmem [shape: bf16[2,288,32], index: 3, kind: input, shape index: {}]   ;;  %s8403_s4 = inlined_call_operand.vmem [shape: f32[2,1,32], index: 4, kind: input, shape index: {}]   ;;  %s8404_s5 = inlined_call_operand.vmem [shape: bf16[2,288,32], index: 5, kind: input, shape index: {}]   ;;  %s8405_s6 = inlined_call_operand.vmem [shape: f32[2,1,32], index: 6, kind: input, shape index: {}]   ;;  %s8406_s7 = inlined_call_operand.vmem [shape: bf16[32,6], index: 7, kind: input, shape index: {}]   ;;  %s8407_s8 = inlined_call_operand.vmem [shape: f32[1,6], index: 8, kind: input, shape index: {}]   ;;  %s8408_s9 = inlined_call_operand.vmem [shape: f32[6,64,192], index: 9, kind: input, shape index: {}]   ;;  %s8409_s10 = inlined_call_operand.vmem [shape: f32[1,192], index: 10, kind: input, shape index: {}]   ;;  %s8410_s11 = inlined_call_operand.vmem [shape: bf16[32,1], index: 11, kind: input, shape index: {}]   ;;  %s8411_s12 = inlined_call_operand.<no memory space> [shape: f32[1,1], index: 12, kind: input, shape index: {}]   ;;  %s8412_s13 = inlined_call_operand.vmem [shape: f32[64,256], index: 13, kind: input, shape index: {}]   ;;  %s8413_s14 = inlined_call_operand.vmem [shape: f32[1,256], index: 14, kind: input, shape index: {}]   ;;  %s8414_s15 = inlined_call_operand.vmem [shape: f32[1,256], index: 15, kind: input, shape index: {}]   ;;  %s8415_s17 = inlined_call_operand.vmem [shape: f32[2,1,192], index: 17, kind: output, shape index: {0}]   ;;  %s8416_s18 = inlined_call_operand.vmem [shape: f32[2,1,1], index: 18, kind: output, shape index: {1}]   ;;  %s8417_s16 = inlined_call_operand.<no memory space> [shape: f32[1,1], index: 16, kind: input, shape index: {}]  }
   0x1   :  { %8419 = sst [smem:[#allocation4_spill]] %s8399_s0  ;;  %v24_v0 = vstv %s8411_s12  ;;  %v26_v1 = vstv %s8417_s16  ;;  %s6150_s0 = smov 0  }
   0x2   :  { %8420 = sst [smem:[#allocation5_spill]] %s8400_s1  ;;  %25 = vst [vmem:[#allocation2] sm:$0x1] %v24_v0  ;;  %27 = vst [vmem:[#allocation3] sm:$0x1] %v26_v1 }
   0x3   :  { %8421 = sst [smem:[#allocation6_spill]] %s8401_s2 }
   0x4 LB: > { %s4723_s19 = sadd.s32 4294967295, %s6029_s0   ;;  %p4727_p0 = scmp.ge.s32.totalorder %s6029_s0, 1  ;;  %s6029_s0 = sphi %s6150_s0, %s33_s0  }
   0x5   : > { %p519_p1 = scmp.lt.s32.totalorder %s6029_s0, 3 }
   0x7   : > { %p520_p2 = pnand %p4727_p0, %p519_p1 }
   0x8   : > { %p575_p3 = scmp.lt.s32.totalorder (!%p520_p2), %s4723_s19, 1  ;;  %vm629_vm0 = vcmask (!%p520_p2), 1040384   ;;  %v6031_v2 = vmov (!%p520_p2), 0.0   ;;  %s8422_s20 = sld [smem:[#allocation4_spill]] (!%p520_p2)  ;;  %vm713_vm1 = vcmask (!%p520_p2), 1045504   ;;  %vm664_vm2 = vcmask (!%p520_p2), 1046528  }
   0x9   : > { %523 = sbr.rel (%p520_p2) target bundleno = 2467 (0x9a3), region = 88  ;;  %v611_v3 = vrot.slane (!%p520_p2), %v6031_v2, 7  ;;  %s6032_s22 = smov (!%p520_p2), 12   ;;  %vm1024_vm3 = vcmask (!%p520_p2), 1041408   ;;  %vm914_vm4 = vcmask (!%p520_p2), 31744   ;;  %vm923_vm5 = vcmask (!%p520_p2), 64512  }
   0xa   : > { %s6033_s2 = smov (!%p520_p2), 8   ;;  %s6034_s23 = smov (!%p520_p2), 4   ;;  %vm932_vm6 = vcmask (!%p520_p2), 97280   ;;  %vm941_vm7 = vcmask (!%p520_p2), 130048   ;;  %vm950_vm8 = vcmask (!%p520_p2), 162816   ;;  %vm959_vm9 = vcmask (!%p520_p2), 195584  }
   0xb   : > { %v6161_v4 = vsel (!%p520_p2), %vm629_vm0, 0.0, %v611_v3  ;;  %v639_v5 = vsel (!%p520_p2), %vm629_vm0, %v611_v3, 0.0  ;;  %s8423_s26 = sld [smem:[#allocation5_spill]] (!%p520_p2)  ;;  %s6035_s27 = smov (!%p520_p2), 16   ;;  %vm968_vm10 = vcmask (!%p520_p2), 228352   ;;  %vm977_vm11 = vcmask (!%p520_p2), 261120  }
   0xc   : > { %v714_v6 = vrot.slane (!%p520_p2), %v6161_v4, 2  ;;  %v715_v7 = vrot.slane (!%p520_p2), %v639_v5, 2  ;;  %v665_v8 = vrot.slane (!%p520_p2), %v6161_v4, 1  ;;  %v666_v9 = vrot.slane (!%p520_p2), %v639_v5, 1  ;;  %s6036_s30 = smov (!%p520_p2), 20   ;;  %s6037_s1 = smov (!%p520_p2), 24  }
   0xd   : > { %vm1011_vm12 = vcmask (!%p520_p2), 293888   ;;  %s8424_s29 = sld [smem:[#allocation6_spill]] (!%p520_p2)  ;;  %vm1410_vm13 = vcmask (!%p520_p2), 523264   ;;  %vm1419_vm14 = vcmask (!%p520_p2), 785408  }
   0xe   : > { %v6178_v19 = vsel (!%p520_p2), %vm713_vm1, %v714_v6, %v715_v7  ;;  %v6181_v20 = vsel (!%p520_p2), %vm664_vm2, %v665_v8, %v666_v9 }
  0x10   : > { %s8426_s19 = smov (!%p575_p3, %s4723_s19), 1 }
  0x11   : > { %s5001_s12 = sshll.u32 %s8426_s19, 6  ;;  %v5942_v1 = vld [vmem:[%s8423_s26] sm:$0xff]  }
  0x12   : > { %s6170_s21 = scalar_lea.vmem %s8422_s20, %s5001_s12  ;;  %5205 = vmatprep.subr.bf16.mxu0 %v5942_v1  ;;  %s6038_s20 = smov 28  }
  0x13   : > { %v590_v10 = vld [vmem:[%s6170_s21 + $0x10] sm:$0xff]  ;;  %v591_v11 = vld [vmem:[%s6170_s21 + $0x18] sm:$0xff]  ;;  %v588_v12 = vld [vmem:[%s6170_s21] sm:$0xff]  ;;  %5206 = vmatpush3.bf16.msra.mxu0 %v5942_v1 }
  0x14   : > { %v614_v13 = vrot.slane %v590_v10, 7  ;;  %v615_v14 = vrot.slane %v591_v11, 7  ;;  %v589_v15 = vld [vmem:[%s6170_s21 + $0x8] sm:$0xff]  ;;  %v612_v16 = vrot.slane %v588_v12, 7  ;;  %v592_v17 = vld [vmem:[%s6170_s21 + $0x20] sm:$0xff]  ;;  %v594_v60 = vld [vmem:[%s6170_s21 + $0x30] sm:$0xff] }
  0x15   : > { %v613_v18 = vrot.slane %v589_v15, 7  ;;  %v616_v21 = vrot.slane %v592_v17, 7  ;;  %v593_v50 = vld [vmem:[%s6170_s21 + $0x28] sm:$0xff]  ;;  %v595_v5 = vld [vmem:[%s6170_s21 + $0x38] sm:$0xff]  ;;  %v618_v6 = vrot.slane %v594_v60, 7  ;;  %s6039_s21 = smov 32  }
  0x16   : > { %v6184_v22 = vsel %vm629_vm0, 0.0, %v614_v13  ;;  %v6187_v23 = vsel %vm629_vm0, 0.0, %v615_v14  ;;  %v6190_v24 = vsel %vm629_vm0, 0.0, %v612_v16  ;;  %v640_v25 = vsel %vm629_vm0, %v612_v16, 0.0 }
  0x17   : > { %v5323_v26 = vpack.i.bf16 %v6187_v23, %v6184_v22  ;;  %v6196_v27 = vsel %vm629_vm0, 0.0, %v613_v18  ;;  %v717_v28 = vrot.slane %v6190_v24, 2  ;;  %v718_v29 = vrot.slane %v640_v25, 2 }
  0x18   : > { %v5318_v30 = vpack.i.bf16 %v6196_v27, %v6190_v24  ;;  %v668_v31 = vrot.slane %v6190_v24, 1  ;;  %v669_v32 = vrot.slane %v640_v25, 1  ;;  %v641_v33 = vsel %vm629_vm0, %v613_v18, 0.0 }
  0x19   : > { %5324 = vrot.lane.b32.xlu1 %v5323_v26, %s6032_s22  ;;  %v6205_v34 = vsel %vm713_vm1, %v717_v28, %v718_v29  ;;  %v642_v35 = vsel %vm629_vm0, %v614_v13, 0.0  ;;  %v720_v36 = vrot.slane %v6196_v27, 2  ;;  %v721_v37 = vrot.slane %v641_v33, 2  ;;  %v5943_v13 = vld [vmem:[%s8423_s26 + $0x8] sm:$0xff]  }
  0x1a   : > { %5319 = vrot.lane.b32.xlu0 %v5318_v30, %s6032_s22  ;;  %v5338_v38 = vpack.i.bf16 %v6205_v34, %v6178_v19  ;;  %v670_v39 = vsel %vm664_vm2, %v668_v31, %v669_v32  ;;  %v723_v40 = vrot.slane %v6184_v22, 2  ;;  %v724_v41 = vrot.slane %v642_v35, 2  ;;  %5207 = vmatprep.subr.bf16.mxu0 %v5943_v13 }
  0x1b   : > { %v5328_v42 = vpack.i.bf16 %v670_v39, %v6181_v20  ;;  %v722_v43 = vsel %vm713_vm1, %v720_v36, %v721_v37  ;;  %v671_v44 = vrot.slane %v6196_v27, 1  ;;  %v672_v45 = vrot.slane %v641_v33, 1  ;;  %5208 = vmatpush3.bf16.msra.mxu0 %v5943_v13  ;;  %v5944_v36 = vld [vmem:[%s8423_s26 + $0x10] ss:$0 sps:$4 sm:$0x33]  }
  0x1c   : > { %v725_v46 = vsel %vm713_vm1, %v723_v40, %v724_v41  ;;  %v674_v47 = vrot.slane %v6184_v22, 1  ;;  %v675_v48 = vrot.slane %v642_v35, 1  ;;  %v643_v49 = vsel %vm629_vm0, %v615_v14, 0.0  ;;  %5291 = vmatprep.subr.msk.bf16.mxu0 %vm1024_vm3, %v5944_v36 }
  0x1d   : > { %5339 = vrot.lane.b32.xlu1 %v5338_v38, %s6033_s2  ;;  %v6222_v51 = vpack.i.bf16 %v725_v46, %v722_v43  ;;  %v673_v52 = vsel %vm664_vm2, %v671_v44, %v672_v45  ;;  %v677_v53 = vrot.slane %v6187_v23, 1  ;;  %v678_v54 = vrot.slane %v643_v49, 1 }
  0x1e   : > { %5329 = vrot.lane.b32.xlu0 %v5328_v42, %s6034_s23  ;;  %v676_v55 = vsel %vm664_vm2, %v674_v47, %v675_v48  ;;  %v726_v56 = vrot.slane %v6187_v23, 2  ;;  %v727_v57 = vrot.slane %v643_v49, 2  ;;  %v6236_v62 = vsel %vm629_vm0, 0.0, %v616_v21 }
  0x1f   : > { %v6229_v58 = vpack.i.bf16 %v676_v55, %v673_v52  ;;  %v679_v59 = vsel %vm664_vm2, %v677_v53, %v678_v54  ;;  %v644_v63 = vsel %vm629_vm0, %v616_v21, 0.0  ;;  %v617_v0 = vrot.slane %v593_v50, 7 }
  0x20   : > { %v5353_v61 = vpack.i.bf16 %v679_v59, %v676_v55  ;;  %v5348_v2 = vpack.i.bf16 %v673_v52, %v670_v39  ;;  %v728_v3 = vsel %vm713_vm1, %v726_v56, %v727_v57  ;;  %v680_v7 = vrot.slane %v6236_v62, 1 }
  0x21   : > { %5344 = vrot.lane.b32.xlu1 %v6222_v51, %s6033_s2  ;;  %v681_v8 = vrot.slane %v644_v63, 1  ;;  %v5363_v9 = vpack.i.bf16 %v728_v3, %v725_v46  ;;  %v6249_v10 = vsel %vm629_vm0, 0.0, %v617_v0  ;;  %v645_v11 = vsel %vm629_vm0, %v617_v0, 0.0 }
  0x22   : > { %5334 = vrot.lane.b32.xlu0 %v6229_v58, %s6034_s23  ;;  %v619_v12 = vrot.slane %v595_v5, 7  ;;  %v5358_v14 = vpack.i.bf16 %v722_v43, %v6205_v34  ;;  %v6258_v15 = vsel %vm629_vm0, 0.0, %v618_v6  ;;  %v646_v16 = vsel %vm629_vm0, %v618_v6, 0.0 }
  0x23   : > { %v729_v17 = vrot.slane %v6236_v62, 2  ;;  %v5373_v18 = vpack.i.bf16 %v6236_v62, %v6187_v23  ;;  %v730_v21 = vrot.slane %v644_v63, 2  ;;  %v683_v25 = vrot.slane %v6249_v10, 1 }
  0x24   : > { %v684_v26 = vrot.slane %v645_v11, 1  ;;  %v686_v28 = vrot.slane %v6258_v15, 1  ;;  %v687_v29 = vrot.slane %v646_v16, 1  ;;  %v732_v30 = vrot.slane %v6249_v10, 2 }
  0x25   : > { %5354 = vrot.lane.b32.xlu1 %v5353_v61, %s6035_s27  ;;  %v5368_v31 = vpack.i.bf16 %v6184_v22, %v6196_v27  ;;  %v682_v32 = vsel %vm664_vm2, %v680_v7, %v681_v8  ;;  %v733_v33 = vrot.slane %v645_v11, 2  ;;  %v638_v34 = vsel %vm629_vm0, 0.0, %v619_v12 }
  0x26   : > { %5349 = vrot.lane.b32.xlu0 %v5348_v2, %s6035_s27  ;;  %v647_v35 = vsel %vm629_vm0, %v619_v12, 0.0  ;;  %v5383_v37 = vpack.i.bf16 %v682_v32, %v679_v59  ;;  %v735_v38 = vrot.slane %v6258_v15, 2  ;;  %v736_v39 = vrot.slane %v646_v16, 2 }
  0x27   : > { %v731_v40 = vsel %vm713_vm1, %v729_v17, %v730_v21  ;;  %v788_v41 = vrot.slane %v638_v34, 1  ;;  %v789_v42 = vrot.slane %v647_v35, 1  ;;  %v815_v43 = vrot.slane %v638_v34, 2 }
  0x28   : > { %v816_v44 = vrot.slane %v647_v35, 2  ;;  %v1026_v45 = vsel %vm1024_vm3, %v5944_v36, 0  ;;  %v5393_v46 = vpack.i.bf16 %v731_v40, %v728_v3  ;;  %v685_v47 = vsel %vm664_vm2, %v683_v25, %v684_v26 }
  0x29   : > { %5364 = vrot.lane.b32.xlu1 %v5363_v9, %s6036_s30  ;;  %5210 = vmatpush3.bf16.msra.mxu0 %v1026_v45  ;;  %v688_v48 = vsel %vm664_vm2, %v686_v28, %v687_v29  ;;  %v734_v50 = vsel %vm713_vm1, %v732_v30, %v733_v33  ;;  %v737_v52 = vsel %vm713_vm1, %v735_v38, %v736_v39 }
  0x2a   : > { %5359 = vrot.lane.b32.xlu0 %v5358_v14, %s6036_s30  ;;  %v5403_v49 = vpack.i.bf16 %v688_v48, %v685_v47  ;;  %v5413_v53 = vpack.i.bf16 %v737_v52, %v734_v50  ;;  %v5423_v54 = vpack.i.bf16 %v638_v34, %v6258_v15  ;;  %v5418_v55 = vpack.i.bf16 %v6249_v10, %v6236_v62 }
  0x2b   : > { %v5428_v57 = vpack.i.bf16 %v685_v47, %v682_v32  ;;  %v5438_v60 = vpack.i.bf16 %v734_v50, %v731_v40  ;;  %v5453_v61 = vpack.i.bf16 %v6161_v4, %v638_v34  ;;  %v5448_v63 = vpack.i.bf16 %v6258_v15, %v6249_v10 }
  0x2d   : > { %5374 = vrot.lane.b32.xlu1 %v5373_v18, %s6037_s1 }
  0x2e   : > { %5369 = vrot.lane.b32.xlu0 %v5368_v31, %s6037_s1 }
  0x31   : > { %5384 = vrot.lane.b32.xlu1 %v5383_v37, %s6038_s20 }
  0x32   : > { %5379 = vrot.lane.b32.xlu0 %v6229_v58, %s6038_s20  ;;  %v817_v58 = vsel %vm713_vm1, %v815_v43, %v816_v44 }
  0x33   : > { %v5443_v59 = vpack.i.bf16 %v817_v58, %v737_v52  ;;  %v5473_v1 = vpack.i.bf16 %v6178_v19, %v817_v58 }
  0x35   : > { %5394 = vrot.lane.b32.xlu1 %v5393_v46, %s6039_s21 }
  0x36   : > { %5389 = vrot.lane.b32.xlu0 %v6222_v51, %s6039_s21  ;;  %v790_v51 = vsel %vm664_vm2, %v788_v41, %v789_v42 }
  0x37   : > { %v5433_v56 = vpack.i.bf16 %v790_v51, %v688_v48  ;;  %v5463_v0 = vpack.i.bf16 %v6181_v20, %v790_v51 }
  0x39   : > { %5404 = vrot.lane.b32.xlu1 %v5403_v49, %s6034_s23 }
  0x3a   : > { %5399 = vrot.lane.b32.xlu0 %v5383_v37, %s6034_s23  ;;  %s586_s23 = scalar_lea.vmem %s8416_s18, %s8426_s19 }
  0x3d   : > { %5414 = vrot.lane.b32.xlu1 %v5413_v53, %s6033_s2 }
  0x3e   : > { %5409 = vrot.lane.b32.xlu0 %v5393_v46, %s6033_s2 }
  0x41   : > { %5424 = vrot.lane.b32.xlu1 %v5423_v54, %s6032_s22 }
  0x42   : > { %5419 = vrot.lane.b32.xlu0 %v5418_v55, %s6032_s22 }
  0x45   : > { %5434 = vrot.lane.b32.xlu1 %v5433_v56, %s6035_s27 }
  0x46   : > { %5429 = vrot.lane.b32.xlu0 %v5428_v57, %s6035_s27 }
  0x49   : > { %5444 = vrot.lane.b32.xlu1 %v5443_v59, %s6036_s30 }
  0x4a   : > { %5439 = vrot.lane.b32.xlu0 %v5438_v60, %s6036_s30  ;;  %s4730_s30 = sshll.u32 %s8426_s19, 1 }
  0x4d   : > { %5454 = vrot.lane.b32.xlu1 %v5453_v61, %s6037_s1 }
  0x4e   : > { %5449 = vrot.lane.b32.xlu0 %v5448_v63, %s6037_s1  ;;  %s583_s1 = scalar_lea.vmem %s8415_s17, %s4730_s30 }
  0x51   : > { %5464 = vrot.lane.b32.xlu1 %v5463_v0, %s6038_s20 }
  0x52   : > { %5459 = vrot.lane.b32.xlu0 %v5403_v49, %s6038_s20  ;;  %s6041_s20 = smov 64  }
  0x55   : > { %5474 = vrot.lane.b32.xlu1 %v5473_v1, %s6039_s21 }
  0x56   : > { %5469 = vrot.lane.b32.xlu0 %v5413_v53, %s6039_s21 }
  0x8b   : > { %v5325_v2 = vpop.permute.xlu1 %5324 }
  0x8c   : > { %v5320_v3 = vpop.permute.xlu0 %5319 }
  0x8d   : > { %v5322_v37 = vunpack.i.h.bf16 %v5320_v3  ;;  %v5321_v38 = vunpack.i.l.bf16 %v5320_v3 }
  0x8f   : > { %v5340_v5 = vpop.permute.xlu1 %5339 }
  0x90   : > { %v5330_v6 = vpop.permute.xlu0 %5329  ;;  %v5342_v21 = vunpack.i.h.bf16 %v5340_v5  ;;  %v5341_v25 = vunpack.i.l.bf16 %v5340_v5 }
  0x91   : > { %v5332_v13 = vunpack.i.h.bf16 %v5330_v6  ;;  %v5331_v14 = vunpack.i.l.bf16 %v5330_v6 }
  0x93   : > { %v5345_v7 = vpop.permute.xlu1 %5344  ;;  %v916_v30 = vsel %vm914_vm4, %v6190_v24, %v5332_v13  ;;  %v915_v31 = vsel %vm914_vm4, %v6161_v4, %v5331_v14 }
  0x94   : > { %v5335_v8 = vpop.permute.xlu0 %5334  ;;  %v5347_v17 = vunpack.i.h.bf16 %v5345_v7  ;;  %v5346_v18 = vunpack.i.l.bf16 %v5345_v7  ;;  %v925_v35 = vsel %vm923_vm5, %v916_v30, %v5342_v21  ;;  %v924_v36 = vsel %vm923_vm5, %v915_v31, %v5341_v25 }
  0x95   : > { %v5337_v9 = vunpack.i.h.bf16 %v5335_v8  ;;  %v5336_v11 = vunpack.i.l.bf16 %v5335_v8  ;;  %v933_v46 = vsel %vm932_vm6, %v924_v36, %v5321_v38  ;;  %v934_v47 = vsel %vm932_vm6, %v925_v35, %v5322_v37 }
  0x97   : > { %v5355_v12 = vpop.permute.xlu1 %5354  ;;  %v918_v26 = vsel %vm914_vm4, %v6184_v22, %v5337_v9  ;;  %v917_v28 = vsel %vm914_vm4, %v6196_v27, %v5336_v11  ;;  %v5327_v22 = vunpack.i.h.bf16 %v5325_v2  ;;  %v5326_v27 = vunpack.i.l.bf16 %v5325_v2 }
  0x98   : > { %v5350_v16 = vpop.permute.xlu0 %5349  ;;  %v927_v33 = vsel %vm923_vm5, %v918_v26, %v5347_v17  ;;  %v926_v34 = vsel %vm923_vm5, %v917_v28, %v5346_v18  ;;  %v5357_v39 = vunpack.i.h.bf16 %v5355_v12  ;;  %v5356_v40 = vunpack.i.l.bf16 %v5355_v12 }
  0x99   : > { %v935_v42 = vsel %vm932_vm6, %v926_v34, %v5326_v27  ;;  %v936_v43 = vsel %vm932_vm6, %v927_v33, %v5327_v22  ;;  %v5352_v44 = vunpack.i.h.bf16 %v5350_v16  ;;  %v5351_v45 = vunpack.i.l.bf16 %v5350_v16 }
  0x9a   : > { %v944_v51 = vsel %vm941_vm7, %v935_v42, %v5356_v40  ;;  %v945_v56 = vsel %vm941_vm7, %v936_v43, %v5357_v39 }
  0x9b   : > { %v5365_v29 = vpop.permute.xlu1 %5364  ;;  %v942_v60 = vsel %vm941_vm7, %v933_v46, %v5351_v45  ;;  %v943_v61 = vsel %vm941_vm7, %v934_v47, %v5352_v44 }
  0x9c   : > { %v5360_v32 = vpop.permute.xlu0 %5359  ;;  %v5367_v48 = vunpack.i.h.bf16 %v5365_v29  ;;  %v5366_v49 = vunpack.i.l.bf16 %v5365_v29 }
  0x9d   : > { %v5362_v50 = vunpack.i.h.bf16 %v5360_v32  ;;  %v5361_v52 = vunpack.i.l.bf16 %v5360_v32 }
  0x9e   : > { %v953_v1 = vsel %vm950_vm8, %v944_v51, %v5366_v49  ;;  %v954_v2 = vsel %vm950_vm8, %v945_v56, %v5367_v48 }
  0x9f   : > { %v5375_v24 = vpop.permute.xlu1 %5374  ;;  %v951_v6 = vsel %vm950_vm8, %v942_v60, %v5361_v52  ;;  %v952_v7 = vsel %vm950_vm8, %v943_v61, %v5362_v50 }
  0xa0   : > { %v5370_v41 = vpop.permute.xlu0 %5369  ;;  %v5377_v53 = vunpack.i.h.bf16 %v5375_v24  ;;  %v5376_v54 = vunpack.i.l.bf16 %v5375_v24 }
  0xa1   : > { %v5372_v57 = vunpack.i.h.bf16 %v5370_v41  ;;  %v5371_v58 = vunpack.i.l.bf16 %v5370_v41 }
  0xa2   : > { %v962_v8 = vsel %vm959_vm9, %v953_v1, %v5376_v54  ;;  %v963_v9 = vsel %vm959_vm9, %v954_v2, %v5377_v53 }
  0xa3   : > { %v5385_v55 = vpop.permute.xlu1 %5384  ;;  %v960_v16 = vsel %vm959_vm9, %v951_v6, %v5371_v58  ;;  %v961_v17 = vsel %vm959_vm9, %v952_v7, %v5372_v57 }
  0xa4   : > { %v5380_v59 = vpop.permute.xlu0 %5379  ;;  %v5387_v63 = vunpack.i.h.bf16 %v5385_v55  ;;  %v5386_v0 = vunpack.i.l.bf16 %v5385_v55 }
  0xa5   : > { %v5382_v3 = vunpack.i.h.bf16 %v5380_v59  ;;  %v5381_v5 = vunpack.i.l.bf16 %v5380_v59 }
  0xa6   : > { %v971_v18 = vsel %vm968_vm10, %v962_v8, %v5386_v0  ;;  %v972_v21 = vsel %vm968_vm10, %v963_v9, %v5387_v63 }
  0xa7   : > { %v5395_v11 = vpop.permute.xlu1 %5394  ;;  %v969_v30 = vsel %vm968_vm10, %v960_v16, %v5381_v5  ;;  %v970_v31 = vsel %vm968_vm10, %v961_v17, %v5382_v3 }
  0xa8   : > { %v5397_v12 = vunpack.i.h.bf16 %v5395_v11  ;;  %v5396_v13 = vunpack.i.l.bf16 %v5395_v11  ;;  %v5390_v14 = vpop.permute.xlu0 %5389 }
  0xa9   : > { %v5392_v25 = vunpack.i.h.bf16 %v5390_v14  ;;  %v5391_v26 = vunpack.i.l.bf16 %v5390_v14 }
  0xaa   : > { %v980_v28 = vsel %vm977_vm11, %v971_v18, %v5396_v13  ;;  %v981_v29 = vsel %vm977_vm11, %v972_v21, %v5397_v12 }
  0xab   : > { %v5405_v32 = vpop.permute.xlu1 %5404  ;;  %v978_v33 = vsel %vm977_vm11, %v969_v30, %v5391_v26  ;;  %v979_v34 = vsel %vm977_vm11, %v970_v31, %v5392_v25  ;;  %v987_v22 = vpack.c.bf16 %v981_v29, %v980_v28 }
  0xac   : > { %v5400_v27 = vpop.permute.xlu0 %5399  ;;  %v986_v35 = vpack.c.bf16 %v979_v34, %v978_v33  ;;  %v5407_v41 = vunpack.i.h.bf16 %v5405_v32  ;;  %v5406_v42 = vunpack.i.l.bf16 %v5405_v32 }
  0xad   : > { %v5402_v43 = vunpack.i.h.bf16 %v5400_v27  ;;  %v5401_v44 = vunpack.i.l.bf16 %v5400_v27 }
  0xae   : > { %5211 = vmatprep.mubr.msk.bf16.mxu0 %vm1011_vm12, %v986_v35  ;;  %v922_v54 = vsel %vm914_vm4, %v6258_v15, %v5407_v41  ;;  %v921_v55 = vsel %vm914_vm4, %v6249_v10, %v5406_v42 }
  0xaf   : > { %5212 = vmatmul.mubr.msk.bf16.vlgmr.msra.gmra.mrb[0].mxu0 %vm1011_vm12, %v987_v22  ;;  %v5415_v36 = vpop.permute.xlu1 %5414  ;;  %v920_v57 = vsel %vm914_vm4, %v6236_v62, %v5402_v43  ;;  %v919_v58 = vsel %vm914_vm4, %v6187_v23, %v5401_v44 }
  0xb0   : > { %v5410_v24 = vpop.permute.xlu0 %5409  ;;  %v5417_v45 = vunpack.i.h.bf16 %v5415_v36  ;;  %v5416_v46 = vunpack.i.l.bf16 %v5415_v36 }
  0xb1   : > { %v5412_v48 = vunpack.i.h.bf16 %v5410_v24  ;;  %v5411_v49 = vunpack.i.l.bf16 %v5410_v24 }
  0xb2   : > { %v930_v59 = vsel %vm923_vm5, %v921_v55, %v5416_v46  ;;  %v931_v60 = vsel %vm923_vm5, %v922_v54, %v5417_v45  ;;  %v5945_v55 = vld [vmem:[%s8402_s3 + $0x80] sm:$0xff]  }
  0xb3   : > { %v5425_v37 = vpop.permute.xlu1 %5424  ;;  %v928_v63 = vsel %vm923_vm5, %v919_v58, %v5411_v49  ;;  %v929_v15 = vsel %vm923_vm5, %v920_v57, %v5412_v48  ;;  %5219 = vmatprep.subr.bf16.mxu0 %v5945_v55  ;;  %v5948_v57 = vld [vmem:[%s8402_s3] sm:$0xff]   ;;  %v5949_v58 = vld [vmem:[%s8402_s3 + $0x48] sm:$0xff]  }
  0xb4   : > { %v5420_v38 = vpop.permute.xlu0 %5419  ;;  %v5427_v52 = vunpack.i.h.bf16 %v5425_v37  ;;  %v5426_v53 = vunpack.i.l.bf16 %v5425_v37  ;;  %5220 = vmatpush3.bf16.msra.mxu0 %v5945_v55 }
  0xb5   : > { %v5422_v51 = vunpack.i.h.bf16 %v5420_v38  ;;  %v5421_v56 = vunpack.i.l.bf16 %v5420_v38 }
  0xb6   : > { %v939_v2 = vsel %vm932_vm6, %v930_v59, %v5426_v53  ;;  %v940_v3 = vsel %vm932_vm6, %v931_v60, %v5427_v52  ;;  %v5950_v59 = vld [vmem:[%s8402_s3 + $0x8] sm:$0xff]   ;;  %v5951_v60 = vld [vmem:[%s8402_s3 + $0x50] sm:$0xff]  }
  0xb7   : > { %v5435_v39 = vpop.permute.xlu1 %5434  ;;  %v937_v23 = vsel %vm932_vm6, %v928_v63, %v5421_v56  ;;  %v938_v6 = vsel %vm932_vm6, %v929_v15, %v5422_v51  ;;  %v5946_v51 = vld [vmem:[%s8402_s3 + $0x88] sm:$0xff]   ;;  %v5947_v56 = vld [vmem:[%s8402_s3 + $0x40] sm:$0xff]   ;;  %v5953_v63 = vld [vmem:[%s8402_s3 + $0x58] sm:$0xff]  }
  0xb8   : > { %v5430_v40 = vpop.permute.xlu0 %5429  ;;  %v5437_v0 = vunpack.i.h.bf16 %v5435_v39  ;;  %v5436_v1 = vunpack.i.l.bf16 %v5435_v39  ;;  %5221 = vmatprep.subr.bf16.mxu0 %v5946_v51  ;;  %5009 = vmatprep.subr.bf16.mxu1 %v5947_v56  ;;  %v6423_v15 = vld [vmem:[%s8424_s29] ss:$0 sm:$0xff]  ;;  %s6040_s29 = smov 96   ;;  %v5962_v56 = vld [vmem:[%s8402_s3 + $0x38] sm:$0xff]  }
  0xb9   : > { %v5432_v62 = vunpack.i.h.bf16 %v5430_v40  ;;  %v5431_v5 = vunpack.i.l.bf16 %v5430_v40  ;;  %5222 = vmatpush3.bf16.msra.mxu0 %v5946_v51  ;;  %5010 = vmatpush3.bf16.msra.mxu1 %v5948_v57 }
  0xba   : > { %v948_v16 = vsel %vm941_vm7, %v939_v2, %v5436_v1  ;;  %v949_v17 = vsel %vm941_vm7, %v940_v3, %v5437_v0  ;;  %5011 = vmatprep.subr.bf16.mxu1 %v5949_v58  ;;  %v5954_v1 = vld [vmem:[%s8402_s3 + $0x18] sm:$0xff]  }
  0xbb   : > { %v5445_v47 = vpop.permute.xlu1 %5444  ;;  %v946_v26 = vsel %vm941_vm7, %v937_v23, %v5431_v5  ;;  %v947_v28 = vsel %vm941_vm7, %v938_v6, %v5432_v62  ;;  %v5955_v5 = vld [vmem:[%s8402_s3 + $0x60] sm:$0xff]  }
  0xbc   : > { %v5440_v50 = vpop.permute.xlu0 %5439  ;;  %v5447_v7 = vunpack.i.h.bf16 %v5445_v47  ;;  %v5446_v8 = vunpack.i.l.bf16 %v5445_v47 }
  0xbd   : > { %v5442_v9 = vunpack.i.h.bf16 %v5440_v50  ;;  %v5441_v11 = vunpack.i.l.bf16 %v5440_v50  ;;  %5012 = vmatpush3.bf16.msra.mxu1 %v5950_v59 }
  0xbe   : > { %v957_v31 = vsel %vm950_vm8, %v948_v16, %v5446_v8  ;;  %v958_v32 = vsel %vm950_vm8, %v949_v17, %v5447_v7  ;;  %5013 = vmatprep.subr.bf16.mxu1 %v5951_v60 }
  0xbf   : > { %v5455_v61 = vpop.permute.xlu1 %5454  ;;  %v955_v22 = vsel %vm950_vm8, %v946_v26, %v5441_v11  ;;  %v956_v27 = vsel %vm950_vm8, %v947_v28, %v5442_v9  ;;  %v5956_v11 = vld [vmem:[%s8402_s3 + $0x20] sm:$0xff]   ;;  %v5957_v26 = vld [vmem:[%s8402_s3 + $0x68] sm:$0xff]  }
  0xc0   : > { %v5450_v10 = vpop.permute.xlu0 %5449  ;;  %v5457_v12 = vunpack.i.h.bf16 %v5455_v61  ;;  %v5456_v13 = vunpack.i.l.bf16 %v5455_v61  ;;  %v5952_v61 = vld [vmem:[%s8402_s3 + $0x10] sm:$0xff]  }
  0xc1   : > { %v5452_v18 = vunpack.i.h.bf16 %v5450_v10  ;;  %v5451_v21 = vunpack.i.l.bf16 %v5450_v10  ;;  %5014 = vmatpush3.bf16.msra.mxu1 %v5952_v61 }
  0xc2   : > { %v966_v35 = vsel %vm959_vm9, %v957_v31, %v5456_v13  ;;  %v967_v36 = vsel %vm959_vm9, %v958_v32, %v5457_v12  ;;  %5015 = vmatprep.subr.bf16.mxu1 %v5953_v63 }
  0xc3   : > { %v5465_v14 = vpop.permute.xlu1 %5464  ;;  %v964_v37 = vsel %vm959_vm9, %v955_v22, %v5451_v21  ;;  %v965_v38 = vsel %vm959_vm9, %v956_v27, %v5452_v18 }
  0xc4   : > { %v5460_v25 = vpop.permute.xlu0 %5459  ;;  %v5467_v29 = vunpack.i.h.bf16 %v5465_v14  ;;  %v5466_v30 = vunpack.i.l.bf16 %v5465_v14 }
  0xc5   : > { %v5462_v33 = vunpack.i.h.bf16 %v5460_v25  ;;  %v5461_v34 = vunpack.i.l.bf16 %v5460_v25  ;;  %5016 = vmatpush3.bf16.msra.mxu1 %v5954_v1 }
  0xc6   : > { %v975_v42 = vsel %vm968_vm10, %v966_v35, %v5466_v30  ;;  %v976_v43 = vsel %vm968_vm10, %v967_v36, %v5467_v29  ;;  %5017 = vmatprep.subr.bf16.mxu1 %v5955_v5 }
  0xc7   : > { %v5475_v24 = vpop.permute.xlu1 %5474  ;;  %v973_v46 = vsel %vm968_vm10, %v964_v37, %v5461_v34  ;;  %v974_v47 = vsel %vm968_vm10, %v965_v38, %v5462_v33  ;;  %v5958_v33 = vld [vmem:[%s8402_s3 + $0x28] sm:$0xff]   ;;  %v5959_v34 = vld [vmem:[%s8402_s3 + $0x70] sm:$0xff]  }
  0xc8   : > { %v5477_v39 = vunpack.i.h.bf16 %v5475_v24  ;;  %v5476_v40 = vunpack.i.l.bf16 %v5475_v24  ;;  %v5470_v41 = vpop.permute.xlu0 %5469 }
  0xc9   : > { %v5472_v44 = vunpack.i.h.bf16 %v5470_v41  ;;  %v5471_v45 = vunpack.i.l.bf16 %v5470_v41  ;;  %5018 = vmatpush3.bf16.msra.mxu1 %v5956_v11 }
  0xca   : > { %v984_v48 = vsel %vm977_vm11, %v975_v42, %v5476_v40  ;;  %v985_v49 = vsel %vm977_vm11, %v976_v43, %v5477_v39  ;;  %5019 = vmatprep.subr.bf16.mxu1 %v5957_v26 }
  0xcb   : > { %v982_v50 = vsel %vm977_vm11, %v973_v46, %v5471_v45  ;;  %v983_v52 = vsel %vm977_vm11, %v974_v47, %v5472_v44  ;;  %v989_v53 = vpack.c.bf16 %v985_v49, %v984_v48  ;;  %v5960_v44 = vld [vmem:[%s8402_s3 + $0x30] sm:$0xff]   ;;  %v5961_v45 = vld [vmem:[%s8402_s3 + $0x78] sm:$0xff]  }
  0xcc   : > { %v988_v54 = vpack.c.bf16 %v983_v52, %v982_v50 }
  0xcd   : > { %5020 = vmatpush3.bf16.msra.mxu1 %v5958_v33 }
  0xce   : > { %5215 = vmatprep.mubr.msk.bf16.mxu0 %vm1011_vm12, %v988_v54  ;;  %5021 = vmatprep.subr.bf16.mxu1 %v5959_v34 }
  0xcf   : > { %5216 = vmatmul.mubr.msk.bf16.gmra.mrb[4].mxu0 %vm1011_vm12, %v989_v53 }
  0xd1   : > { %5022 = vmatpush3.bf16.msra.mxu1 %v5960_v44 }
  0xd2   : > { %5023 = vmatprep.subr.bf16.mxu1 %v5961_v45 }
  0xd5   : > { %5024 = vmatpush3.bf16.msra.mxu1 %v5962_v56 }
 0x182   : > { %v5213_v0 = vpop.f32.mrb[0].mxu0 }
 0x183   : > { %v6429_v10 = vadd.f32 %v5213_v0, %v6423_v15  ;;  %v1062_v2 = vpop.f32.mrb[1].mxu0 }
 0x184   : > { %v6432_v3 = vadd.f32 %v6423_v15, %v1062_v2  ;;  %v5214_v62 = vpop.f32.mrb[2].mxu0 }
 0x185   : > { %v1095_v23 = vmax.f32 %v6429_v10, 0.0  ;;  %v6439_v6 = vadd.f32 %v5214_v62, %v6423_v15  ;;  %v1065_v7 = vpop.f32.mrb[3].mxu0 }
 0x186   : > { %v1093_v8 = vmax.f32 %v6432_v3, 0.0  ;;  %v6443_v9 = vadd.f32 %v6423_v15, %v1065_v7 }
 0x187   : > { %v1148_v12 = vrot.slane %v1095_v23, 7  ;;  %v1096_v13 = vmax.f32 %v6439_v6, 0.0 }
 0x188   : > { %v1146_v14 = vrot.slane %v1093_v8, 7  ;;  %v1094_v16 = vmax.f32 %v6443_v9, 0.0  ;;  %v5991_v9 = vld [vmem:[%s8402_s3 + $0xf0] sm:$0xff]  }
 0x189   : > { %v6455_v17 = vsel %vm629_vm0, 0.0, %v1148_v12  ;;  %v1149_v18 = vrot.slane %v1096_v13, 7  ;;  %v1172_v21 = vsel %vm629_vm0, %v1148_v12, 0.0 }
 0x18a   : > { %v6461_v25 = vsel %vm629_vm0, 0.0, %v1146_v14  ;;  %v1170_v28 = vsel %vm629_vm0, %v1146_v14, 0.0  ;;  %v1243_v30 = vrot.slane %v6455_v17, 2  ;;  %v1147_v32 = vrot.slane %v1094_v16, 7 }
 0x18b   : > { %v6468_v29 = vsel %vm629_vm0, 0.0, %v1149_v18  ;;  %v6472_v31 = vsel %vm629_vm0, %v1149_v18, 0.0  ;;  %v1244_v22 = vrot.slane %v1172_v21, 2  ;;  %v1192_v27 = vrot.slane %v6461_v25, 1 }
 0x18c   : > { %v1247_v35 = vrot.slane %v6472_v31, 2  ;;  %v5478_v36 = vpack.i.bf16 %v6468_v29, %v6455_v17  ;;  %v1193_v24 = vrot.slane %v1170_v28, 1  ;;  %v6487_v37 = vsel %vm629_vm0, 0.0, %v1147_v32 }
 0x18d   : > { %v1171_v38 = vsel %vm629_vm0, %v1147_v32, 0.0  ;;  %v1246_v39 = vrot.slane %v6468_v29, 2  ;;  %v1240_v40 = vrot.slane %v6487_v37, 2  ;;  %v5483_v42 = vpack.i.bf16 %v6455_v17, %v6487_v37 }
 0x18e   : > { %v1241_v41 = vrot.slane %v1171_v38, 2  ;;  %5479 = vrot.lane.b32.xlu1 %v5478_v36, %s6040_s29  ;;  %v1245_v47 = vsel %vm713_vm1, %v1243_v30, %v1244_v22  ;;  %v5488_v48 = vpack.i.bf16 %v6487_v37, %v6461_v25  ;;  %v1237_v49 = vrot.slane %v6461_v25, 2 }
 0x18f   : > { %v6496_v43 = vsel %vm713_vm1, %v1246_v39, %v1247_v35  ;;  %5484 = vrot.lane.b32.xlu0 %v5483_v42, %s6041_s20  ;;  %v1238_v50 = vrot.slane %v1170_v28, 2  ;;  %v6511_v53 = vsel %vm664_vm2, %v1192_v27, %v1193_v24  ;;  %v1196_v55 = vrot.slane %v1171_v38, 1 }
 0x190   : > { %v1242_v46 = vsel %vm713_vm1, %v1240_v40, %v1241_v41  ;;  %v5503_v54 = vpack.i.bf16 %v6496_v43, %v1245_v47  ;;  %v1195_v51 = vrot.slane %v6487_v37, 1  ;;  %v5493_v57 = vpack.i.bf16 %v6511_v53, %v6181_v20 }
 0x191   : > { %v1454_v52 = vpack.c.bf16 %v1245_v47, %v1242_v46  ;;  %v1199_v58 = vrot.slane %v1172_v21, 1  ;;  %v1239_v59 = vsel %vm713_vm1, %v1237_v49, %v1238_v50  ;;  %v1198_v60 = vrot.slane %v6455_v17, 1 }
 0x192   : > { %5489 = vrot.lane.b32.xlu1 %v5488_v48, %s6040_s29  ;;  %v5508_v61 = vpack.i.bf16 %v1242_v46, %v1239_v59  ;;  %v6527_v63 = vsel %vm664_vm2, %v1195_v51, %v1196_v55  ;;  %v5498_v0 = vpack.i.bf16 %v1239_v59, %v6178_v19  ;;  %v5523_v62 = vpack.i.bf16 %v1245_v47, %v1242_v46 }
 0x193   : > { %5223 = vmatprep.mubr.msk.bf16.mxu0 %vm977_vm11, %v1454_v52  ;;  %5504 = vrot.lane.b32.xlu0 %v5503_v54, %s6039_s21  ;;  %v6532_v1 = vsel %vm664_vm2, %v1198_v60, %v1199_v58  ;;  %v1202_v39 = vrot.slane %v6472_v31, 1  ;;  %v1201_v42 = vrot.slane %v6468_v29, 1 }
 0x194   : > { %v5513_v2 = vpack.i.bf16 %v6532_v1, %v6527_v63 }
 0x196   : > { %5494 = vrot.lane.b32.xlu1 %v5493_v57, %s6039_s21 }
 0x197   : > { %5509 = vrot.lane.b32.xlu0 %v5508_v61, %s6039_s21 }
 0x19a   : > { %5499 = vrot.lane.b32.xlu1 %v5498_v0, %s6041_s20 }
 0x19b   : > { %5514 = vrot.lane.b32.xlu0 %v5513_v2, %s6040_s29 }
 0x19e   : > { %5519 = vrot.lane.b32.xlu1 %v5513_v2, %s6039_s21 }
 0x1a2   : > { %v5217_v5 = vpop.f32.mrb[4].mxu0  ;;  %5524 = vrot.lane.b32.xlu1 %v5523_v62, %s6041_s20 }
 0x1a3   : > { %v6540_v7 = vadd.f32 %v5217_v5, %v6423_v15  ;;  %v1078_v11 = vpop.f32.mrb[5].mxu0  ;;  %v6602_v5 = vsel %vm664_vm2, %v1201_v42, %v1202_v39 }
 0x1a4   : > { %v6544_v12 = vadd.f32 %v6423_v15, %v1078_v11  ;;  %v5218_v14 = vpop.f32.mrb[6].mxu0 }
 0x1a5   : > { %v1099_v18 = vmax.f32 %v6540_v7, 0.0  ;;  %v6548_v21 = vadd.f32 %v5218_v14, %v6423_v15  ;;  %v1081_v26 = vpop.f32.mrb[7].mxu0 }
 0x1a6   : > { %v1097_v28 = vmax.f32 %v6544_v12, 0.0  ;;  %v6552_v30 = vadd.f32 %v6423_v15, %v1081_v26 }
 0x1a7   : > { %v1152_v32 = vrot.slane %v1099_v18, 7  ;;  %v1100_v33 = vmax.f32 %v6548_v21, 0.0 }
 0x1a8   : > { %v1150_v34 = vrot.slane %v1097_v28, 7  ;;  %v1098_v27 = vmax.f32 %v6552_v30, 0.0 }
 0x1a9   : > { %v1153_v22 = vrot.slane %v1100_v33, 7  ;;  %v6566_v36 = vsel %vm629_vm0, 0.0, %v1152_v32  ;;  %v1176_v15 = vsel %vm629_vm0, %v1152_v32, 0.0 }
 0x1aa   : > { %v6563_v35 = vsel %vm629_vm0, 0.0, %v1150_v34  ;;  %v1174_v24 = vsel %vm629_vm0, %v1150_v34, 0.0  ;;  %v1151_v46 = vrot.slane %v1098_v27, 7  ;;  %v1255_v48 = vrot.slane %v6566_v36, 2 }
 0x1ab   : > { %v1249_v38 = vrot.slane %v6563_v35, 2  ;;  %v1250_v40 = vrot.slane %v1174_v24, 2  ;;  %v1169_v41 = vsel %vm629_vm0, 0.0, %v1153_v22  ;;  %v1205_v44 = vrot.slane %v1174_v24, 1 }
 0x1ac   : > { %v1177_v45 = vsel %vm629_vm0, %v1153_v22, 0.0  ;;  %v5528_v47 = vpack.i.bf16 %v6563_v35, %v6468_v29  ;;  %v1256_v49 = vrot.slane %v1176_v15, 2  ;;  %v1204_v31 = vrot.slane %v6563_v35, 1 }
 0x1ad   : > { %v1251_v50 = vsel %vm713_vm1, %v1249_v38, %v1250_v40  ;;  %v1319_v54 = vrot.slane %v1169_v41, 2  ;;  %v6584_v55 = vsel %vm629_vm0, 0.0, %v1151_v46  ;;  %v1175_v51 = vsel %vm629_vm0, %v1151_v46, 0.0 }
 0x1ae   : > { %v1457_v52 = vpack.c.bf16 %v1251_v50, %v6496_v43  ;;  %5529 = vrot.lane.b32.xlu0 %v5528_v47, %s6041_s20  ;;  %v1320_v56 = vrot.slane %v1177_v45, 2  ;;  %v1252_v57 = vrot.slane %v6584_v55, 2  ;;  %v1253_v58 = vrot.slane %v1175_v51, 2 }
 0x1af   : > { %v5538_v59 = vpack.i.bf16 %v6584_v55, %v6563_v35  ;;  %v5533_v60 = vpack.i.bf16 %v6566_v36, %v6584_v55  ;;  %v6595_v61 = vsel %vm664_vm2, %v1204_v31, %v1205_v44  ;;  %v1257_v2 = vsel %vm713_vm1, %v1255_v48, %v1256_v49 }
 0x1b0   : > { %5224 = vmatmul.mubr.msk.bf16.vlgmr.msra.gmra.mrb[8].mxu0 %vm977_vm11, %v1457_v52  ;;  %v1254_v0 = vsel %vm713_vm1, %v1252_v57, %v1253_v58  ;;  %v5548_v11 = vpack.i.bf16 %v6595_v61, %v6602_v5  ;;  %v1321_v14 = vsel %vm713_vm1, %v1319_v54, %v1320_v56  ;;  %v1208_v26 = vrot.slane %v1175_v51, 1 }
 0x1b1   : > { %5539 = vrot.lane.b32.xlu1 %v5538_v59, %s6040_s29  ;;  %v1460_v62 = vpack.c.bf16 %v1257_v2, %v1254_v0  ;;  %v1207_v32 = vrot.slane %v6584_v55, 1  ;;  %v1211_v34 = vrot.slane %v1176_v15, 1  ;;  %v1463_v22 = vpack.c.bf16 %v6178_v19, %v1321_v14 }
 0x1b2   : > { %5534 = vrot.lane.b32.xlu0 %v5533_v60, %s6041_s20  ;;  %v1210_v24 = vrot.slane %v6566_v36, 1  ;;  %v5553_v38 = vpack.i.bf16 %v1251_v50, %v6496_v43  ;;  %v5558_v39 = vpack.i.bf16 %v1321_v14, %v1257_v2  ;;  %v5563_v44 = vpack.i.bf16 %v1254_v0, %v1251_v50 }
 0x1b3   : > { %5227 = vmatprep.mubr.msk.bf16.mxu0 %vm977_vm11, %v1460_v62  ;;  %v6616_v40 = vsel %vm664_vm2, %v1207_v32, %v1208_v26  ;;  %v5588_v43 = vpack.i.bf16 %v1257_v2, %v1254_v0  ;;  %v1308_v46 = vrot.slane %v1169_v41, 1  ;;  %v1309_v47 = vrot.slane %v1177_v45, 1 }
 0x1b4   : > { %v6621_v15 = vsel %vm664_vm2, %v1210_v24, %v1211_v34  ;;  %v5593_v48 = vpack.i.bf16 %v1169_v41, %v6566_v36  ;;  %v5573_v49 = vpack.i.bf16 %v6161_v4, %v1169_v41 }
 0x1b5   : > { %5549 = vrot.lane.b32.xlu1 %v5548_v11, %s6039_s21  ;;  %v5583_v42 = vpack.i.bf16 %v6621_v15, %v6616_v40  ;;  %v6633_v31 = vsel %vm664_vm2, %v1308_v46, %v1309_v47 }
 0x1b6   : > { %5544 = vrot.lane.b32.xlu0 %v5548_v11, %s6040_s29  ;;  %v5578_v50 = vpack.i.bf16 %v6181_v20, %v6633_v31 }
 0x1b8   : > { %5228 = vmatmul.mubr.msk.bf16.gmra.mrb[12].mxu0 %vm977_vm11, %v1463_v22 }
 0x1b9   : > { %5554 = vrot.lane.b32.xlu1 %v5553_v38, %s6041_s20 }
 0x1ba   : > { %5559 = vrot.lane.b32.xlu0 %v5558_v39, %s6039_s21 }
 0x1bd   : > { %5584 = vrot.lane.b32.xlu1 %v5583_v42, %s6039_s21 }
 0x1be   : > { %5564 = vrot.lane.b32.xlu0 %v5563_v44, %s6039_s21 }
 0x1c1   : > { %5589 = vrot.lane.b32.xlu1 %v5588_v43, %s6041_s20 }
 0x1c2   : > { %5569 = vrot.lane.b32.xlu0 %v5583_v42, %s6040_s29 }
 0x1c5   : > { %5594 = vrot.lane.b32.xlu1 %v5593_v48, %s6040_s29 }
 0x1c6   : > { %5574 = vrot.lane.b32.xlu0 %v5573_v49, %s6041_s20 }
 0x1ca   : > { %5579 = vrot.lane.b32.xlu0 %v5578_v50, %s6040_s29 }
 0x200   : > { %v6639_v45 = vpop.permute.xlu1 %5479 }
 0x201   : > { %v5485_v52 = vpop.permute.xlu0 %5484 }
 0x202   : > { %v5487_v0 = vunpack.i.h.bf16 %v5485_v52  ;;  %v5486_v2 = vunpack.i.l.bf16 %v5485_v52 }
 0x204   : > { %v5490_v54 = vpop.permute.xlu1 %5489 }
 0x205   : > { %v5505_v51 = vpop.permute.xlu0 %5504  ;;  %v5492_v32 = vunpack.i.h.bf16 %v5490_v54  ;;  %v5491_v34 = vunpack.i.l.bf16 %v5490_v54 }
 0x208   : > { %v5495_v56 = vpop.permute.xlu1 %5494 }
 0x209   : > { %v5497_v57 = vunpack.i.h.bf16 %v5495_v56  ;;  %v5496_v41 = vunpack.i.l.bf16 %v5495_v56  ;;  %v5510_v58 = vpop.permute.xlu0 %5509 }
 0x20a   : > { %v5512_v59 = vunpack.i.h.bf16 %v5510_v58  ;;  %v5511_v60 = vunpack.i.l.bf16 %v5510_v58 }
 0x20b   : > { %v1403_v22 = vsel %vm977_vm11, %v6461_v25, %v5497_v57  ;;  %v1402_v24 = vsel %vm977_vm11, %v6161_v4, %v5496_v41 }
 0x20c   : > { %v5500_v62 = vpop.permute.xlu1 %5499  ;;  %v1428_v14 = vsel %vm977_vm11, %v6511_v53, %v5511_v60  ;;  %v1429_v26 = vsel %vm977_vm11, %v6527_v63, %v5512_v59 }
 0x20d   : > { %v5502_v11 = vunpack.i.h.bf16 %v5500_v62  ;;  %v5501_v20 = vunpack.i.l.bf16 %v5500_v62  ;;  %v5515_v38 = vpop.permute.xlu0 %5514  ;;  %v1436_v53 = vsel %vm1410_vm13, %v1428_v14, %v5486_v2  ;;  %v1437_v63 = vsel %vm1410_vm13, %v1429_v26, %v5487_v0 }
 0x20e   : > { %v5517_v42 = vunpack.i.h.bf16 %v5515_v38  ;;  %v5516_v44 = vunpack.i.l.bf16 %v5515_v38  ;;  %v5507_v0 = vunpack.i.h.bf16 %v5505_v51  ;;  %v5506_v2 = vunpack.i.l.bf16 %v5505_v51 }
 0x20f   : > { %v6650_v39 = vsel %vm1410_vm13, %v1402_v24, %v5501_v20  ;;  %v1412_v43 = vsel %vm1410_vm13, %v1403_v22, %v5502_v11  ;;  %v5482_v22 = vunpack.i.h.bf16 %v6639_v45  ;;  %v5481_v24 = vunpack.i.l.bf16 %v6639_v45 }
 0x210   : > { %v1420_v46 = vsel %vm1419_vm14, %v6650_v39, %v5491_v34  ;;  %v1421_v25 = vsel %vm1419_vm14, %v1412_v43, %v5492_v32  ;;  %v1444_v47 = vsel %vm1419_vm14, %v1436_v53, %v5516_v44  ;;  %v1445_v4 = vsel %vm1419_vm14, %v1437_v63, %v5517_v42  ;;  %v5520_v50 = vpop.permute.xlu1 %5519 }
 0x211   : > { %v1453_v48 = vpack.c.bf16 %v1445_v4, %v1444_v47  ;;  %v1452_v49 = vpack.c.bf16 %v1421_v25, %v1420_v46  ;;  %v5522_v56 = vunpack.i.h.bf16 %v5520_v50  ;;  %v5521_v57 = vunpack.i.l.bf16 %v5520_v50 }
 0x212   : > { %v1431_v51 = vsel %vm977_vm11, %v6602_v5, %v5507_v0 }
 0x213   : > { %1622 = vmatprep.mubr.bf16.mxu1 %v1453_v48  ;;  %v1405_v62 = vsel %vm977_vm11, %v6455_v17, %v5522_v56  ;;  %v1404_v11 = vsel %vm977_vm11, %v6487_v37, %v5521_v57  ;;  %v1430_v17 = vsel %vm977_vm11, %v6532_v1, %v5506_v2 }
 0x214   : > { %1623 = vmatmul.mubr.bf16.vlgmr.msra.gmra.mrb[0].mxu1 %v1452_v49  ;;  %v5525_v52 = vpop.permute.xlu1 %5524 }
 0x215   : > { %v5527_v41 = vunpack.i.h.bf16 %v5525_v52  ;;  %v5526_v58 = vunpack.i.l.bf16 %v5525_v52 }
 0x217   : > { %v1413_v32 = vsel %vm1410_vm13, %v1404_v11, %v5526_v58  ;;  %v1414_v34 = vsel %vm1410_vm13, %v1405_v62, %v5527_v41 }
 0x218   : > { %v1422_v53 = vsel %vm1419_vm14, %v1413_v32, %v5481_v24  ;;  %v1423_v63 = vsel %vm1419_vm14, %v1414_v34, %v5482_v22 }
 0x219   : > { %v1455_v4 = vpack.c.bf16 %v1423_v63, %v1422_v53 }
 0x220   : > { %v5530_v54 = vpop.permute.xlu0 %5529 }
 0x221   : > { %v5532_v20 = vunpack.i.h.bf16 %v5530_v54  ;;  %v5531_v14 = vunpack.i.l.bf16 %v5530_v54 }
 0x223   : > { %v5540_v59 = vpop.permute.xlu1 %5539  ;;  %v1438_v44 = vsel %vm1410_vm13, %v1430_v17, %v5531_v14  ;;  %v1439_v43 = vsel %vm1410_vm13, %v1431_v51, %v5532_v20 }
 0x224   : > { %v5535_v60 = vpop.permute.xlu0 %5534  ;;  %v5542_v14 = vunpack.i.h.bf16 %v5540_v59 }
 0x225   : > { %v5537_v32 = vunpack.i.h.bf16 %v5535_v60  ;;  %v5536_v34 = vunpack.i.l.bf16 %v5535_v60 }
 0x227   : > { %v5550_v26 = vpop.permute.xlu1 %5549 }
 0x228   : > { %v5545_v38 = vpop.permute.xlu0 %5544  ;;  %v5552_v48 = vunpack.i.h.bf16 %v5550_v26  ;;  %v5551_v1 = vunpack.i.l.bf16 %v5550_v26  ;;  %v5541_v26 = vunpack.i.l.bf16 %v5540_v59 }
 0x229   : > { %v5547_v42 = vunpack.i.h.bf16 %v5545_v38  ;;  %v5546_v37 = vunpack.i.l.bf16 %v5545_v38 }
 0x22a   : > { %v1407_v41 = vsel %vm977_vm11, %v6563_v35, %v5552_v48  ;;  %v1406_v58 = vsel %vm977_vm11, %v6468_v29, %v5551_v1 }
 0x22b   : > { %v5555_v46 = vpop.permute.xlu1 %5554  ;;  %v1446_v45 = vsel %vm1419_vm14, %v1438_v44, %v5546_v37  ;;  %v1447_v25 = vsel %vm1419_vm14, %v1439_v43, %v5547_v42 }
 0x22c   : > { %v5560_v47 = vpop.permute.xlu0 %5559  ;;  %v1456_v5 = vpack.c.bf16 %v1447_v25, %v1446_v45  ;;  %v5557_v49 = vunpack.i.h.bf16 %v5555_v46  ;;  %v5556_v50 = vunpack.i.l.bf16 %v5555_v46 }
 0x22d   : > { %v5562_v51 = vunpack.i.h.bf16 %v5560_v47  ;;  %v5561_v59 = vunpack.i.l.bf16 %v5560_v47 }
 0x22e   : > { %1630 = vmatprep.mubr.bf16.mxu1 %v1456_v5  ;;  %v1415_v11 = vsel %vm1410_vm13, %v1406_v58, %v5556_v50  ;;  %v1416_v20 = vsel %vm1410_vm13, %v1407_v41, %v5557_v49 }
 0x22f   : > { %v5585_v52 = vpop.permute.xlu1 %5584  ;;  %1631 = vmatmul.mubr.bf16.gmra.mrb[4].mxu1 %v1455_v4  ;;  %v1435_v1 = vsel %vm977_vm11, %v6633_v31, %v5562_v51  ;;  %v1434_v47 = vsel %vm977_vm11, %v6621_v15, %v5561_v59 }
 0x230   : > { %v5565_v54 = vpop.permute.xlu0 %5564  ;;  %v5587_v44 = vunpack.i.h.bf16 %v5585_v52  ;;  %v5586_v60 = vunpack.i.l.bf16 %v5585_v52 }
 0x231   : > { %v5567_v56 = vunpack.i.h.bf16 %v5565_v54  ;;  %v5566_v57 = vunpack.i.l.bf16 %v5565_v54 }
 0x232   : > { %v1409_v49 = vsel %vm977_vm11, %v6566_v36, %v5587_v44  ;;  %v1408_v50 = vsel %vm977_vm11, %v6584_v55, %v5586_v60 }
 0x233   : > { %v1433_v0 = vsel %vm977_vm11, %v6616_v40, %v5567_v56  ;;  %v1432_v2 = vsel %vm977_vm11, %v6595_v61, %v5566_v57  ;;  %v5590_v62 = vpop.permute.xlu1 %5589  ;;  %v1424_v40 = vsel %vm1419_vm14, %v1415_v11, %v5541_v26  ;;  %v1425_v61 = vsel %vm1419_vm14, %v1416_v20, %v5542_v14 }
 0x234   : > { %v5570_v22 = vpop.permute.xlu0 %5569  ;;  %v1440_v29 = vsel %vm1410_vm13, %v1432_v2, %v5536_v34  ;;  %v1441_v38 = vsel %vm1410_vm13, %v1433_v0, %v5537_v32  ;;  %v5592_v63 = vunpack.i.h.bf16 %v5590_v62  ;;  %v5591_v46 = vunpack.i.l.bf16 %v5590_v62 }
 0x235   : > { %v5572_v35 = vunpack.i.h.bf16 %v5570_v22  ;;  %v5571_v24 = vunpack.i.l.bf16 %v5570_v22  ;;  %v1458_v45 = vpack.c.bf16 %v1425_v61, %v1424_v40  ;;  %v6737_v40 = vld [vmem:[%s8403_s4] ss:$0 sm:$0xff] }
 0x236   : > { %v1417_v57 = vsel %vm1410_vm13, %v1408_v50, %v5591_v46  ;;  %v1418_v41 = vsel %vm1410_vm13, %v1409_v49, %v5592_v63  ;;  %v5968_v49 = vld [vmem:[%s8404_s5 + $0x8] sm:$0xff]  }
 0x237   : > { %v5595_v17 = vpop.permute.xlu1 %5594  ;;  %v1448_v42 = vsel %vm1419_vm14, %v1440_v29, %v5571_v24  ;;  %v1449_v37 = vsel %vm1419_vm14, %v1441_v38, %v5572_v35  ;;  %v5963_v24 = vld [vmem:[%s8404_s5 + $0x80] sm:$0xff]   ;;  %v5964_v29 = vld [vmem:[%s8404_s5 + $0x88] sm:$0xff]  }
 0x238   : > { %v5575_v43 = vpop.permute.xlu0 %5574  ;;  %v1459_v53 = vpack.c.bf16 %v1449_v37, %v1448_v42  ;;  %v5597_v25 = vunpack.i.h.bf16 %v5595_v17  ;;  %v5596_v5 = vunpack.i.l.bf16 %v5595_v17  ;;  %5231 = vmatprep.subr.bf16.mxu1 %v5963_v24 }
 0x239   : > { %v6694_v4 = vunpack.i.h.bf16 %v5575_v43  ;;  %v5576_v48 = vunpack.i.l.bf16 %v5575_v43  ;;  %5232 = vmatpush3.bf16.msra.mxu1 %v5963_v24 }
 0x23a   : > { %1638 = vmatprep.mubr.bf16.mxu1 %v1459_v53  ;;  %v1426_v15 = vsel %vm1419_vm14, %v1417_v57, %v5596_v5  ;;  %v1427_v36 = vsel %vm1419_vm14, %v1418_v41, %v5597_v25  ;;  %5233 = vmatprep.subr.bf16.mxu1 %v5964_v29  ;;  %v5966_v25 = vld [vmem:[%s8404_s5] sm:$0xff]   ;;  %v5967_v5 = vld [vmem:[%s8404_s5 + $0x48] sm:$0xff]   ;;  %v5969_v41 = vld [vmem:[%s8404_s5 + $0x50] sm:$0xff]  }
 0x23b   : > { %1639 = vmatmul.mubr.bf16.gmra.mrb[8].mxu1 %v1458_v45  ;;  %v1442_v58 = vsel %vm1410_vm13, %v1434_v47, %v5576_v48  ;;  %v1443_v31 = vsel %vm1410_vm13, %v1435_v1, %v6694_v4  ;;  %v1461_v62 = vpack.c.bf16 %v1427_v36, %v1426_v15  ;;  %v5965_v45 = vld [vmem:[%s8404_s5 + $0x40] sm:$0xff]   ;;  %v5970_v36 = vld [vmem:[%s8404_s5 + $0x10] sm:$0xff]  }
 0x23c   : > { %v5580_v52 = vpop.permute.xlu0 %5579  ;;  %5055 = vmatprep.subr.bf16.mxu0 %v5965_v45 }
 0x23d   : > { %v6704_v54 = vunpack.i.h.bf16 %v5580_v52  ;;  %v5581_v56 = vunpack.i.l.bf16 %v5580_v52  ;;  %5234 = vmatpush3.bf16.msra.mxu1 %v5964_v29  ;;  %5056 = vmatpush3.bf16.msra.mxu0 %v5966_v25 }
 0x23e   : > { %5057 = vmatprep.subr.bf16.mxu0 %v5967_v5 }
 0x23f   : > { %v1450_v0 = vsel %vm1419_vm14, %v1442_v58, %v5581_v56  ;;  %v1451_v55 = vsel %vm1419_vm14, %v1443_v31, %v6704_v54 }
 0x240   : > { %v1462_v2 = vpack.c.bf16 %v1451_v55, %v1450_v0 }
 0x241   : > { %5058 = vmatpush3.bf16.msra.mxu0 %v5968_v49 }
 0x242   : > { %1646 = vmatprep.mubr.bf16.mxu1 %v1462_v2  ;;  %5059 = vmatprep.subr.bf16.mxu0 %v5969_v41  ;;  %v5971_v2 = vld [vmem:[%s8404_s5 + $0x58] sm:$0xff]  }
 0x243   : > { %1647 = vmatmul.mubr.bf16.gmra.mrb[12].mxu1 %v1461_v62 }
 0x245   : > { %5060 = vmatpush3.bf16.msra.mxu0 %v5970_v36 }
 0x246   : > { %5061 = vmatprep.subr.bf16.mxu0 %v5971_v2 }
 0x283   : > { %v6716_v11 = vpop.f32.mrb[8].mxu0 }
 0x284   : > { %v1689_v20 = vpop.f32.mrb[9].mxu0 }
 0x285   : > { %v6718_v14 = vpop.f32.mrb[10].mxu0 }
 0x286   : > { %v1692_v26 = vpop.f32.mrb[11].mxu0 }
 0x28b   : > { %v6720_v32 = vpop.f32.mrb[12].mxu0 }
 0x28c   : > { %v6722_v34 = vpop.f32.mrb[13].mxu0 }
 0x28d   : > { %v6724_v22 = vpop.f32.mrb[14].mxu0 }
 0x28e   : > { %v6726_v35 = vpop.f32.mrb[15].mxu0 }
 0x2e7   : > { %v5025_v38 = vpop.f32.mrb[0].mxu1 }
 0x2e8   : > { %v5026_v61 = vpop.f32.mrb[1].mxu1 }
 0x2e9   : > { %v5027_v51 = vadd.f32 %v5026_v61, %v5025_v38  ;;  %v5028_v17 = vpop.f32.mrb[2].mxu1  ;;  %v5973_v61 = vld [vmem:[%s8404_s5 + $0x60] sm:$0xff]  }
 0x2ea   : > { %v5029_v42 = vpop.f32.mrb[3].mxu1 }
 0x2eb   : > { %v1625_v37 = vadd.f32 %v5027_v51, %v6737_v40  ;;  %v5030_v59 = vadd.f32 %v5029_v42, %v5028_v17 }
 0x2ed   : > { %v1690_v44 = vadd.f32 %v1689_v20, %v1625_v37  ;;  %v1628_v60 = vadd.f32 %v5030_v59, %v6737_v40  ;;  %v5972_v20 = vld [vmem:[%s8404_s5 + $0x18] sm:$0xff]   ;;  %v5974_v37 = vld [vmem:[%s8404_s5 + $0x20] sm:$0xff]  }
 0x2ee   : > { %5062 = vmatpush3.bf16.msra.mxu0 %v5972_v20 }
 0x2ef   : > { %v1720_v43 = vmax.f32 %v1690_v44, 0.0  ;;  %v1693_v53 = vadd.f32 %v1692_v26, %v1628_v60  ;;  %5063 = vmatprep.subr.bf16.mxu0 %v5973_v61  ;;  %v5975_v60 = vld [vmem:[%s8404_s5 + $0x68] sm:$0xff]  }
 0x2f1   : > { %v1773_v63 = vrot.slane %v1720_v43, 7  ;;  %v1721_v46 = vmax.f32 %v1693_v53, 0.0 }
 0x2f2   : > { %5064 = vmatpush3.bf16.msra.mxu0 %v5974_v37 }
 0x2f3   : > { %v6751_v48 = vsel %vm629_vm0, 0.0, %v1773_v63  ;;  %v6754_v1 = vsel %vm629_vm0, %v1773_v63, 0.0  ;;  %v1774_v47 = vrot.slane %v1721_v46, 7  ;;  %5065 = vmatprep.subr.bf16.mxu0 %v5975_v60  ;;  %v5976_v63 = vld [vmem:[%s8404_s5 + $0x28] sm:$0xff]  }
 0x2f4   : > { %v1862_v50 = vrot.slane %v6754_v1, 2  ;;  %v1861_v57 = vrot.slane %v6751_v48, 2 }
 0x2f5   : > { %v6761_v52 = vsel %vm629_vm0, 0.0, %v1774_v47  ;;  %v6764_v56 = vsel %vm629_vm0, %v1774_v47, 0.0 }
 0x2f6   : > { %v1865_v58 = vrot.slane %v6764_v56, 2  ;;  %v5598_v31 = vpack.i.bf16 %v6761_v52, %v6751_v48  ;;  %v1864_v15 = vrot.slane %v6761_v52, 2  ;;  %v1863_v0 = vsel %vm713_vm1, %v1861_v57, %v1862_v50  ;;  %5066 = vmatpush3.bf16.msra.mxu0 %v5976_v63 }
 0x2f7   : > { %v1822_v25 = vrot.slane %v6761_v52, 1 }
 0x2f8   : > { %5599 = vrot.lane.b32.xlu1 %v5598_v31, %s6040_s29  ;;  %v6780_v55 = vsel %vm713_vm1, %v1864_v15, %v1865_v58 }
 0x2f9   : > { %v5603_v62 = vpack.i.bf16 %v6780_v55, %v1863_v0 }
 0x2fb   : > { %5604 = vrot.lane.b32.xlu0 %v5603_v62, %s6039_s21 }
 0x302   : > { %v5031_v26 = vpop.f32.mrb[4].mxu1 }
 0x303   : > { %v5032_v24 = vpop.f32.mrb[5].mxu1 }
 0x304   : > { %v5033_v29 = vadd.f32 %v5032_v24, %v5031_v26  ;;  %v5034_v38 = vpop.f32.mrb[6].mxu1 }
 0x305   : > { %v5035_v51 = vpop.f32.mrb[7].mxu1 }
 0x306   : > { %v1633_v17 = vadd.f32 %v5033_v29, %v6737_v40  ;;  %v5036_v42 = vadd.f32 %v5035_v51, %v5034_v38 }
 0x308   : > { %v1698_v59 = vadd.f32 %v6716_v11, %v1633_v17  ;;  %v1636_v44 = vadd.f32 %v5036_v42, %v6737_v40  ;;  %v1823_v11 = vrot.slane %v6764_v56, 1 }
 0x30a   : > { %v1722_v43 = vmax.f32 %v1698_v59, 0.0  ;;  %v1701_v53 = vadd.f32 %v6718_v14, %v1636_v44  ;;  %v5977_v14 = vld [vmem:[%s8404_s5 + $0x70] sm:$0xff]   ;;  %v6832_v61 = vsel %vm664_vm2, %v1822_v25, %v1823_v11 }
 0x30b   : > { %5067 = vmatprep.subr.bf16.mxu0 %v5977_v14  ;;  %v5978_v59 = vld [vmem:[%s8404_s5 + $0x30] sm:$0xff]  }
 0x30c   : > { %v1775_v46 = vrot.slane %v1722_v43, 7  ;;  %v1723_v45 = vmax.f32 %v1701_v53, 0.0  ;;  %v1820_v43 = vrot.slane %v6754_v1, 1  ;;  %5068 = vmatpush3.bf16.msra.mxu0 %v5978_v59 }
 0x30e   : > { %v6809_v5 = vsel %vm629_vm0, 0.0, %v1775_v46  ;;  %v1799_v47 = vsel %vm629_vm0, %v1775_v46, 0.0  ;;  %v1776_v49 = vrot.slane %v1723_v45, 7  ;;  %v5037_v50 = vpop.f32.mrb[8].mxu1  ;;  %v1819_v46 = vrot.slane %v6751_v48, 1  ;;  %v5980_v45 = vld [vmem:[%s8404_s5 + $0x38] sm:$0xff]  }
 0x30f   : > { %v1826_v57 = vrot.slane %v1799_v47, 1  ;;  %v1867_v41 = vrot.slane %v6809_v5, 2  ;;  %v1868_v58 = vrot.slane %v1799_v47, 2  ;;  %v5038_v31 = vpop.f32.mrb[9].mxu1  ;;  %v5608_v56 = vpack.i.bf16 %v6809_v5, %v6761_v52 }
 0x310   : > { %v6819_v15 = vsel %vm629_vm0, 0.0, %v1776_v49  ;;  %v6822_v36 = vsel %vm629_vm0, %v1776_v49, 0.0  ;;  %v5039_v2 = vadd.f32 %v5038_v31, %v5037_v50  ;;  %v5040_v62 = vpop.f32.mrb[10].mxu1  ;;  %v1825_v20 = vrot.slane %v6809_v5, 1 }
 0x311   : > { %v1871_v26 = vrot.slane %v6822_v36, 2  ;;  %v5041_v24 = vpop.f32.mrb[11].mxu1  ;;  %5609 = vrot.lane.b32.xlu0 %v5608_v56, %s6041_s20  ;;  %v5613_v29 = vpack.i.bf16 %v6819_v15, %v1863_v0  ;;  %v6829_v38 = vsel %vm713_vm1, %v1867_v41, %v1868_v58  ;;  %v5979_v0 = vld [vmem:[%s8404_s5 + $0x78] sm:$0xff]   ;;  %v1870_v60 = vrot.slane %v6819_v15, 2 }
 0x312   : > { %v1641_v51 = vadd.f32 %v5039_v2, %v6737_v40  ;;  %v5042_v17 = vadd.f32 %v5041_v24, %v5040_v62  ;;  %v2064_v42 = vpack.c.bf16 %v6829_v38, %v6780_v55  ;;  %v6838_v37 = vsel %vm664_vm2, %v1825_v20, %v1826_v57  ;;  %5069 = vmatprep.subr.bf16.mxu0 %v5979_v0 }
 0x313   : > { %5614 = vrot.lane.b32.xlu1 %v5613_v29, %s6041_s20  ;;  %v5628_v44 = vpack.i.bf16 %v6838_v37, %v6832_v61  ;;  %v5618_v11 = vpack.i.bf16 %v6819_v15, %v6809_v5  ;;  %v6862_v1 = vsel %vm713_vm1, %v1870_v60, %v1871_v26  ;;  %v6869_v31 = vsel %vm664_vm2, %v1819_v46, %v1820_v43 }
 0x314   : > { %v1706_v53 = vadd.f32 %v6722_v34, %v1641_v51  ;;  %v1644_v63 = vadd.f32 %v5042_v17, %v6737_v40  ;;  %5235 = vmatprep.mubr.msk.bf16.mxu1 %vm977_vm11, %v2064_v42  ;;  %v5633_v50 = vpack.i.bf16 %v6832_v61, %v6862_v1  ;;  %5070 = vmatpush3.bf16.msra.mxu0 %v5980_v45  ;;  %v1829_v56 = vrot.slane %v6822_v36, 1 }
 0x315   : > { %5629 = vrot.lane.b32.xlu0 %v5628_v44, %s6040_s29  ;;  %v1828_v62 = vrot.slane %v6819_v15, 1 }
 0x316   : > { %v1724_v34 = vmax.f32 %v1706_v53, 0.0  ;;  %v1709_v25 = vadd.f32 %v6726_v35, %v1644_v63  ;;  %v5043_v47 = vpop.f32.mrb[12].mxu1  ;;  %v5623_v35 = vpack.i.bf16 %v6829_v38, %v6869_v31 }
 0x317   : > { %v5044_v49 = vpop.f32.mrb[13].mxu1  ;;  %5619 = vrot.lane.b32.xlu1 %v5618_v11, %s6040_s29 }
 0x318   : > { %v1777_v14 = vrot.slane %v1724_v34, 7  ;;  %v1725_v57 = vmax.f32 %v1709_v25, 0.0  ;;  %v5045_v41 = vadd.f32 %v5044_v49, %v5043_v47  ;;  %v5046_v58 = vpop.f32.mrb[14].mxu1 }
 0x319   : > { %v5047_v2 = vpop.f32.mrb[15].mxu1  ;;  %5634 = vrot.lane.b32.xlu0 %v5633_v50, %s6039_s21 }
 0x31a   : > { %v6877_v20 = vsel %vm629_vm0, 0.0, %v1777_v14  ;;  %v1801_v26 = vsel %vm629_vm0, %v1777_v14, 0.0  ;;  %v1778_v24 = vrot.slane %v1725_v57, 7  ;;  %v1649_v29 = vadd.f32 %v5045_v41, %v6737_v40 }
 0x31b   : > { %v1832_v51 = vrot.slane %v1801_v26, 1  ;;  %v1873_v17 = vrot.slane %v6877_v20, 2  ;;  %v1874_v36 = vrot.slane %v1801_v26, 2  ;;  %v5048_v42 = vadd.f32 %v5047_v2, %v5046_v58  ;;  %5624 = vrot.lane.b32.xlu1 %v5623_v35, %s6039_s21 }
 0x31c   : > { %v6884_v59 = vsel %vm629_vm0, 0.0, %v1778_v24  ;;  %v1802_v0 = vsel %vm629_vm0, %v1778_v24, 0.0  ;;  %v1714_v44 = vadd.f32 %v6720_v32, %v1649_v29  ;;  %v5638_v60 = vpack.i.bf16 %v6780_v55, %v6877_v20 }
 0x31d   : > { %v1877_v43 = vrot.slane %v1802_v0, 2  ;;  %v1652_v53 = vadd.f32 %v5048_v42, %v6737_v40  ;;  %v1875_v63 = vsel %vm713_vm1, %v1873_v17, %v1874_v36  ;;  %v5643_v11 = vpack.i.bf16 %v6884_v59, %v6829_v38 }
 0x31e   : > { %v1726_v46 = vmax.f32 %v1714_v44, 0.0  ;;  %v2067_v45 = vpack.c.bf16 %v1875_v63, %v6862_v1  ;;  %5639 = vrot.lane.b32.xlu0 %v5638_v60, %s6041_s20  ;;  %v1831_v34 = vrot.slane %v6877_v20, 1  ;;  %v1876_v25 = vrot.slane %v6884_v59, 2 }
 0x31f   : > { %v1717_v32 = vadd.f32 %v6724_v22, %v1652_v53  ;;  %5644 = vrot.lane.b32.xlu1 %v5643_v11, %s6041_s20  ;;  %v6902_v40 = vsel %vm664_vm2, %v1828_v62, %v1829_v56  ;;  %v5648_v57 = vpack.i.bf16 %v1875_v63, %v6838_v37  ;;  %v1835_v60 = vrot.slane %v1802_v0, 1 }
 0x320   : > { %v1779_v55 = vrot.slane %v1726_v46, 7  ;;  %5236 = vmatmul.mubr.msk.bf16.vlgmr.msra.gmra.mrb[16].mxu1 %vm977_vm11, %v2067_v45  ;;  %v6905_v47 = vsel %vm664_vm2, %v1831_v34, %v1832_v51  ;;  %v1878_v50 = vsel %vm713_vm1, %v1876_v25, %v1877_v43  ;;  %v1834_v53 = vrot.slane %v6884_v59, 1 }
 0x321   : > { %v1727_v49 = vmax.f32 %v1717_v32, 0.0  ;;  %v5653_v38 = vpack.i.bf16 %v6905_v47, %v6902_v40  ;;  %v5658_v2 = vpack.i.bf16 %v6902_v40, %v1878_v50 }
 0x322   : > { %v6911_v22 = vsel %vm629_vm0, 0.0, %v1779_v55  ;;  %v1803_v14 = vsel %vm629_vm0, %v1779_v55, 0.0  ;;  %v6939_v0 = vsel %vm664_vm2, %v1834_v53, %v1835_v60 }
 0x323   : > { %v1879_v41 = vrot.slane %v6911_v22, 2  ;;  %v1880_v58 = vrot.slane %v1803_v14, 2  ;;  %v1780_v56 = vrot.slane %v1727_v49, 7  ;;  %5654 = vrot.lane.b32.xlu0 %v5653_v38, %s6040_s29  ;;  %5649 = vrot.lane.b32.xlu1 %v5648_v57, %s6039_s21  ;;  %v1838_v35 = vrot.slane %v1803_v14, 1 }
 0x324   : > { %v1837_v36 = vrot.slane %v6911_v22, 1  ;;  %v5663_v46 = vpack.i.bf16 %v6862_v1, %v6911_v22  ;;  %v5678_v1 = vpack.i.bf16 %v6884_v59, %v6877_v20 }
 0x325   : > { %v1796_v62 = vsel %vm629_vm0, 0.0, %v1780_v56  ;;  %v1804_v26 = vsel %vm629_vm0, %v1780_v56, 0.0  ;;  %v1881_v24 = vsel %vm713_vm1, %v1879_v41, %v1880_v58 }
 0x326   : > { %v1940_v29 = vrot.slane %v1796_v62, 2  ;;  %v1941_v51 = vrot.slane %v1804_v26, 2  ;;  %v5668_v17 = vpack.i.bf16 %v1796_v62, %v1875_v63  ;;  %v2070_v42 = vpack.c.bf16 %v1881_v24, %v1878_v50 }
 0x327   : > { %5659 = vrot.lane.b32.xlu0 %v5658_v2, %s6039_s21  ;;  %v5688_v44 = vpack.i.bf16 %v1881_v24, %v1878_v50  ;;  %v5673_v45 = vpack.i.bf16 %v1881_v24, %v6905_v47  ;;  %v6933_v11 = vsel %vm664_vm2, %v1837_v36, %v1838_v35  ;;  %v1930_v32 = vrot.slane %v1804_v26, 1 }
 0x328   : > { %5669 = vrot.lane.b32.xlu1 %v5668_v17, %s6041_s20  ;;  %v1942_v43 = vsel %vm713_vm1, %v1940_v29, %v1941_v51  ;;  %5239 = vmatprep.mubr.msk.bf16.mxu1 %vm977_vm11, %v2070_v42  ;;  %v5683_v34 = vpack.i.bf16 %v6933_v11, %v6939_v0  ;;  %v1929_v25 = vrot.slane %v1796_v62, 1 }
 0x329   : > { %v2073_v63 = vpack.c.bf16 %v6178_v19, %v1942_v43  ;;  %v5693_v49 = vpack.i.bf16 %v6939_v0, %v1942_v43 }
 0x32a   : > { %v6949_v55 = vsel %vm664_vm2, %v1929_v25, %v1930_v32 }
 0x32b   : > { %5664 = vrot.lane.b32.xlu0 %v5663_v46, %s6041_s20  ;;  %5240 = vmatmul.mubr.msk.bf16.gmra.mrb[20].mxu1 %vm977_vm11, %v2073_v63  ;;  %v5698_v38 = vpack.i.bf16 %v6911_v22, %v6949_v55 }
 0x32c   : > { %5674 = vrot.lane.b32.xlu1 %v5673_v45, %s6039_s21 }
 0x32f   : > { %5684 = vrot.lane.b32.xlu0 %v5683_v34, %s6040_s29 }
 0x330   : > { %5679 = vrot.lane.b32.xlu1 %v5678_v1, %s6040_s29 }
 0x333   : > { %5689 = vrot.lane.b32.xlu0 %v5688_v44, %s6041_s20 }
 0x334   : > { %1852 = vrot.lane.b32.xlu1 %v6933_v11, %s6039_s21 }
 0x337   : > { %5694 = vrot.lane.b32.xlu0 %v5693_v49, %s6039_s21 }
 0x338   : > { %5699 = vrot.lane.b32.xlu1 %v5698_v38, %s6040_s29 }
 0x33b   : > { %1918 = vrot.lane.b32.xlu0 %v1796_v62, %s6040_s29 }
 0x36a   : > { %v5600_v14 = vpop.permute.xlu1 %5599 }
 0x36b   : > { %v5601_v63 = vunpack.i.l.bf16 %v5600_v14  ;;  %v5602_v34 = vunpack.i.h.bf16 %v5600_v14 }
 0x36d   : > { %v5605_v50 = vpop.permute.xlu0 %5604  ;;  %v2030_v49 = vsel %vm1419_vm14, %v6650_v39, %v5601_v63 }
 0x36e   : > { %v5607_v41 = vunpack.i.h.bf16 %v5605_v50  ;;  %v5606_v58 = vunpack.i.l.bf16 %v5605_v50 }
 0x370   : > { %v2039_v24 = vsel %vm977_vm11, %v6832_v61, %v5607_v41  ;;  %v2038_v29 = vsel %vm977_vm11, %v6869_v31, %v5606_v58 }
 0x383   : > { %v5610_v57 = vpop.permute.xlu0 %5609 }
 0x384   : > { %v5612_v56 = vunpack.i.h.bf16 %v5610_v57  ;;  %v5611_v2 = vunpack.i.l.bf16 %v5610_v57 }
 0x385   : > { %v5615_v35 = vpop.permute.xlu1 %5614 }
 0x386   : > { %v2046_v62 = vsel %vm1410_vm13, %v2038_v29, %v5611_v2  ;;  %v2047_v42 = vsel %vm1410_vm13, %v2039_v24, %v5612_v56  ;;  %v5616_v45 = vunpack.i.l.bf16 %v5615_v35 }
 0x387   : > { %v5630_v26 = vpop.permute.xlu0 %5629 }
 0x388   : > { %v5632_v51 = vunpack.i.h.bf16 %v5630_v26  ;;  %v5631_v17 = vunpack.i.l.bf16 %v5630_v26  ;;  %v5617_v26 = vunpack.i.h.bf16 %v5615_v35 }
 0x389   : > { %v5620_v36 = vpop.permute.xlu1 %5619 }
 0x38a   : > { %v2054_v44 = vsel %vm1419_vm14, %v2046_v62, %v5631_v17  ;;  %v2055_v60 = vsel %vm1419_vm14, %v2047_v42, %v5632_v51 }
 0x38b   : > { %v5635_v43 = vpop.permute.xlu0 %5634  ;;  %v2063_v53 = vpack.c.bf16 %v2055_v60, %v2054_v44 }
 0x38c   : > { %v5636_v38 = vunpack.i.l.bf16 %v5635_v43  ;;  %v5637_v41 = vunpack.i.h.bf16 %v5635_v43 }
 0x38d   : > { %v5625_v46 = vpop.permute.xlu1 %5624  ;;  %2232 = vmatprep.mubr.bf16.mxu0 %v2063_v53 }
 0x38e   : > { %v5626_v61 = vunpack.i.l.bf16 %v5625_v46  ;;  %v5627_v31 = vunpack.i.h.bf16 %v5625_v46  ;;  %v2017_v62 = vsel %vm977_vm11, %v6761_v52, %v5637_v41  ;;  %v5622_v46 = vunpack.i.h.bf16 %v5620_v36 }
 0x390   : > { %v2016_v1 = vsel %vm977_vm11, %v6751_v48, %v5626_v61  ;;  %v5640_v32 = vpop.permute.xlu0 %5639  ;;  %v2040_v14 = vsel %vm977_vm11, %v6838_v37, %v5627_v31  ;;  %v2041_v48 = vsel %vm977_vm11, %v6902_v40, %v5636_v38  ;;  %v5621_v40 = vunpack.i.l.bf16 %v5620_v36 }
 0x391   : > { %v2023_v25 = vsel %vm1410_vm13, %v2016_v1, %v5616_v45  ;;  %v5645_v57 = vpop.permute.xlu1 %5644  ;;  %v5641_v58 = vunpack.i.l.bf16 %v5640_v32  ;;  %v5642_v2 = vunpack.i.h.bf16 %v5640_v32  ;;  %v2048_v44 = vsel %vm1410_vm13, %v2040_v14, %v5617_v26 }
 0x392   : > { %v2031_v50 = vsel %vm1419_vm14, %v2023_v25, %v5602_v34  ;;  %v5646_v43 = vunpack.i.l.bf16 %v5645_v57 }
 0x393   : > { %v2062_v56 = vpack.c.bf16 %v2031_v50, %v2030_v49  ;;  %v2049_v60 = vsel %vm1410_vm13, %v2041_v48, %v5641_v58  ;;  %v2024_v53 = vsel %vm1410_vm13, %v2017_v62, %v5642_v2 }
 0x394   : > { %v2032_v1 = vsel %vm1419_vm14, %v2024_v53, %v5621_v40 }
 0x395   : > { %v5655_v24 = vpop.permute.xlu0 %5654  ;;  %2233 = vmatmul.mubr.bf16.vlgmr.msra.gmra.mrb[16].mxu0 %v2062_v56  ;;  %v5650_v17 = vpop.permute.xlu1 %5649 }
 0x396   : > { %v5657_v29 = vunpack.i.h.bf16 %v5655_v24  ;;  %v5656_v51 = vunpack.i.l.bf16 %v5655_v24  ;;  %v5651_v42 = vunpack.i.l.bf16 %v5650_v17  ;;  %v5652_v52 = vunpack.i.h.bf16 %v5650_v17 }
 0x398   : > { %v2056_v37 = vsel %vm1419_vm14, %v2048_v44, %v5656_v51  ;;  %v2057_v35 = vsel %vm1419_vm14, %v2049_v60, %v5657_v29  ;;  %v2018_v63 = vsel %vm977_vm11, %v6809_v5, %v5651_v42  ;;  %v2042_v38 = vsel %vm977_vm11, %v6905_v47, %v5652_v52 }
 0x399   : > { %v5660_v61 = vpop.permute.xlu0 %5659  ;;  %v2066_v45 = vpack.c.bf16 %v2057_v35, %v2056_v37  ;;  %v2025_v31 = vsel %vm1410_vm13, %v2018_v63, %v5646_v43  ;;  %v5647_v5 = vunpack.i.h.bf16 %v5645_v57 }
 0x39a   : > { %v5670_v34 = vpop.permute.xlu1 %5669  ;;  %v2033_v32 = vsel %vm1419_vm14, %v2025_v31, %v5622_v46  ;;  %v5661_v36 = vunpack.i.l.bf16 %v5660_v61  ;;  %v5662_v41 = vunpack.i.h.bf16 %v5660_v61 }
 0x39b   : > { %2240 = vmatprep.mubr.bf16.mxu0 %v2066_v45  ;;  %v2065_v25 = vpack.c.bf16 %v2033_v32, %v2032_v1  ;;  %v2050_v24 = vsel %vm1410_vm13, %v2042_v38, %v5647_v5  ;;  %v5671_v29 = vunpack.i.l.bf16 %v5670_v34  ;;  %v5672_v31 = vunpack.i.h.bf16 %v5670_v34 }
 0x39c   : > { %v2043_v48 = vsel %vm977_vm11, %v6939_v0, %v5661_v36  ;;  %v2019_v57 = vsel %vm977_vm11, %v6819_v15, %v5662_v41 }
 0x39d   : > { %v5665_v49 = vpop.permute.xlu0 %5664  ;;  %2241 = vmatmul.mubr.bf16.gmra.mrb[20].mxu0 %v2065_v25 }
 0x39e   : > { %v5675_v50 = vpop.permute.xlu1 %5674  ;;  %v5666_v58 = vunpack.i.l.bf16 %v5665_v49  ;;  %v5667_v14 = vunpack.i.h.bf16 %v5665_v49 }
 0x39f   : > { %v5676_v56 = vunpack.i.l.bf16 %v5675_v50  ;;  %v5677_v0 = vunpack.i.h.bf16 %v5675_v50 }
 0x3a0   : > { %v2051_v44 = vsel %vm1410_vm13, %v2043_v48, %v5666_v58  ;;  %v2026_v43 = vsel %vm1410_vm13, %v2019_v57, %v5667_v14 }
 0x3a1   : > { %v2020_v2 = vsel %vm977_vm11, %v6877_v20, %v5676_v56  ;;  %v5685_v26 = vpop.permute.xlu0 %5684  ;;  %v2044_v61 = vsel %vm977_vm11, %v6933_v11, %v5677_v0  ;;  %v5986_v0 = vld [vmem:[%s8402_s3 + $0x98] sm:$0xff]  }
 0x3a2   : > { %v5687_v51 = vunpack.i.h.bf16 %v5685_v26  ;;  %v5686_v47 = vunpack.i.l.bf16 %v5685_v26  ;;  %v5680_v17 = vpop.permute.xlu1 %5679  ;;  %v2027_v37 = vsel %vm1410_vm13, %v2020_v2, %v5671_v29  ;;  %v2052_v11 = vsel %vm1410_vm13, %v2044_v61, %v5672_v31 }
 0x3a3   : > { %v5682_v62 = vunpack.i.h.bf16 %v5680_v17  ;;  %v5681_v42 = vunpack.i.l.bf16 %v5680_v17 }
 0x3a4   : > { %v2058_v60 = vsel %vm1419_vm14, %v2050_v24, %v5686_v47  ;;  %v2059_v20 = vsel %vm1419_vm14, %v2051_v44, %v5687_v51  ;;  %v5981_v44 = vld [vmem:[%s8402_s3 + $0x110] sm:$0xff]  }
 0x3a5   : > { %v5690_v35 = vpop.permute.xlu0 %5689  ;;  %v2069_v53 = vpack.c.bf16 %v2059_v20, %v2058_v60  ;;  %v2034_v46 = vsel %vm1419_vm14, %v2026_v43, %v5681_v42  ;;  %v2035_v40 = vsel %vm1419_vm14, %v2027_v37, %v5682_v62  ;;  %5243 = vmatprep.subr.bf16.mxu1 %v5981_v44  ;;  %v5982_v60 = vld [vmem:[%s8402_s3 + $0x118] sm:$0xff]   ;;  %v5983_v20 = vld [vmem:[%s8402_s3 + $0xd0] sm:$0xff]  }
 0x3a6   : > { %v1853_v15 = vpop.permute.xlu1 %1852  ;;  %v2068_v63 = vpack.c.bf16 %v2035_v40, %v2034_v46  ;;  %v5692_v45 = vunpack.i.h.bf16 %v5690_v35  ;;  %v5691_v38 = vunpack.i.l.bf16 %v5690_v35  ;;  %5244 = vmatpush3.bf16.msra.mxu1 %v5981_v44  ;;  %v5984_v43 = vld [vmem:[%s8402_s3 + $0x90] sm:$0xff]   ;;  %v5985_v37 = vld [vmem:[%s8402_s3 + $0xd8] sm:$0xff]   ;;  %5101 = vmatprep.subr.bf16.mxu0 %v5983_v20  ;;  %v5987_v35 = vld [vmem:[%s8402_s3 + $0xe0] sm:$0xff]  }
 0x3a7   : > { %2248 = vmatprep.mubr.bf16.mxu0 %v2069_v53  ;;  %v2022_v1 = vsel %vm977_vm11, %v6911_v22, %v1853_v15  ;;  %5245 = vmatprep.subr.bf16.mxu1 %v5982_v60  ;;  %v5988_v53 = vld [vmem:[%s8402_s3 + $0xa0] sm:$0xff]   ;;  %v5993_v20 = vld [vmem:[%s8402_s3 + $0xf8] sm:$0xff]  }
 0x3a8   : > { %2249 = vmatmul.mubr.bf16.gmra.mrb[24].mxu0 %v2068_v63  ;;  %v2029_v56 = vsel %vm1410_vm13, %v2022_v1, %v5692_v45  ;;  %v7060_v40 = vld [vmem:[%s8405_s6] ss:$0 sm:$0xff] }
 0x3a9   : > { %v5695_v52 = vpop.permute.xlu0 %5694  ;;  %5102 = vmatpush3.bf16.msra.mxu0 %v5984_v43 }
 0x3aa   : > { %v5697_v32 = vunpack.i.h.bf16 %v5695_v52  ;;  %v5696_v25 = vunpack.i.l.bf16 %v5695_v52  ;;  %v5700_v49 = vpop.permute.xlu1 %5699  ;;  %5246 = vmatpush3.bf16.msra.mxu1 %v5982_v60  ;;  %5103 = vmatprep.subr.bf16.mxu0 %v5985_v37 }
 0x3ab   : > { %v5702_v36 = vunpack.i.h.bf16 %v5700_v49  ;;  %v5701_v50 = vunpack.i.l.bf16 %v5700_v49 }
 0x3ac   : > { %v2021_v5 = vsel %vm977_vm11, %v6884_v59, %v5697_v32  ;;  %v2045_v41 = vsel %vm977_vm11, %v6949_v55, %v5696_v25 }
 0x3ad   : > { %v1919_v58 = vpop.permute.xlu0 %1918  ;;  %v2028_v34 = vsel %vm1410_vm13, %v2021_v5, %v5691_v38  ;;  %v2053_v22 = vsel %vm1410_vm13, %v2045_v41, %v6694_v4  ;;  %v2060_v14 = vsel %vm1419_vm14, %v2052_v11, %v5701_v50  ;;  %5104 = vmatpush3.bf16.msra.mxu0 %v5986_v0  ;;  %v5989_v38 = vld [vmem:[%s8402_s3 + $0xe8] sm:$0xff]  }
 0x3ae   : > { %v2036_v2 = vsel %vm1419_vm14, %v2028_v34, %v5702_v36  ;;  %v2037_v26 = vsel %vm1419_vm14, %v2029_v56, %v1919_v58  ;;  %v2061_v59 = vsel %vm1419_vm14, %v2053_v22, %v6704_v54  ;;  %5105 = vmatprep.subr.bf16.mxu0 %v5987_v35  ;;  %v5990_v56 = vld [vmem:[%s8402_s3 + $0xa8] sm:$0xff]  }
 0x3af   : > { %v2071_v55 = vpack.c.bf16 %v2037_v26, %v2036_v2  ;;  %v2072_v24 = vpack.c.bf16 %v2061_v59, %v2060_v14  ;;  %v5992_v59 = vld [vmem:[%s8402_s3 + $0xb0] sm:$0xff]  }
 0x3b1   : > { %2256 = vmatprep.mubr.bf16.mxu0 %v2072_v24  ;;  %5106 = vmatpush3.bf16.msra.mxu0 %v5988_v53  ;;  %v5994_v53 = vld [vmem:[%s8402_s3 + $0xb8] sm:$0xff]  }
 0x3b2   : > { %2257 = vmatmul.mubr.bf16.gmra.mrb[28].mxu0 %v2071_v55  ;;  %5107 = vmatprep.subr.bf16.mxu0 %v5989_v38 }
 0x3b5   : > { %5108 = vmatpush3.bf16.msra.mxu0 %v5990_v56 }
 0x3b6   : > { %5109 = vmatprep.subr.bf16.mxu0 %v5991_v9  ;;  %v5996_v9 = vld [vmem:[%s8402_s3 + $0xc0] sm:$0xff]  }
 0x3b9   : > { %5110 = vmatpush3.bf16.msra.mxu0 %v5992_v59 }
 0x3ba   : > { %5111 = vmatprep.subr.bf16.mxu0 %v5993_v20 }
 0x3bd   : > { %5112 = vmatpush3.bf16.msra.mxu0 %v5994_v53 }
 0x3f3   : > { %v5237_v48 = vpop.f32.mrb[16].mxu1 }
 0x3f4   : > { %v2299_v29 = vpop.f32.mrb[17].mxu1 }
 0x3f5   : > { %v7023_v51 = vpop.f32.mrb[18].mxu1 }
 0x3f6   : > { %v2302_v47 = vpop.f32.mrb[19].mxu1 }
 0x3fe   : > { %v7025_v17 = vpop.f32.mrb[20].mxu1 }
 0x3ff   : > { %v7027_v57 = vpop.f32.mrb[21].mxu1 }
 0x400   : > { %v7029_v62 = vpop.f32.mrb[22].mxu1 }
 0x401   : > { %v7031_v42 = vpop.f32.mrb[23].mxu1 }
 0x468   : > { %v5071_v46 = vpop.f32.mrb[16].mxu0 }
 0x469   : > { %v5072_v15 = vpop.f32.mrb[17].mxu0 }
 0x46a   : > { %v5073_v63 = vadd.f32 %v5072_v15, %v5071_v46  ;;  %v5074_v61 = vpop.f32.mrb[18].mxu0 }
 0x46b   : > { %v5075_v45 = vpop.f32.mrb[19].mxu0 }
 0x46c   : > { %v2235_v52 = vadd.f32 %v5073_v63, %v7060_v40  ;;  %v5076_v31 = vadd.f32 %v5075_v45, %v5074_v61  ;;  %v5995_v61 = vld [vmem:[%s8402_s3 + $0x100] sm:$0xff]  }
 0x46d   : > { %5113 = vmatprep.subr.bf16.mxu0 %v5995_v61 }
 0x46e   : > { %v2300_v1 = vadd.f32 %v2299_v29, %v2235_v52  ;;  %v2238_v32 = vadd.f32 %v5076_v31, %v7060_v40  ;;  %5114 = vmatpush3.bf16.msra.mxu0 %v5996_v9 }
 0x470   : > { %v7066_v25 = vadd.f32 %v2300_v1, %v1093_v8  ;;  %v2303_v49 = vadd.f32 %v2302_v47, %v2238_v32  ;;  %v5077_v36 = vpop.f32.mrb[20].mxu0 }
 0x471   : > { %v5078_v41 = vpop.f32.mrb[21].mxu0 }
 0x472   : > { %v2338_v50 = vmax.f32 %v7066_v25, 0.0  ;;  %v7074_v5 = vadd.f32 %v2303_v49, %v1094_v16  ;;  %v5079_v11 = vadd.f32 %v5078_v41, %v5077_v36  ;;  %v5080_v58 = vpop.f32.mrb[22].mxu0 }
 0x473   : > { %v5081_v34 = vpop.f32.mrb[23].mxu0 }
 0x474   : > { %v2393_v3 = vrot.slane %v2338_v50, 7  ;;  %v2339_v8 = vmax.f32 %v7074_v5, 0.0  ;;  %v2243_v16 = vadd.f32 %v5079_v11, %v7060_v40  ;;  %v5082_v22 = vadd.f32 %v5081_v34, %v5080_v58 }
 0x476   : > { %v2394_v14 = vrot.slane %v2339_v8, 7  ;;  %v7089_v2 = vsel %vm629_vm0, 0.0, %v2393_v3  ;;  %v7092_v26 = vsel %vm629_vm0, %v2393_v3, 0.0  ;;  %v2308_v55 = vadd.f32 %v5237_v48, %v2243_v16 }
 0x477   : > { %v2246_v24 = vadd.f32 %v5082_v22, %v7060_v40  ;;  %v2481_v44 = vrot.slane %v7089_v2, 2  ;;  %v2482_v60 = vrot.slane %v7092_v26, 2  ;;  %v2439_v49 = vrot.slane %v7089_v2, 1 }
 0x478   : > { %v2418_v29 = vsel %vm629_vm0, %v2394_v14, 0.0  ;;  %v7100_v47 = vsel %vm629_vm0, 0.0, %v2394_v14  ;;  %v7109_v43 = vadd.f32 %v2308_v55, %v1095_v23 }
 0x479   : > { %v2311_v48 = vadd.f32 %v7023_v51, %v2246_v24  ;;  %v5703_v37 = vpack.i.bf16 %v7100_v47, %v7089_v2  ;;  %v2484_v0 = vrot.slane %v7100_v47, 2  ;;  %v2485_v35 = vrot.slane %v2418_v29, 2 }
 0x47a   : > { %v2340_v46 = vmax.f32 %v7109_v43, 0.0  ;;  %v2483_v15 = vsel %vm713_vm1, %v2481_v44, %v2482_v60  ;;  %v2442_v32 = vrot.slane %v7100_v47, 1  ;;  %v2443_v34 = vrot.slane %v2418_v29, 1 }
 0x47b   : > { %v7121_v10 = vadd.f32 %v2311_v48, %v1096_v13  ;;  %v5083_v23 = vpop.f32.mrb[24].mxu0  ;;  %5704 = vrot.lane.b32.xlu0 %v5703_v37, %s6040_s29  ;;  %v7126_v63 = vsel %vm713_vm1, %v2484_v0, %v2485_v35  ;;  %v2440_v48 = vrot.slane %v7092_v26, 1 }
 0x47c   : > { %v5084_v51 = vpop.f32.mrb[25].mxu0  ;;  %v2395_v45 = vrot.slane %v2340_v46, 7  ;;  %v5708_v31 = vpack.i.bf16 %v7126_v63, %v2483_v15  ;;  %v7171_v0 = vsel %vm664_vm2, %v2442_v32, %v2443_v34 }
 0x47d   : > { %v2341_v6 = vmax.f32 %v7121_v10, 0.0  ;;  %v5085_v13 = vadd.f32 %v5084_v51, %v5083_v23  ;;  %v5086_v52 = vpop.f32.mrb[26].mxu0  ;;  %v5997_v51 = vld [vmem:[%s8402_s3 + $0x108] sm:$0xff]  }
 0x47e   : > { %v5087_v1 = vpop.f32.mrb[27].mxu0  ;;  %v2419_v38 = vsel %vm629_vm0, %v2395_v45, 0.0  ;;  %5709 = vrot.lane.b32.xlu1 %v5708_v31, %s6039_s21  ;;  %v7143_v3 = vsel %vm629_vm0, 0.0, %v2395_v45  ;;  %5115 = vmatprep.subr.bf16.mxu0 %v5997_v51 }
 0x47f   : > { %v2396_v36 = vrot.slane %v2341_v6, 7  ;;  %v2251_v41 = vadd.f32 %v5085_v13, %v7060_v40  ;;  %v5088_v11 = vadd.f32 %v5087_v1, %v5086_v52  ;;  %v2488_v58 = vrot.slane %v2419_v38, 2 }
 0x480   : > { %v2446_v56 = vrot.slane %v2419_v38, 1  ;;  %v5713_v59 = vpack.i.bf16 %v7143_v3, %v7100_v47  ;;  %v2487_v24 = vrot.slane %v7143_v3, 2  ;;  %v2445_v29 = vrot.slane %v7143_v3, 1 }
 0x481   : > { %v7149_v16 = vsel %vm629_vm0, %v2396_v36, 0.0  ;;  %v2316_v22 = vadd.f32 %v7027_v57, %v2251_v41  ;;  %v2254_v14 = vadd.f32 %v5088_v11, %v7060_v40  ;;  %v7156_v55 = vsel %vm629_vm0, 0.0, %v2396_v36 }
 0x482   : > { %v2491_v44 = vrot.slane %v7149_v16, 2  ;;  %5714 = vrot.lane.b32.xlu1 %v5713_v59, %s6041_s20  ;;  %v5718_v20 = vpack.i.bf16 %v7156_v55, %v2483_v15  ;;  %v2489_v37 = vsel %vm713_vm1, %v2487_v24, %v2488_v58  ;;  %v7174_v35 = vsel %vm664_vm2, %v2445_v29, %v2446_v56  ;;  %v5998_v15 = vld [vmem:[%s8402_s3 + $0xc8] sm:$0xff]  }
 0x483   : > { %v7163_v60 = vadd.f32 %v2316_v22, %v1097_v28  ;;  %v2319_v57 = vadd.f32 %v7031_v42, %v2254_v14  ;;  %v2490_v12 = vrot.slane %v7156_v55, 2  ;;  %v2684_v26 = vpack.c.bf16 %v2489_v37, %v7126_v63  ;;  %5116 = vmatpush3.bf16.msra.mxu0 %v5998_v15 }
 0x484   : > { %5719 = vrot.lane.b32.xlu0 %v5718_v20, %s6041_s20  ;;  %v5733_v23 = vpack.i.bf16 %v7174_v35, %v7171_v0  ;;  %v5723_v31 = vpack.i.bf16 %v7156_v55, %v7143_v3  ;;  %v7205_v38 = vsel %vm664_vm2, %v2439_v49, %v2440_v48  ;;  %v2448_v36 = vrot.slane %v7156_v55, 1 }
 0x485   : > { %v2342_v28 = vmax.f32 %v7163_v60, 0.0  ;;  %v7180_v42 = vadd.f32 %v2319_v57, %v1098_v27  ;;  %v5089_v53 = vpop.f32.mrb[28].mxu0  ;;  %v7193_v30 = vsel %vm713_vm1, %v2490_v12, %v2491_v44  ;;  %5247 = vmatprep.mubr.msk.bf16.mxu1 %vm977_vm11, %v2684_v26  ;;  %v5728_v22 = vpack.i.bf16 %v2489_v37, %v7205_v38 }
 0x486   : > { %v5090_v61 = vpop.f32.mrb[29].mxu0  ;;  %5734 = vrot.lane.b32.xlu1 %v5733_v23, %s6040_s29  ;;  %v5738_v32 = vpack.i.bf16 %v7171_v0, %v7193_v30  ;;  %v2449_v20 = vrot.slane %v7149_v16, 1 }
 0x487   : > { %v2397_v27 = vrot.slane %v2342_v28, 7  ;;  %v2343_v45 = vmax.f32 %v7180_v42, 0.0  ;;  %v5091_v13 = vadd.f32 %v5090_v61, %v5089_v53  ;;  %v5092_v52 = vpop.f32.mrb[30].mxu0 }
 0x488   : > { %v5093_v1 = vpop.f32.mrb[31].mxu0  ;;  %5724 = vrot.lane.b32.xlu0 %v5723_v31, %s6040_s29 }
 0x489   : > { %v7209_v41 = vsel %vm629_vm0, 0.0, %v2397_v27  ;;  %v2421_v11 = vsel %vm629_vm0, %v2397_v27, 0.0  ;;  %v2398_v58 = vrot.slane %v2343_v45, 7  ;;  %v2259_v34 = vadd.f32 %v5091_v13, %v7060_v40 }
 0x48a   : > { %v2494_v56 = vrot.slane %v2421_v11, 2  ;;  %v5094_v9 = vadd.f32 %v5093_v1, %v5092_v52  ;;  %v2493_v49 = vrot.slane %v7209_v41, 2  ;;  %5739 = vrot.lane.b32.xlu1 %v5738_v32, %s6039_s21  ;;  %v2451_v29 = vrot.slane %v7209_v41, 1 }
 0x48b   : > { %v2422_v14 = vsel %vm629_vm0, %v2398_v58, 0.0  ;;  %v2324_v59 = vadd.f32 %v7025_v17, %v2259_v34  ;;  %v7222_v24 = vsel %vm629_vm0, 0.0, %v2398_v58  ;;  %v2452_v48 = vrot.slane %v2421_v11, 1 }
 0x48c   : > { %v2262_v44 = vadd.f32 %v5094_v9, %v7060_v40  ;;  %v2495_v57 = vsel %vm713_vm1, %v2493_v49, %v2494_v56  ;;  %5729 = vrot.lane.b32.xlu0 %v5728_v22, %s6039_s21  ;;  %v5743_v53 = vpack.i.bf16 %v7126_v63, %v7209_v41  ;;  %v2496_v23 = vrot.slane %v7222_v24, 2 }
 0x48d   : > { %v7230_v12 = vadd.f32 %v2324_v59, %v1099_v18  ;;  %v2687_v17 = vpack.c.bf16 %v2495_v57, %v7193_v30  ;;  %v7238_v40 = vsel %vm664_vm2, %v2451_v29, %v2452_v48  ;;  %v2497_v16 = vrot.slane %v2422_v14, 2 }
 0x48e   : > { %v2327_v26 = vadd.f32 %v7029_v62, %v2262_v44  ;;  %5744 = vrot.lane.b32.xlu1 %v5743_v53, %s6041_s20  ;;  %v5748_v7 = vpack.i.bf16 %v7222_v24, %v2489_v37  ;;  %v7250_v62 = vsel %vm664_vm2, %v2448_v36, %v2449_v20  ;;  %v2454_v59 = vrot.slane %v7222_v24, 1 }
 0x48f   : > { %v2344_v51 = vmax.f32 %v7230_v12, 0.0  ;;  %5248 = vmatmul.mubr.msk.bf16.vlgmr.msra.gmra.mrb[24].mxu1 %vm977_vm11, %v2687_v17  ;;  %v5758_v15 = vpack.i.bf16 %v7238_v40, %v7250_v62  ;;  %v2498_v27 = vsel %vm713_vm1, %v2496_v23, %v2497_v16  ;;  %v2455_v29 = vrot.slane %v2422_v14, 1  ;;  %v7724_v12 = vld [vmem:[%s8407_s8] ss:$0 sm:$0xff] }
 0x490   : > { %v7247_v18 = vadd.f32 %v2327_v26, %v1100_v33  ;;  %5749 = vrot.lane.b32.xlu0 %v5748_v7, %s6041_s20  ;;  %v5753_v33 = vpack.i.bf16 %v2495_v57, %v7174_v35  ;;  %v5763_v1 = vpack.i.bf16 %v7250_v62, %v2498_v27  ;;  %v5783_v53 = vpack.i.bf16 %v7222_v24, %v7209_v41 }
 0x491   : > { %v2399_v63 = vrot.slane %v2344_v51, 7  ;;  %v7288_v14 = vsel %vm664_vm2, %v2454_v59, %v2455_v29 }
 0x492   : > { %v2345_v61 = vmax.f32 %v7247_v18, 0.0  ;;  %5759 = vrot.lane.b32.xlu1 %v5758_v15, %s6040_s29 }
 0x493   : > { %v7260_v37 = vsel %vm629_vm0, 0.0, %v2399_v63  ;;  %v2423_v21 = vsel %vm629_vm0, %v2399_v63, 0.0 }
 0x494   : > { %v2500_v13 = vrot.slane %v2423_v21, 2  ;;  %v2400_v52 = vrot.slane %v2345_v61, 7  ;;  %v2499_v31 = vrot.slane %v7260_v37, 2  ;;  %5754 = vrot.lane.b32.xlu0 %v5753_v33, %s6039_s21  ;;  %v2457_v32 = vrot.slane %v7260_v37, 1 }
 0x495   : > { %v2458_v34 = vrot.slane %v2423_v21, 1  ;;  %v5768_v44 = vpack.i.bf16 %v7193_v30, %v7260_v37 }
 0x496   : > { %v2424_v36 = vsel %vm629_vm0, %v2400_v52, 0.0  ;;  %v2501_v11 = vsel %vm713_vm1, %v2499_v31, %v2500_v13  ;;  %v2416_v58 = vsel %vm629_vm0, 0.0, %v2400_v52  ;;  %5764 = vrot.lane.b32.xlu1 %v5763_v1, %s6039_s21 }
 0x497   : > { %v2561_v56 = vrot.slane %v2424_v36, 2  ;;  %v2690_v9 = vpack.c.bf16 %v2501_v11, %v2498_v27  ;;  %v2560_v49 = vrot.slane %v2416_v58, 2  ;;  %v5773_v22 = vpack.i.bf16 %v2416_v58, %v2495_v57 }
 0x498   : > { %v7282_v48 = vsel %vm664_vm2, %v2457_v32, %v2458_v34  ;;  %v5778_v57 = vpack.i.bf16 %v2501_v11, %v7238_v40  ;;  %v2550_v26 = vrot.slane %v2424_v36, 1  ;;  %v2549_v23 = vrot.slane %v2416_v58, 1 }
 0x499   : > { %5251 = vmatprep.mubr.msk.bf16.mxu1 %vm977_vm11, %v2690_v9  ;;  %5774 = vrot.lane.b32.xlu0 %v5773_v22, %s6041_s20  ;;  %v2562_v20 = vsel %vm713_vm1, %v2560_v49, %v2561_v56  ;;  %v5788_v30 = vpack.i.bf16 %v7282_v48, %v7288_v14  ;;  %v5793_v16 = vpack.i.bf16 %v2501_v11, %v2498_v27 }
 0x49a   : > { %v2693_v17 = vpack.c.bf16 %v6178_v19, %v2562_v20  ;;  %5769 = vrot.lane.b32.xlu1 %v5768_v44, %s6041_s20  ;;  %v5798_v7 = vpack.i.bf16 %v7288_v14, %v2562_v20  ;;  %v7301_v63 = vsel %vm664_vm2, %v2549_v23, %v2550_v26 }
 0x49b   : > { %v5803_v15 = vpack.i.bf16 %v7260_v37, %v7301_v63 }
 0x49c   : > { %5252 = vmatmul.mubr.msk.bf16.gmra.mrb[28].mxu1 %vm977_vm11, %v2693_v17 }
 0x49d   : > { %5779 = vrot.lane.b32.xlu0 %v5778_v57, %s6039_s21 }
 0x49e   : > { %5789 = vrot.lane.b32.xlu1 %v5788_v30, %s6040_s29 }
 0x4a1   : > { %5784 = vrot.lane.b32.xlu0 %v5783_v53, %s6040_s29 }
 0x4a2   : > { %5794 = vrot.lane.b32.xlu1 %v5793_v16, %s6041_s20 }
 0x4a5   : > { %2472 = vrot.lane.b32.xlu0 %v7282_v48, %s6039_s21 }
 0x4a6   : > { %5799 = vrot.lane.b32.xlu1 %v5798_v7, %s6039_s21 }
 0x4a9   : > { %5804 = vrot.lane.b32.xlu0 %v5803_v15, %s6040_s29 }
 0x4aa   : > { %2538 = vrot.lane.b32.xlu1 %v2416_v58, %s6040_s29 }
 0x4ed   : > { %v5705_v21 = vpop.permute.xlu0 %5704 }
 0x4ee   : > { %v5706_v57 = vunpack.i.l.bf16 %v5705_v21  ;;  %v5707_v26 = vunpack.i.h.bf16 %v5705_v21 }
 0x4f0   : > { %v5710_v27 = vpop.permute.xlu1 %5709 }
 0x4f1   : > { %v5712_v13 = vunpack.i.h.bf16 %v5710_v27  ;;  %v5711_v52 = vunpack.i.l.bf16 %v5710_v27 }
 0x4f3   : > { %v2659_v11 = vsel %vm977_vm11, %v7171_v0, %v5712_v13  ;;  %v2658_v34 = vsel %vm977_vm11, %v7205_v38, %v5711_v52 }
 0x4f4   : > { %v5715_v33 = vpop.permute.xlu1 %5714 }
 0x4f5   : > { %v5717_v31 = vunpack.i.h.bf16 %v5715_v33  ;;  %v5716_v1 = vunpack.i.l.bf16 %v5715_v33  ;;  %v2650_v33 = vsel %vm1419_vm14, %v6650_v39, %v5706_v57 }
 0x4f6   : > { %v5720_v32 = vpop.permute.xlu0 %5719 }
 0x4f7   : > { %v2666_v58 = vsel %vm1410_vm13, %v2658_v34, %v5716_v1  ;;  %v2667_v22 = vsel %vm1410_vm13, %v2659_v11, %v5717_v31  ;;  %v5721_v53 = vunpack.i.l.bf16 %v5720_v32  ;;  %v5722_v1 = vunpack.i.h.bf16 %v5720_v32 }
 0x4f8   : > { %v5735_v36 = vpop.permute.xlu1 %5734 }
 0x4f9   : > { %v5737_v56 = vunpack.i.h.bf16 %v5735_v36  ;;  %v5736_v9 = vunpack.i.l.bf16 %v5735_v36 }
 0x4fa   : > { %v5725_v49 = vpop.permute.xlu0 %5724 }
 0x4fb   : > { %v2674_v59 = vsel %vm1419_vm14, %v2666_v58, %v5736_v9  ;;  %v2675_v29 = vsel %vm1419_vm14, %v2667_v22, %v5737_v56  ;;  %v5727_v57 = vunpack.i.h.bf16 %v5725_v49 }
 0x4fc   : > { %v5740_v44 = vpop.permute.xlu1 %5739  ;;  %v2683_v20 = vpack.c.bf16 %v2675_v29, %v2674_v59 }
 0x4fd   : > { %v5741_v23 = vunpack.i.l.bf16 %v5740_v44  ;;  %v5742_v13 = vunpack.i.h.bf16 %v5740_v44 }
 0x4fe   : > { %v5730_v17 = vpop.permute.xlu0 %5729  ;;  %2852 = vmatprep.mubr.bf16.mxu0 %v2683_v20 }
 0x4ff   : > { %v5732_v0 = vunpack.i.h.bf16 %v5730_v17  ;;  %v5731_v30 = vunpack.i.l.bf16 %v5730_v17 }
 0x500   : > { %v5745_v38 = vpop.permute.xlu1 %5744 }
 0x501   : > { %v2636_v16 = vsel %vm977_vm11, %v7089_v2, %v5731_v30  ;;  %v5746_v15 = vunpack.i.l.bf16 %v5745_v38  ;;  %v2660_v52 = vsel %vm977_vm11, %v7174_v35, %v5732_v0  ;;  %v5747_v21 = vunpack.i.h.bf16 %v5745_v38 }
 0x502   : > { %v2643_v7 = vsel %vm1410_vm13, %v2636_v16, %v5721_v53  ;;  %v5750_v27 = vpop.permute.xlu0 %5749  ;;  %v2661_v2 = vsel %vm977_vm11, %v7250_v62, %v5741_v23  ;;  %v2668_v58 = vsel %vm1410_vm13, %v2660_v52, %v5722_v1  ;;  %v2637_v35 = vsel %vm977_vm11, %v7100_v47, %v5742_v13 }
 0x503   : > { %v2651_v31 = vsel %vm1419_vm14, %v2643_v7, %v5707_v26  ;;  %v2669_v22 = vsel %vm1410_vm13, %v2661_v2, %v5746_v15  ;;  %v5751_v44 = vunpack.i.l.bf16 %v5750_v27  ;;  %v2644_v62 = vsel %vm1410_vm13, %v2637_v35, %v5747_v21 }
 0x504   : > { %v2682_v36 = vpack.c.bf16 %v2651_v31, %v2650_v33  ;;  %v5760_v11 = vpop.permute.xlu1 %5759  ;;  %v5726_v0 = vunpack.i.l.bf16 %v5725_v49  ;;  %v5752_v52 = vunpack.i.h.bf16 %v5750_v27 }
 0x505   : > { %v5762_v34 = vunpack.i.h.bf16 %v5760_v11  ;;  %v5761_v56 = vunpack.i.l.bf16 %v5760_v11 }
 0x506   : > { %v5755_v9 = vpop.permute.xlu0 %5754  ;;  %2853 = vmatmul.mubr.bf16.vlgmr.msra.gmra.mrb[32].mxu0 %v2682_v36  ;;  %v2652_v26 = vsel %vm1419_vm14, %v2644_v62, %v5726_v0 }
 0x507   : > { %v5756_v59 = vunpack.i.l.bf16 %v5755_v9  ;;  %v2676_v32 = vsel %vm1419_vm14, %v2668_v58, %v5761_v56  ;;  %v2677_v29 = vsel %vm1419_vm14, %v2669_v22, %v5762_v34  ;;  %v5757_v38 = vunpack.i.h.bf16 %v5755_v9 }
 0x508   : > { %v5765_v20 = vpop.permute.xlu1 %5764  ;;  %v2686_v17 = vpack.c.bf16 %v2677_v29, %v2676_v32 }
 0x509   : > { %v2638_v30 = vsel %vm977_vm11, %v7143_v3, %v5756_v59  ;;  %v5766_v15 = vunpack.i.l.bf16 %v5765_v20  ;;  %v2662_v49 = vsel %vm977_vm11, %v7238_v40, %v5757_v38  ;;  %v5767_v3 = vunpack.i.h.bf16 %v5765_v20 }
 0x50a   : > { %2860 = vmatprep.mubr.bf16.mxu0 %v2686_v17  ;;  %v2645_v53 = vsel %vm1410_vm13, %v2638_v30, %v5751_v44  ;;  %v2670_v56 = vsel %vm1410_vm13, %v2662_v49, %v5752_v52 }
 0x50b   : > { %v5775_v47 = vpop.permute.xlu0 %5774  ;;  %v2653_v23 = vsel %vm1419_vm14, %v2645_v53, %v5727_v57  ;;  %v2663_v36 = vsel %vm977_vm11, %v7288_v14, %v5766_v15  ;;  %v2639_v35 = vsel %vm977_vm11, %v7156_v55, %v5767_v3 }
 0x50c   : > { %v5770_v16 = vpop.permute.xlu1 %5769  ;;  %v2685_v7 = vpack.c.bf16 %v2653_v23, %v2652_v26  ;;  %v5776_v58 = vunpack.i.l.bf16 %v5775_v47 }
 0x50d   : > { %v5771_v33 = vunpack.i.l.bf16 %v5770_v16  ;;  %v5772_v21 = vunpack.i.h.bf16 %v5770_v16 }
 0x50e   : > { %2861 = vmatmul.mubr.bf16.gmra.mrb[36].mxu0 %v2685_v7  ;;  %v5777_v7 = vunpack.i.h.bf16 %v5775_v47 }
 0x50f   : > { %v5780_v13 = vpop.permute.xlu0 %5779  ;;  %v2671_v9 = vsel %vm1410_vm13, %v2663_v36, %v5771_v33  ;;  %v2646_v44 = vsel %vm1410_vm13, %v2639_v35, %v5772_v21  ;;  %v5999_v35 = vld [vmem:[%s8404_s5 + $0x110] sm:$0xff]  }
 0x510   : > { %v5781_v31 = vunpack.i.l.bf16 %v5780_v13  ;;  %v5790_v1 = vpop.permute.xlu1 %5789  ;;  %v5782_v20 = vunpack.i.h.bf16 %v5780_v13  ;;  %5255 = vmatprep.subr.bf16.mxu0 %v5999_v35 }
 0x511   : > { %v5792_v11 = vunpack.i.h.bf16 %v5790_v1  ;;  %v5791_v2 = vunpack.i.l.bf16 %v5790_v1  ;;  %5256 = vmatpush3.bf16.msra.mxu0 %v5999_v35 }
 0x512   : > { %v2640_v34 = vsel %vm977_vm11, %v7209_v41, %v5781_v31  ;;  %v2664_v23 = vsel %vm977_vm11, %v7282_v48, %v5782_v20 }
 0x513   : > { %v5785_v40 = vpop.permute.xlu0 %5784  ;;  %v2678_v27 = vsel %vm1419_vm14, %v2670_v56, %v5791_v2  ;;  %v2679_v22 = vsel %vm1419_vm14, %v2671_v9, %v5792_v11  ;;  %v2647_v41 = vsel %vm1410_vm13, %v2640_v34, %v5776_v58  ;;  %v2672_v47 = vsel %vm1410_vm13, %v2664_v23, %v5777_v7  ;;  %v6006_v23 = vld [vmem:[%s8404_s5 + $0xa0] sm:$0xff]  }
 0x514   : > { %v5787_v14 = vunpack.i.h.bf16 %v5785_v40  ;;  %v5786_v59 = vunpack.i.l.bf16 %v5785_v40  ;;  %v5795_v32 = vpop.permute.xlu1 %5794  ;;  %v2689_v29 = vpack.c.bf16 %v2679_v22, %v2678_v27 }
 0x515   : > { %v5797_v57 = vunpack.i.h.bf16 %v5795_v32  ;;  %v5796_v16 = vunpack.i.l.bf16 %v5795_v32  ;;  %v6002_v32 = vld [vmem:[%s8404_s5 + $0x90] sm:$0xff]  }
 0x516   : > { %2868 = vmatprep.mubr.bf16.mxu0 %v2689_v29  ;;  %v2654_v17 = vsel %vm1419_vm14, %v2646_v44, %v5786_v59  ;;  %v2655_v62 = vsel %vm1419_vm14, %v2647_v41, %v5787_v14  ;;  %v6000_v14 = vld [vmem:[%s8404_s5 + $0x118] sm:$0xff]   ;;  %v6001_v59 = vld [vmem:[%s8404_s5 + $0xd0] sm:$0xff]   ;;  %v6005_v41 = vld [vmem:[%s8404_s5 + $0xe0] sm:$0xff]  }
 0x517   : > { %v2473_v0 = vpop.permute.xlu0 %2472  ;;  %v2688_v30 = vpack.c.bf16 %v2655_v62, %v2654_v17  ;;  %5257 = vmatprep.subr.bf16.mxu0 %v6000_v14  ;;  %v6003_v29 = vld [vmem:[%s8404_s5 + $0xd8] sm:$0xff]   ;;  %5147 = vmatprep.subr.bf16.mxu1 %v6001_v59  ;;  %v7408_v17 = vld [vmem:[%s8403_s4 + $0x1] ss:$0 sm:$0xff] }
 0x518   : > { %v2642_v55 = vsel %vm977_vm11, %v7260_v37, %v2473_v0  ;;  %v5800_v53 = vpop.permute.xlu1 %5799  ;;  %5258 = vmatpush3.bf16.msra.mxu0 %v6000_v14  ;;  %5148 = vmatpush3.bf16.msra.mxu1 %v6002_v32  ;;  %v6004_v44 = vld [vmem:[%s8404_s5 + $0x98] sm:$0xff]  }
 0x519   : > { %2869 = vmatmul.mubr.bf16.gmra.mrb[40].mxu0 %v2688_v30  ;;  %v5802_v38 = vunpack.i.h.bf16 %v5800_v53  ;;  %v5801_v26 = vunpack.i.l.bf16 %v5800_v53  ;;  %v2649_v13 = vsel %vm1410_vm13, %v2642_v55, %v5797_v57  ;;  %5149 = vmatprep.subr.bf16.mxu1 %v6003_v29  ;;  %v6010_v29 = vld [vmem:[%s8404_s5 + $0xb0] sm:$0xff]  }
 0x51b   : > { %v2641_v15 = vsel %vm977_vm11, %v7222_v24, %v5802_v38  ;;  %v2665_v33 = vsel %vm977_vm11, %v7301_v63, %v5801_v26  ;;  %v5805_v49 = vpop.permute.xlu0 %5804 }
 0x51c   : > { %v5807_v52 = vunpack.i.h.bf16 %v5805_v49  ;;  %v5806_v37 = vunpack.i.l.bf16 %v5805_v49  ;;  %v2539_v3 = vpop.permute.xlu1 %2538  ;;  %v2648_v31 = vsel %vm1410_vm13, %v2641_v15, %v5796_v16  ;;  %v2673_v1 = vsel %vm1410_vm13, %v2665_v33, %v6694_v4  ;;  %5150 = vmatpush3.bf16.msra.mxu1 %v6004_v44  ;;  %v6007_v49 = vld [vmem:[%s8404_s5 + $0xe8] sm:$0xff]   ;;  %v6011_v44 = vld [vmem:[%s8404_s5 + $0xf8] sm:$0xff]  }
 0x51d   : > { %v2657_v48 = vsel %vm1419_vm14, %v2649_v13, %v2539_v3  ;;  %v2681_v24 = vsel %vm1419_vm14, %v2673_v1, %v6704_v54  ;;  %5151 = vmatprep.subr.bf16.mxu1 %v6005_v41  ;;  %v6008_v13 = vld [vmem:[%s8404_s5 + $0xa8] sm:$0xff]  }
 0x51e   : > { %v2656_v63 = vsel %vm1419_vm14, %v2648_v31, %v5807_v52  ;;  %v2680_v36 = vsel %vm1419_vm14, %v2672_v47, %v5806_v37 }
 0x51f   : > { %v2691_v21 = vpack.c.bf16 %v2657_v48, %v2656_v63  ;;  %v2692_v11 = vpack.c.bf16 %v2681_v24, %v2680_v36 }
 0x520   : > { %5152 = vmatpush3.bf16.msra.mxu1 %v6006_v23 }
 0x521   : > { %2876 = vmatprep.mubr.bf16.mxu0 %v2692_v11  ;;  %5153 = vmatprep.subr.bf16.mxu1 %v6007_v49  ;;  %v6009_v11 = vld [vmem:[%s8404_s5 + $0xf0] sm:$0xff]  }
 0x522   : > { %2877 = vmatmul.mubr.bf16.gmra.mrb[44].mxu0 %v2691_v21 }
 0x524   : > { %5154 = vmatpush3.bf16.msra.mxu1 %v6008_v13 }
 0x525   : > { %5155 = vmatprep.subr.bf16.mxu1 %v6009_v11 }
 0x528   : > { %5156 = vmatpush3.bf16.msra.mxu1 %v6010_v29  ;;  %v6014_v29 = vld [vmem:[%s8404_s5 + $0xc0] sm:$0xff]  }
 0x529   : > { %5157 = vmatprep.subr.bf16.mxu1 %v6011_v44 }
 0x562   : > { %v5249_v2 = vpop.f32.mrb[24].mxu1 }
 0x563   : > { %v2919_v34 = vpop.f32.mrb[25].mxu1 }
 0x564   : > { %v7374_v56 = vpop.f32.mrb[26].mxu1 }
 0x565   : > { %v2922_v9 = vpop.f32.mrb[27].mxu1 }
 0x56f   : > { %v7376_v58 = vpop.f32.mrb[28].mxu1 }
 0x570   : > { %v7378_v40 = vpop.f32.mrb[29].mxu1 }
 0x571   : > { %v7380_v27 = vpop.f32.mrb[30].mxu1 }
 0x572   : > { %v7382_v22 = vpop.f32.mrb[31].mxu1 }
 0x5d9   : > { %v5117_v20 = vpop.f32.mrb[32].mxu0 }
 0x5da   : > { %v5118_v62 = vpop.f32.mrb[33].mxu0 }
 0x5db   : > { %v5119_v57 = vadd.f32 %v5118_v62, %v5117_v20  ;;  %v5120_v0 = vpop.f32.mrb[34].mxu0 }
 0x5dc   : > { %v5121_v30 = vpop.f32.mrb[35].mxu0 }
 0x5dd   : > { %v2855_v55 = vadd.f32 %v5119_v57, %v7408_v17  ;;  %v5122_v53 = vadd.f32 %v5121_v30, %v5120_v0 }
 0x5df   : > { %v2920_v38 = vadd.f32 %v2919_v34, %v2855_v55  ;;  %v2858_v26 = vadd.f32 %v5122_v53, %v7408_v17 }
 0x5e1   : > { %v2950_v16 = vmax.f32 %v2920_v38, 0.0  ;;  %v2923_v7 = vadd.f32 %v2922_v9, %v2858_v26  ;;  %v5123_v15 = vpop.f32.mrb[36].mxu0  ;;  %v6012_v26 = vld [vmem:[%s8404_s5 + $0xb8] sm:$0xff]  }
 0x5e2   : > { %v5124_v33 = vpop.f32.mrb[37].mxu0  ;;  %5158 = vmatpush3.bf16.msra.mxu1 %v6012_v26 }
 0x5e3   : > { %v3005_v52 = vrot.slane %v2950_v16, 7  ;;  %v2951_v37 = vmax.f32 %v2923_v7, 0.0  ;;  %v5125_v3 = vadd.f32 %v5124_v33, %v5123_v15  ;;  %v5126_v31 = vpop.f32.mrb[38].mxu0 }
 0x5e4   : > { %v5127_v1 = vpop.f32.mrb[39].mxu0 }
 0x5e5   : > { %v7422_v48 = vsel %vm629_vm0, 0.0, %v3005_v52  ;;  %v7425_v47 = vsel %vm629_vm0, %v3005_v52, 0.0  ;;  %v3006_v24 = vrot.slane %v2951_v37, 7  ;;  %v2863_v63 = vadd.f32 %v5125_v3, %v7408_v17  ;;  %v6013_v3 = vld [vmem:[%s8404_s5 + $0x100] sm:$0xff]  }
 0x5e6   : > { %v3093_v36 = vrot.slane %v7422_v48, 2  ;;  %v3094_v21 = vrot.slane %v7425_v47, 2  ;;  %v5128_v14 = vadd.f32 %v5127_v1, %v5126_v31  ;;  %5159 = vmatprep.subr.bf16.mxu1 %v6013_v3  ;;  %v3052_v44 = vrot.slane %v7425_v47, 1 }
 0x5e7   : > { %v7434_v34 = vsel %vm629_vm0, 0.0, %v3006_v24  ;;  %v3030_v9 = vsel %vm629_vm0, %v3006_v24, 0.0  ;;  %v2928_v35 = vadd.f32 %v5249_v2, %v2863_v63  ;;  %5160 = vmatpush3.bf16.msra.mxu1 %v6014_v29 }
 0x5e8   : > { %v3096_v59 = vrot.slane %v7434_v34, 2  ;;  %v3097_v32 = vrot.slane %v3030_v9, 2  ;;  %v2866_v20 = vadd.f32 %v5128_v14, %v7408_v17  ;;  %v5808_v62 = vpack.i.bf16 %v7434_v34, %v7422_v48 }
 0x5e9   : > { %v2952_v41 = vmax.f32 %v2928_v35, 0.0  ;;  %v3095_v2 = vsel %vm713_vm1, %v3093_v36, %v3094_v21  ;;  %v3054_v53 = vrot.slane %v7434_v34, 1  ;;  %v3055_v23 = vrot.slane %v3030_v9, 1 }
 0x5ea   : > { %v7449_v57 = vsel %vm713_vm1, %v3096_v59, %v3097_v32  ;;  %v2931_v30 = vadd.f32 %v7374_v56, %v2866_v20  ;;  %5809 = vrot.lane.b32.xlu1 %v5808_v62, %s6040_s29  ;;  %v3051_v36 = vrot.slane %v7422_v48, 1 }
 0x5eb   : > { %v3007_v0 = vrot.slane %v2952_v41, 7  ;;  %v5813_v55 = vpack.i.bf16 %v7449_v57, %v3095_v2  ;;  %v7494_v62 = vsel %vm664_vm2, %v3054_v53, %v3055_v23  ;;  %v6015_v53 = vld [vmem:[%s8404_s5 + $0x108] sm:$0xff]  }
 0x5ec   : > { %v5129_v38 = vpop.f32.mrb[40].mxu0  ;;  %v2953_v15 = vmax.f32 %v2931_v30, 0.0  ;;  %5161 = vmatprep.subr.bf16.mxu1 %v6015_v53 }
 0x5ed   : > { %v7459_v16 = vsel %vm629_vm0, 0.0, %v3007_v0  ;;  %v3031_v7 = vsel %vm629_vm0, %v3007_v0, 0.0  ;;  %v5130_v56 = vpop.f32.mrb[41].mxu0  ;;  %5814 = vrot.lane.b32.xlu0 %v5813_v55, %s6039_s21 }
 0x5ee   : > { %v3057_v33 = vrot.slane %v7459_v16, 1  ;;  %v3058_v49 = vrot.slane %v3031_v7, 1  ;;  %v3099_v13 = vrot.slane %v7459_v16, 2  ;;  %v3100_v52 = vrot.slane %v3031_v7, 2  ;;  %v5132_v37 = vpop.f32.mrb[42].mxu0 }
 0x5ef   : > { %v3008_v31 = vrot.slane %v2953_v15, 7  ;;  %v5131_v1 = vadd.f32 %v5130_v56, %v5129_v38  ;;  %v5133_v24 = vpop.f32.mrb[43].mxu0  ;;  %v5818_v63 = vpack.i.bf16 %v7459_v16, %v7434_v34  ;;  %v7517_v56 = vsel %vm664_vm2, %v3051_v36, %v3052_v44 }
 0x5f0   : > { %v5134_v21 = vadd.f32 %v5133_v24, %v5132_v37  ;;  %v7472_v11 = vsel %vm713_vm1, %v3099_v13, %v3100_v52  ;;  %v7475_v9 = vsel %vm664_vm2, %v3057_v33, %v3058_v49 }
 0x5f1   : > { %v7478_v35 = vsel %vm629_vm0, 0.0, %v3008_v31  ;;  %v7481_v14 = vsel %vm629_vm0, %v3008_v31, 0.0  ;;  %v2871_v59 = vadd.f32 %v5131_v1, %v7408_v17  ;;  %5819 = vrot.lane.b32.xlu0 %v5818_v63, %s6041_s20  ;;  %v3296_v32 = vpack.c.bf16 %v7472_v11, %v7449_v57 }
 0x5f2   : > { %v3102_v41 = vrot.slane %v7478_v35, 2  ;;  %v3103_v20 = vrot.slane %v7481_v14, 2  ;;  %v2874_v30 = vadd.f32 %v5134_v21, %v7408_v17  ;;  %v5823_v55 = vpack.i.bf16 %v7478_v35, %v3095_v2  ;;  %v6016_v2 = vld [vmem:[%s8404_s5 + $0xc8] sm:$0xff]  }
 0x5f3   : > { %v2936_v0 = vadd.f32 %v7378_v40, %v2871_v59  ;;  %5259 = vmatprep.mubr.msk.bf16.mxu0 %vm977_vm11, %v3296_v32  ;;  %v5838_v38 = vpack.i.bf16 %v7475_v9, %v7494_v62  ;;  %v5828_v15 = vpack.i.bf16 %v7478_v35, %v7459_v16  ;;  %v5833_v3 = vpack.i.bf16 %v7472_v11, %v7517_v56 }
 0x5f4   : > { %v7503_v47 = vsel %vm713_vm1, %v3102_v41, %v3103_v20  ;;  %v2939_v40 = vadd.f32 %v7382_v22, %v2874_v30  ;;  %5824 = vrot.lane.b32.xlu1 %v5823_v55, %s6041_s20  ;;  %5162 = vmatpush3.bf16.msra.mxu1 %v6016_v2  ;;  %v3061_v55 = vrot.slane %v7481_v14, 1 }
 0x5f5   : > { %v2954_v26 = vmax.f32 %v2936_v0, 0.0  ;;  %v5135_v23 = vpop.f32.mrb[44].mxu0  ;;  %5839 = vrot.lane.b32.xlu0 %v5838_v38, %s6040_s29  ;;  %v5843_v52 = vpack.i.bf16 %v7494_v62, %v7503_v47  ;;  %v3060_v0 = vrot.slane %v7478_v35, 1 }
 0x5f6   : > { %v5136_v7 = vpop.f32.mrb[45].mxu0  ;;  %v2955_v49 = vmax.f32 %v2939_v40, 0.0 }
 0x5f7   : > { %v3009_v33 = vrot.slane %v2954_v26, 7  ;;  %v5137_v22 = vadd.f32 %v5136_v7, %v5135_v23  ;;  %v5138_v13 = vpop.f32.mrb[46].mxu0 }
 0x5f8   : > { %v5139_v37 = vpop.f32.mrb[47].mxu0  ;;  %v3010_v24 = vrot.slane %v2955_v49, 7  ;;  %5829 = vrot.lane.b32.xlu1 %v5828_v15, %s6040_s29 }
 0x5f9   : > { %v7524_v31 = vsel %vm629_vm0, 0.0, %v3009_v33  ;;  %v3033_v1 = vsel %vm629_vm0, %v3009_v33, 0.0  ;;  %v2879_v63 = vadd.f32 %v5137_v22, %v7408_v17  ;;  %5844 = vrot.lane.b32.xlu0 %v5843_v52, %s6039_s21  ;;  %v5140_v20 = vadd.f32 %v5139_v37, %v5138_v13 }
 0x5fa   : > { %v3063_v36 = vrot.slane %v7524_v31, 1  ;;  %v3064_v21 = vrot.slane %v3033_v1, 1  ;;  %v3105_v59 = vrot.slane %v7524_v31, 2  ;;  %v3106_v32 = vrot.slane %v3033_v1, 2 }
 0x5fb   : > { %v7533_v29 = vsel %vm629_vm0, 0.0, %v3010_v24  ;;  %v3034_v44 = vsel %vm629_vm0, %v3010_v24, 0.0  ;;  %v2944_v41 = vadd.f32 %v7376_v58, %v2879_v63  ;;  %v2882_v53 = vadd.f32 %v5140_v20, %v7408_v17 }
 0x5fc   : > { %v3107_v30 = vsel %vm713_vm1, %v3105_v59, %v3106_v32  ;;  %5834 = vrot.lane.b32.xlu1 %v5833_v3, %s6039_s21  ;;  %v3108_v40 = vrot.slane %v7533_v29, 2  ;;  %v3109_v23 = vrot.slane %v3034_v44, 2  ;;  %v5848_v58 = vpack.i.bf16 %v7449_v57, %v7524_v31 }
 0x5fd   : > { %v2956_v38 = vmax.f32 %v2944_v41, 0.0  ;;  %v3299_v26 = vpack.c.bf16 %v3107_v30, %v7503_v47  ;;  %v2947_v7 = vadd.f32 %v7380_v27, %v2882_v53  ;;  %v5853_v14 = vpack.i.bf16 %v7533_v29, %v7472_v11 }
 0x5fe   : > { %v7551_v17 = vsel %vm664_vm2, %v3063_v36, %v3064_v21  ;;  %5849 = vrot.lane.b32.xlu0 %v5848_v58, %s6041_s20  ;;  %v7560_v27 = vsel %vm664_vm2, %v3060_v0, %v3061_v55  ;;  %v5858_v52 = vpack.i.bf16 %v3107_v30, %v7475_v9  ;;  %v3110_v37 = vsel %vm713_vm1, %v3108_v40, %v3109_v23 }
 0x5ff   : > { %v3011_v2 = vrot.slane %v2956_v38, 7  ;;  %5260 = vmatmul.mubr.msk.bf16.vlgmr.msra.gmra.mrb[48].mxu0 %vm977_vm11, %v3299_v26  ;;  %v2957_v49 = vmax.f32 %v2947_v7, 0.0  ;;  %v5863_v11 = vpack.i.bf16 %v7551_v17, %v7560_v27  ;;  %v5868_v59 = vpack.i.bf16 %v7560_v27, %v3110_v37 }
 0x600   : > { %5854 = vrot.lane.b32.xlu1 %v5853_v14, %s6041_s20  ;;  %v3066_v38 = vrot.slane %v7533_v29, 1  ;;  %v3067_v53 = vrot.slane %v3034_v44, 1 }
 0x601   : > { %v7555_v15 = vsel %vm629_vm0, 0.0, %v3011_v2  ;;  %v3035_v33 = vsel %vm629_vm0, %v3011_v2, 0.0  ;;  %v3012_v13 = vrot.slane %v2957_v49, 7 }
 0x602   : > { %v3111_v57 = vrot.slane %v7555_v15, 2  ;;  %v3112_v22 = vrot.slane %v3035_v33, 2  ;;  %5864 = vrot.lane.b32.xlu0 %v5863_v11, %s6040_s29  ;;  %v3069_v32 = vrot.slane %v7555_v15, 1  ;;  %v3070_v41 = vrot.slane %v3035_v33, 1 }
 0x603   : > { %v3028_v1 = vsel %vm629_vm0, 0.0, %v3012_v13  ;;  %v3036_v24 = vsel %vm629_vm0, %v3012_v13, 0.0  ;;  %v5873_v40 = vpack.i.bf16 %v7503_v47, %v7555_v15  ;;  %v7590_v44 = vsel %vm664_vm2, %v3066_v38, %v3067_v53 }
 0x604   : > { %v3113_v3 = vsel %vm713_vm1, %v3111_v57, %v3112_v22  ;;  %5859 = vrot.lane.b32.xlu1 %v5858_v52, %s6039_s21  ;;  %v3172_v36 = vrot.slane %v3028_v1, 2  ;;  %v3173_v21 = vrot.slane %v3036_v24, 2  ;;  %v5878_v20 = vpack.i.bf16 %v3028_v1, %v3107_v30 }
 0x605   : > { %v3302_v63 = vpack.c.bf16 %v3113_v3, %v3110_v37  ;;  %v5898_v0 = vpack.i.bf16 %v3113_v3, %v3110_v37  ;;  %v5883_v30 = vpack.i.bf16 %v3113_v3, %v7551_v17  ;;  %v7585_v23 = vsel %vm664_vm2, %v3069_v32, %v3070_v41 }
 0x606   : > { %5869 = vrot.lane.b32.xlu0 %v5868_v59, %s6039_s21  ;;  %v3174_v55 = vsel %vm713_vm1, %v3172_v36, %v3173_v21  ;;  %v5888_v47 = vpack.i.bf16 %v7533_v29, %v7524_v31  ;;  %v3161_v58 = vrot.slane %v3028_v1, 1  ;;  %v3162_v2 = vrot.slane %v3036_v24, 1 }
 0x607   : > { %5263 = vmatprep.mubr.msk.bf16.mxu0 %vm977_vm11, %v3302_v63  ;;  %v3305_v26 = vpack.c.bf16 %v6178_v19, %v3174_v55  ;;  %v5893_v19 = vpack.i.bf16 %v7585_v23, %v7590_v44  ;;  %v5903_v14 = vpack.i.bf16 %v7590_v44, %v3174_v55 }
 0x608   : > { %5879 = vrot.lane.b32.xlu1 %v5878_v20, %s6041_s20  ;;  %v7600_v7 = vsel %vm664_vm2, %v3161_v58, %v3162_v2 }
 0x609   : > { %5264 = vmatmul.mubr.msk.bf16.gmra.mrb[52].mxu0 %vm977_vm11, %v3305_v26  ;;  %v5908_v33 = vpack.i.bf16 %v7555_v15, %v7600_v7 }
 0x60a   : > { %5874 = vrot.lane.b32.xlu0 %v5873_v40, %s6041_s20 }
 0x60c   : > { %5884 = vrot.lane.b32.xlu1 %v5883_v30, %s6039_s21 }
 0x60e   : > { %5894 = vrot.lane.b32.xlu0 %v5893_v19, %s6040_s29 }
 0x610   : > { %5889 = vrot.lane.b32.xlu1 %v5888_v47, %s6040_s29 }
 0x612   : > { %5899 = vrot.lane.b32.xlu0 %v5898_v0, %s6041_s20 }
 0x614   : > { %3084 = vrot.lane.b32.xlu1 %v7585_v23, %s6039_s21 }
 0x616   : > { %5904 = vrot.lane.b32.xlu0 %v5903_v14, %s6039_s21 }
 0x618   : > { %5909 = vrot.lane.b32.xlu1 %v5908_v33, %s6040_s29 }
 0x61a   : > { %3150 = vrot.lane.b32.xlu0 %v3028_v1, %s6040_s29 }
 0x65c   : > { %v5810_v57 = vpop.permute.xlu1 %5809 }
 0x65d   : > { %v5811_v26 = vunpack.i.l.bf16 %v5810_v57 }
 0x65f   : > { %v5815_v49 = vpop.permute.xlu0 %5814  ;;  %v3262_v33 = vsel %vm1419_vm14, %v6650_v39, %v5811_v26 }
 0x660   : > { %v5817_v11 = vunpack.i.h.bf16 %v5815_v49  ;;  %v5816_v13 = vunpack.i.l.bf16 %v5815_v49 }
 0x662   : > { %v3271_v63 = vsel %vm977_vm11, %v7494_v62, %v5817_v11  ;;  %v3270_v36 = vsel %vm977_vm11, %v7517_v56, %v5816_v13  ;;  %v5812_v56 = vunpack.i.h.bf16 %v5810_v57 }
 0x663   : > { %v5820_v22 = vpop.permute.xlu0 %5819 }
 0x664   : > { %v5822_v52 = vunpack.i.h.bf16 %v5820_v22  ;;  %v5821_v37 = vunpack.i.l.bf16 %v5820_v22 }
 0x666   : > { %v5825_v3 = vpop.permute.xlu1 %5824  ;;  %v3278_v32 = vsel %vm1410_vm13, %v3270_v36, %v5821_v37  ;;  %v3279_v1 = vsel %vm1410_vm13, %v3271_v63, %v5822_v52 }
 0x667   : > { %v5840_v24 = vpop.permute.xlu0 %5839  ;;  %v5826_v40 = vunpack.i.l.bf16 %v5825_v3  ;;  %v5827_v37 = vunpack.i.h.bf16 %v5825_v3 }
 0x668   : > { %v5842_v21 = vunpack.i.h.bf16 %v5840_v24  ;;  %v5841_v59 = vunpack.i.l.bf16 %v5840_v24 }
 0x66a   : > { %v3286_v41 = vsel %vm1419_vm14, %v3278_v32, %v5841_v59  ;;  %v3287_v20 = vsel %vm1419_vm14, %v3279_v1, %v5842_v21  ;;  %v5830_v0 = vpop.permute.xlu1 %5829 }
 0x66b   : > { %v3295_v55 = vpack.c.bf16 %v3287_v20, %v3286_v41  ;;  %v5845_v38 = vpop.permute.xlu0 %5844 }
 0x66c   : > { %v5846_v58 = vunpack.i.l.bf16 %v5845_v38  ;;  %v5847_v49 = vunpack.i.h.bf16 %v5845_v38 }
 0x66d   : > { %3464 = vmatprep.mubr.bf16.mxu1 %v3295_v55  ;;  %v5831_v55 = vunpack.i.l.bf16 %v5830_v0 }
 0x66e   : > { %v5835_v53 = vpop.permute.xlu1 %5834  ;;  %v3249_v39 = vsel %vm977_vm11, %v7434_v34, %v5847_v49 }
 0x66f   : > { %v5836_v62 = vunpack.i.l.bf16 %v5835_v53  ;;  %v5837_v30 = vunpack.i.h.bf16 %v5835_v53 }
 0x670   : > { %v5850_v47 = vpop.permute.xlu0 %5849 }
 0x671   : > { %v3248_v19 = vsel %vm977_vm11, %v7422_v48, %v5836_v62  ;;  %v5851_v11 = vunpack.i.l.bf16 %v5850_v47  ;;  %v3272_v13 = vsel %vm977_vm11, %v7475_v9, %v5837_v30  ;;  %v5852_v57 = vunpack.i.h.bf16 %v5850_v47 }
 0x672   : > { %v3255_v2 = vsel %vm1410_vm13, %v3248_v19, %v5826_v40  ;;  %v5855_v14 = vpop.permute.xlu1 %5854  ;;  %v3273_v48 = vsel %vm977_vm11, %v7560_v27, %v5846_v58  ;;  %v3280_v1 = vsel %vm1410_vm13, %v3272_v13, %v5827_v37  ;;  %v5832_v27 = vunpack.i.h.bf16 %v5830_v0 }
 0x673   : > { %v3263_v22 = vsel %vm1419_vm14, %v3255_v2, %v5812_v56  ;;  %v3281_v59 = vsel %vm1410_vm13, %v3273_v48, %v5851_v11  ;;  %v3256_v9 = vsel %vm1410_vm13, %v3249_v39, %v5852_v57  ;;  %v5856_v41 = vunpack.i.l.bf16 %v5855_v14 }
 0x674   : > { %v3294_v52 = vpack.c.bf16 %v3263_v22, %v3262_v33  ;;  %v5865_v24 = vpop.permute.xlu0 %5864  ;;  %v3264_v30 = vsel %vm1419_vm14, %v3256_v9, %v5831_v55 }
 0x675   : > { %v5867_v63 = vunpack.i.h.bf16 %v5865_v24  ;;  %v5866_v36 = vunpack.i.l.bf16 %v5865_v24 }
 0x676   : > { %v5860_v21 = vpop.permute.xlu1 %5859  ;;  %3465 = vmatmul.mubr.bf16.vlgmr.msra.gmra.mrb[32].mxu1 %v3294_v52 }
 0x677   : > { %v5861_v32 = vunpack.i.l.bf16 %v5860_v21  ;;  %v3288_v3 = vsel %vm1419_vm14, %v3280_v1, %v5866_v36  ;;  %v3289_v20 = vsel %vm1419_vm14, %v3281_v59, %v5867_v63  ;;  %v5862_v34 = vunpack.i.h.bf16 %v5860_v21 }
 0x678   : > { %v5870_v53 = vpop.permute.xlu0 %5869  ;;  %v3298_v26 = vpack.c.bf16 %v3289_v20, %v3288_v3 }
 0x679   : > { %v3250_v38 = vsel %vm977_vm11, %v7459_v16, %v5861_v32  ;;  %v3274_v58 = vsel %vm977_vm11, %v7551_v17, %v5862_v34  ;;  %v5871_v0 = vunpack.i.l.bf16 %v5870_v53  ;;  %v5857_v16 = vunpack.i.h.bf16 %v5855_v14 }
 0x67a   : > { %v5880_v62 = vpop.permute.xlu1 %5879  ;;  %v3257_v40 = vsel %vm1410_vm13, %v3250_v38, %v5856_v41  ;;  %3472 = vmatprep.mubr.bf16.mxu1 %v3298_v26  ;;  %v5872_v33 = vunpack.i.h.bf16 %v5870_v53 }
 0x67b   : > { %v3265_v56 = vsel %vm1419_vm14, %v3257_v40, %v5832_v27  ;;  %v3282_v57 = vsel %vm1410_vm13, %v3274_v58, %v5857_v16  ;;  %v3275_v37 = vsel %vm977_vm11, %v7590_v44, %v5871_v0  ;;  %v5881_v24 = vunpack.i.l.bf16 %v5880_v62 }
 0x67c   : > { %v3297_v19 = vpack.c.bf16 %v3265_v56, %v3264_v30  ;;  %v5875_v47 = vpop.permute.xlu0 %5874  ;;  %v3251_v14 = vsel %vm977_vm11, %v7478_v35, %v5872_v33  ;;  %v5882_v26 = vunpack.i.h.bf16 %v5880_v62 }
 0x67d   : > { %v5876_v49 = vunpack.i.l.bf16 %v5875_v47  ;;  %v5877_v11 = vunpack.i.h.bf16 %v5875_v47 }
 0x67e   : > { %v5885_v2 = vpop.permute.xlu1 %5884  ;;  %3473 = vmatmul.mubr.bf16.gmra.mrb[36].mxu1 %v3297_v19 }
 0x67f   : > { %v5886_v22 = vunpack.i.l.bf16 %v5885_v2  ;;  %v3283_v36 = vsel %vm1410_vm13, %v3275_v37, %v5876_v49  ;;  %v3258_v59 = vsel %vm1410_vm13, %v3251_v14, %v5877_v11  ;;  %v5887_v44 = vunpack.i.h.bf16 %v5885_v2  ;;  %v6020_v14 = vld [vmem:[%s8410_s11 + $0x8] sm:$0xff]  }
 0x680   : > { %v5895_v52 = vpop.permute.xlu0 %5894 }
 0x681   : > { %v3252_v13 = vsel %vm977_vm11, %v7524_v31, %v5886_v22  ;;  %v5897_v48 = vunpack.i.h.bf16 %v5895_v52  ;;  %v5896_v17 = vunpack.i.l.bf16 %v5895_v52  ;;  %v3276_v55 = vsel %vm977_vm11, %v7585_v23, %v5887_v44 }
 0x682   : > { %v5890_v63 = vpop.permute.xlu1 %5889  ;;  %v3259_v1 = vsel %vm1410_vm13, %v3252_v13, %v5881_v24  ;;  %v3284_v23 = vsel %vm1410_vm13, %v3276_v55, %v5882_v26 }
 0x683   : > { %v5892_v21 = vunpack.i.h.bf16 %v5890_v63  ;;  %v5891_v39 = vunpack.i.l.bf16 %v5890_v63  ;;  %v3290_v31 = vsel %vm1419_vm14, %v3282_v57, %v5896_v17  ;;  %v3291_v32 = vsel %vm1419_vm14, %v3283_v36, %v5897_v48  ;;  %v6018_v48 = vld [vmem:[%s8406_s7] sm:$0xff]   ;;  %v6019_v63 = vld [vmem:[%s8406_s7 + $0x8] sm:$0xff]  }
 0x684   : > { %v5900_v9 = vpop.permute.xlu0 %5899  ;;  %v3301_v41 = vpack.c.bf16 %v3291_v32, %v3290_v31  ;;  %5267 = vmatprep.subr.bf16.mxu0 %v6018_v48 }
 0x685   : > { %v3266_v3 = vsel %vm1419_vm14, %v3258_v59, %v5891_v39  ;;  %v3267_v20 = vsel %vm1419_vm14, %v3259_v1, %v5892_v21  ;;  %v5902_v38 = vunpack.i.h.bf16 %v5900_v9  ;;  %v5901_v19 = vunpack.i.l.bf16 %v5900_v9  ;;  %5268 = vmatpush3.bf16.msra.mxu0 %v6018_v48  ;;  %v4882_v59 = vld [vmem:[%s8405_s6 + $0x1] ss:$0 sm:$0xff] }
 0x686   : > { %v3085_v35 = vpop.permute.xlu1 %3084  ;;  %v3300_v27 = vpack.c.bf16 %v3267_v20, %v3266_v3  ;;  %3480 = vmatprep.mubr.bf16.mxu1 %v3301_v41  ;;  %5269 = vmatprep.subr.bf16.mxu0 %v6019_v63 }
 0x687   : > { %v3254_v34 = vsel %vm977_vm11, %v7555_v15, %v3085_v35 }
 0x688   : > { %3481 = vmatmul.mubr.bf16.gmra.mrb[40].mxu1 %v3300_v27  ;;  %v5905_v53 = vpop.permute.xlu0 %5904  ;;  %v3261_v33 = vsel %vm1410_vm13, %v3254_v34, %v5902_v38 }
 0x689   : > { %v5907_v40 = vunpack.i.h.bf16 %v5905_v53  ;;  %v5906_v30 = vunpack.i.l.bf16 %v5905_v53  ;;  %5270 = vmatpush3.bf16.msra.mxu0 %v6019_v63 }
 0x68a   : > { %v5910_v56 = vpop.permute.xlu1 %5909 }
 0x68b   : > { %v5912_v47 = vunpack.i.h.bf16 %v5910_v56  ;;  %v5911_v58 = vunpack.i.l.bf16 %v5910_v56  ;;  %v3253_v0 = vsel %vm977_vm11, %v7533_v29, %v5907_v40  ;;  %v3277_v2 = vsel %vm977_vm11, %v7600_v7, %v5906_v30 }
 0x68c   : > { %v3151_v16 = vpop.permute.xlu0 %3150  ;;  %v3260_v62 = vsel %vm1410_vm13, %v3253_v0, %v5901_v19  ;;  %v3285_v15 = vsel %vm1410_vm13, %v3277_v2, %v6694_v4  ;;  %v6017_v4 = vld [vmem:[%s8410_s11] sm:$0xff]  }
 0x68d   : > { %v3292_v49 = vsel %vm1419_vm14, %v3284_v23, %v5911_v58  ;;  %v3268_v22 = vsel %vm1419_vm14, %v3260_v62, %v5912_v47  ;;  %v3269_v11 = vsel %vm1419_vm14, %v3261_v33, %v3151_v16  ;;  %v3293_v29 = vsel %vm1419_vm14, %v3285_v15, %v6704_v54  ;;  %5279 = vmatprep.subr.bf16.mxu1 %v6017_v4 }
 0x68e   : > { %v3303_v7 = vpack.c.bf16 %v3269_v11, %v3268_v22  ;;  %v3304_v13 = vpack.c.bf16 %v3293_v29, %v3292_v49  ;;  %5280 = vmatpush3.bf16.msra.mxu1 %v6017_v4 }
 0x68f   : > { %5281 = vmatprep.subr.bf16.mxu1 %v6020_v14 }
 0x690   : > { %3488 = vmatprep.mubr.bf16.mxu1 %v3304_v13 }
 0x691   : > { %3489 = vmatmul.mubr.bf16.gmra.mrb[44].mxu1 %v3303_v7 }
 0x692   : > { %5282 = vmatpush3.bf16.msra.mxu1 %v6020_v14 }
 0x6d2   : > { %v5261_v52 = vpop.f32.mrb[48].mxu0 }
 0x6d3   : > { %v3531_v57 = vpop.f32.mrb[49].mxu0 }
 0x6d4   : > { %v5262_v37 = vpop.f32.mrb[50].mxu0 }
 0x6d5   : > { %v3534_v24 = vpop.f32.mrb[51].mxu0 }
 0x6dc   : > { %v7680_v54 = vpop.f32.mrb[52].mxu0 }
 0x6dd   : > { %v3547_v17 = vpop.f32.mrb[53].mxu0 }
 0x6de   : > { %v7688_v36 = vpop.f32.mrb[54].mxu0 }
 0x6df   : > { %v3550_v21 = vpop.f32.mrb[55].mxu0 }
 0x749   : > { %v5163_v39 = vpop.f32.mrb[32].mxu1 }
 0x74a   : > { %v5164_v31 = vpop.f32.mrb[33].mxu1 }
 0x74b   : > { %v5165_v32 = vadd.f32 %v5164_v31, %v5163_v39  ;;  %v5166_v1 = vpop.f32.mrb[34].mxu1 }
 0x74c   : > { %v5167_v44 = vpop.f32.mrb[35].mxu1 }
 0x74d   : > { %v3467_v9 = vadd.f32 %v5165_v32, %v4882_v59  ;;  %v5168_v41 = vadd.f32 %v5167_v44, %v5166_v1 }
 0x74f   : > { %v3532_v3 = vadd.f32 %v3531_v57, %v3467_v9  ;;  %v3470_v20 = vadd.f32 %v5168_v41, %v4882_v59 }
 0x751   : > { %v3562_v35 = vadd.f32 %v3532_v3, %v2338_v50  ;;  %v3535_v27 = vadd.f32 %v3534_v24, %v3470_v20  ;;  %v5169_v55 = vpop.f32.mrb[36].mxu1 }
 0x752   : > { %v5170_v38 = vpop.f32.mrb[37].mxu1 }
 0x753   : > { %v3563_v53 = vadd.f32 %v3535_v27, %v2339_v8  ;;  %v5171_v26 = vadd.f32 %v5170_v38, %v5169_v55  ;;  %v5172_v34 = vpop.f32.mrb[38].mxu1  ;;  %v3570_v30 = vmax.f32 %v3562_v35, 0.0  ;;  %v4992_v38 = vld [vmem:[#allocation2] ss:$0 sm:$0xff] }
 0x754   : > { %v5173_v40 = vpop.f32.mrb[39].mxu1 }
 0x755   : > { %v3571_v56 = vmax.f32 %v3563_v53, 0.0  ;;  %v3475_v19 = vadd.f32 %v5171_v26, %v4882_v59  ;;  %v5174_v47 = vadd.f32 %v5173_v40, %v5172_v34 }
 0x757   : > { %v3540_v58 = vadd.f32 %v5261_v52, %v3475_v19  ;;  %v3478_v0 = vadd.f32 %v5174_v47, %v4882_v59  ;;  %v3578_v2 = vpack.c.bf16 %v3571_v56, %v3570_v30 }
 0x759   : > { %v3564_v25 = vadd.f32 %v3540_v58, %v2340_v46  ;;  %v3543_v50 = vadd.f32 %v5262_v37, %v3478_v0  ;;  %5271 = vmatprep.mubr.msk.bf16.mxu0 %vm977_vm11, %v3578_v2  ;;  %5283 = vmatprep.mubr.msk.bf16.mxu1 %vm977_vm11, %v3578_v2 }
 0x75b   : > { %v3565_v5 = vadd.f32 %v3543_v50, %v2341_v6  ;;  %v5175_v8 = vpop.f32.mrb[40].mxu1  ;;  %v3572_v16 = vmax.f32 %v3564_v25, 0.0 }
 0x75c   : > { %v5176_v23 = vpop.f32.mrb[41].mxu1 }
 0x75d   : > { %v3573_v62 = vmax.f32 %v3565_v5, 0.0  ;;  %v5177_v33 = vadd.f32 %v5176_v23, %v5175_v8  ;;  %v5178_v15 = vpop.f32.mrb[42].mxu1 }
 0x75e   : > { %v5179_v49 = vpop.f32.mrb[43].mxu1 }
 0x75f   : > { %v3579_v22 = vpack.c.bf16 %v3573_v62, %v3572_v16  ;;  %v3483_v11 = vadd.f32 %v5177_v33, %v4882_v59  ;;  %v5180_v29 = vadd.f32 %v5179_v49, %v5178_v15 }
 0x761   : > { %v3548_v43 = vadd.f32 %v3547_v17, %v3483_v11  ;;  %v3486_v46 = vadd.f32 %v5180_v29, %v4882_v59  ;;  %5272 = vmatmul.mubr.msk.bf16.vlgmr.msra.gmra.mrb[56].mxu0 %vm977_vm11, %v3579_v22  ;;  %5284 = vmatmul.mubr.msk.bf16.vlgmr.msra.gmra.mrb[48].mxu1 %vm977_vm11, %v3579_v22 }
 0x763   : > { %v3566_v10 = vadd.f32 %v3548_v43, %v2342_v28  ;;  %v3551_v6 = vadd.f32 %v3550_v21, %v3486_v46 }
 0x764   : > { %v5181_v13 = vpop.f32.mrb[44].mxu1 }
 0x765   : > { %v3567_v7 = vadd.f32 %v3551_v6, %v2343_v45  ;;  %v5182_v52 = vpop.f32.mrb[45].mxu1  ;;  %v3574_v57 = vmax.f32 %v3566_v10, 0.0 }
 0x766   : > { %v5183_v4 = vadd.f32 %v5182_v52, %v5181_v13  ;;  %v5184_v24 = vpop.f32.mrb[46].mxu1 }
 0x767   : > { %v3575_v37 = vmax.f32 %v3567_v7, 0.0  ;;  %v5185_v48 = vpop.f32.mrb[47].mxu1 }
 0x768   : > { %v3491_v17 = vadd.f32 %v5183_v4, %v4882_v59  ;;  %v5186_v63 = vadd.f32 %v5185_v48, %v5184_v24 }
 0x769   : > { %v3580_v14 = vpack.c.bf16 %v3575_v37, %v3574_v57  ;;  %v6044_v37 = vmov 2  }
 0x76a   : > { %v3556_v39 = vadd.f32 %v7680_v54, %v3491_v17  ;;  %v3494_v31 = vadd.f32 %v5186_v63, %v4882_v59  ;;  %v6042_v54 = vmov 0   ;;  %v6043_v59 = vmov 1  }
 0x76b   : > { %5275 = vmatprep.mubr.msk.bf16.mxu0 %vm977_vm11, %v3580_v14  ;;  %5287 = vmatprep.mubr.msk.bf16.mxu1 %vm977_vm11, %v3580_v14  ;;  %v6045_v17 = vmov 5   ;;  %v6046_v63 = vmov 3   ;;  %v6047_v14 = vmov 4  }
 0x76c   : > { %v3568_v60 = vadd.f32 %v3556_v39, %v2344_v51  ;;  %v3559_v28 = vadd.f32 %v7688_v36, %v3494_v31  ;;  %5913 = vset.pattern.permute.xlu1 %v6042_v54  ;;  %5916 = vset.pattern.permute.xlu0 %v6043_v59 }
 0x76e   : > { %v3569_v42 = vadd.f32 %v3559_v28, %v2345_v61  ;;  %v3576_v45 = vmax.f32 %v3568_v60, 0.0 }
 0x770   : > { %v3577_v21 = vmax.f32 %v3569_v42, 0.0 }
 0x772   : > { %v3581_v32 = vpack.c.bf16 %v3577_v21, %v3576_v45  ;;  %v3694_v45 = vld [vmem:[%s8408_s9 + $0x18] sm:$0xff] }
 0x774   : > { %5276 = vmatmul.mubr.msk.bf16.gmra.mrb[60].mxu0 %vm977_vm11, %v3581_v32  ;;  %5288 = vmatmul.mubr.msk.bf16.gmra.mrb[52].mxu1 %vm977_vm11, %v3581_v32  ;;  %v3696_v32 = vld [vmem:[%s8408_s9 + $0x28] sm:$0xff] }
 0x834   : > { %v5273_v51 = vpop.f32.mrb[56].mxu0  ;;  %v5285_v18 = vpop.f32.mrb[48].mxu1 }
 0x835   : > { %v3660_v61 = vadd.f32 %v5273_v51, %v7724_v12  ;;  %v3651_v36 = vpop.f32.mrb[57].mxu0  ;;  %v4468_v1 = vpop.f32.mrb[49].mxu1  ;;  %v4477_v26 = vadd.f32 %v5285_v18, %v4992_v38  ;;  %v3695_v18 = vld [vmem:[%s8408_s9 + $0x20] sm:$0xff] }
 0x836   : > { %v3652_v44 = vadd.f32 %v7724_v12, %v3651_v36  ;;  %v5274_v9 = vpop.f32.mrb[58].mxu0  ;;  %v5286_v41 = vpop.f32.mrb[50].mxu1  ;;  %v4469_v19 = vadd.f32 %v4992_v38, %v4468_v1 }
 0x837   : > { %v7728_v3 = vmax.f32 %v3660_v61, 0.0  ;;  %v3654_v20 = vpop.f32.mrb[59].mxu0  ;;  %v4471_v35 = vpop.f32.mrb[51].mxu1  ;;  %v3663_v55 = vadd.f32 %v5274_v9, %v7724_v12  ;;  %v4501_v40 = vmax.f32 %v4477_v26, 0.0  ;;  %v4480_v49 = vadd.f32 %v5286_v41, %v4992_v38 }
 0x838   : > { %v7730_v27 = vmax.f32 %v3652_v44, 0.0  ;;  %v3655_v34 = vadd.f32 %v7724_v12, %v3654_v20  ;;  %v4472_v56 = vadd.f32 %v4992_v38, %v4471_v35  ;;  %v4499_v2 = vmax.f32 %v4469_v19, 0.0 }
 0x839   : > { %3719 = vperm.xlu1 %5913, %v7728_v3   ;;  %v7735_v53 = vmax.f32 %v3663_v55, 0.0  ;;  %v4502_v29 = vmax.f32 %v4480_v49, 0.0 }
 0x83a   : > { %3834 = vperm.xlu0 %5916, %v7730_v27   ;;  %v7741_v30 = vmax.f32 %v3655_v34, 0.0  ;;  %v4500_v47 = vmax.f32 %v4472_v56, 0.0 }
 0x83d   : > { %5914 = vset.pattern.permute.xlu1 %v6043_v59 }
 0x83e   : > { %3842 = vperm.xlu1 %5914, %v7728_v3   ;;  %3846 = vperm.xlu0 %5916, %v7735_v53  }
 0x842   : > { %5915 = vset.pattern.permute.xlu1 %v6042_v54  ;;  %5917 = vset.pattern.permute.xlu0 %v6042_v54 }
 0x843   : > { %4535 = vperm.xlu1 %5915, %v4501_v40   ;;  %3714 = vperm.xlu0 %5917, %v7741_v30   ;;  %v3697_v40 = vld [vmem:[%s8408_s9 + $0x30] sm:$0xff] }
 0x847   : > { %4530 = vperm.xlu0 %5917, %v4500_v47   ;;  %3709 = vperm.xlu1 %5915, %v7730_v27   ;;  %v5277_v58 = vpop.f32.mrb[60].mxu0  ;;  %v5289_v0 = vpop.f32.mrb[52].mxu1 }
 0x848   : > { %v3676_v25 = vadd.f32 %v5277_v58, %v7724_v12  ;;  %v3667_v50 = vpop.f32.mrb[61].mxu0  ;;  %v4484_v5 = vpop.f32.mrb[53].mxu1  ;;  %v4493_v62 = vadd.f32 %v5289_v0, %v4992_v38 }
 0x849   : > { %v5278_v8 = vpop.f32.mrb[62].mxu0  ;;  %v5290_v23 = vpop.f32.mrb[54].mxu1  ;;  %v3668_v11 = vadd.f32 %v7724_v12, %v3667_v50  ;;  %v4485_v46 = vadd.f32 %v4992_v38, %v4484_v5 }
 0x84a   : > { %v7748_v16 = vmax.f32 %v3676_v25, 0.0  ;;  %v3670_v33 = vpop.f32.mrb[63].mxu0  ;;  %v4487_v15 = vpop.f32.mrb[55].mxu1  ;;  %v4505_v22 = vmax.f32 %v4493_v62, 0.0  ;;  %v3679_v7 = vadd.f32 %v5278_v8, %v7724_v12  ;;  %v4496_v4 = vadd.f32 %v5290_v23, %v4992_v38  ;;  %v3699_v8 = vld [vmem:[%s8408_s9 + $0x40] sm:$0xff]  ;;  %v3700_v23 = vld [vmem:[%s8408_s9 + $0x48] sm:$0xff] }
 0x84b   : > { %4525 = vperm.xlu1 %5915, %v4499_v2   ;;  %v7753_v43 = vmax.f32 %v3668_v11, 0.0  ;;  %v4503_v10 = vmax.f32 %v4485_v46, 0.0  ;;  %v3671_v6 = vadd.f32 %v7724_v12, %v3670_v33  ;;  %v4488_v57 = vadd.f32 %v4992_v38, %v4487_v15  ;;  %v3692_v12 = vld [vmem:[%s8408_s9 + $0x8] sm:$0xff]  ;;  %v4912_v15 = vld [vmem:[%s8408_s9 + $0x80] sm:$0xff]  ;;  %v4914_v11 = vld [vmem:[%s8408_s9 + $0x90] sm:$0xff] }
 0x84c   : > { %3739 = vperm.xlu0 %5917, %v7748_v16   ;;  %v7765_v52 = vmax.f32 %v3679_v7, 0.0  ;;  %v4506_v48 = vmax.f32 %v4496_v4, 0.0  ;;  %v4917_v62 = vld [vmem:[%s8408_s9 + $0xa8] sm:$0xff]  ;;  %v4919_v46 = vld [vmem:[%s8408_s9 + $0xb8] sm:$0xff] }
 0x84d   : > { %v7760_v13 = vmax.f32 %v3671_v6, 0.0  ;;  %v4504_v24 = vmax.f32 %v4488_v57, 0.0 }
 0x84f   : > { %3724 = vperm.xlu1 %5915, %v7735_v53  }
 0x850   : > { %4555 = vperm.xlu0 %5917, %v4505_v22  }
 0x853   : > { %4540 = vperm.xlu1 %5915, %v4502_v29   ;;  %v4915_v29 = vld [vmem:[%s8408_s9 + $0x98] sm:$0xff] }
 0x854   : > { %3729 = vperm.xlu0 %5917, %v7753_v43  }
 0x857   : > { %5918 = vset.pattern.permute.xlu1 %v6043_v59 }
 0x858   : > { %3838 = vperm.xlu1 %5918, %v7741_v30   ;;  %4545 = vperm.xlu0 %5917, %v4503_v10   ;;  %v4916_v10 = vld [vmem:[%s8408_s9 + $0xa0] sm:$0xff] }
 0x85c   : > { %3850 = vperm.xlu1 %5918, %v7753_v43   ;;  %5920 = vset.pattern.permute.xlu0 %v6043_v59 }
 0x85d   : > { %3854 = vperm.xlu0 %5920, %v7760_v13  }
 0x860   : > { %5919 = vset.pattern.permute.xlu1 %v6042_v54 }
 0x861   : > { %3744 = vperm.xlu1 %5919, %v7765_v52   ;;  %3858 = vperm.xlu0 %5920, %v7748_v16  }
 0x865   : > { %3734 = vperm.xlu1 %5919, %v7760_v13   ;;  %5923 = vset.pattern.permute.xlu0 %v6044_v37 }
 0x866   : > { %3956 = vperm.xlu0 %5923, %v7741_v30  }
 0x869   : > { %4550 = vperm.xlu1 %5919, %v4504_v24  }
 0x86a   : > { %3968 = vperm.xlu0 %5923, %v7753_v43  }
 0x86d   : > { %4560 = vperm.xlu1 %5919, %v4506_v48  }
 0x86e   : > { %3976 = vperm.xlu0 %5923, %v7748_v16  }
 0x871   : > { %5921 = vset.pattern.permute.xlu1 %v6043_v59  ;;  %v3691_v59 = vld [vmem:[%s8408_s9] sm:$0xff] }
 0x872   : > { %3862 = vperm.xlu1 %5921, %v7765_v52   ;;  %5928 = vset.pattern.permute.xlu0 %v6045_v17 }
 0x873   : > { %4310 = vperm.xlu0 %5928, %v7741_v30  }
 0x876   : > { %5922 = vset.pattern.permute.xlu1 %v6044_v37 }
 0x877   : > { %3952 = vperm.xlu1 %5922, %v7730_v27   ;;  %4314 = vperm.xlu0 %5928, %v7728_v3  }
 0x87b   : > { %3960 = vperm.xlu1 %5922, %v7728_v3   ;;  %5931 = vset.pattern.permute.xlu0 %v6046_v63 }
 0x87c   : > { %4070 = vperm.xlu0 %5931, %v7730_v27  }
 0x87f   : > { %3964 = vperm.xlu1 %5922, %v7735_v53  }
 0x880   : > { %4098 = vperm.xlu0 %5931, %v7765_v52  }
 0x883   : > { %3980 = vperm.xlu1 %5922, %v7765_v52  }
 0x884   : > { %5935 = vset.pattern.permute.xlu0 %v6047_v14 }
 0x885   : > { %4188 = vperm.xlu0 %5935, %v7730_v27  }
 0x887   : > { %5924 = vset.pattern.permute.xlu1 %v6046_v63 }
 0x888   : > { %4074 = vperm.xlu1 %5924, %v7741_v30  }
 0x889   : > { %4196 = vperm.xlu0 %5935, %v7728_v3  }
 0x88c   : > { %4078 = vperm.xlu1 %5924, %v7728_v3  }
 0x88d   : > { %4204 = vperm.xlu0 %5935, %v7753_v43  }
 0x890   : > { %5925 = vset.pattern.permute.xlu1 %v6047_v14 }
 0x891   : > { %4192 = vperm.xlu1 %5925, %v7741_v30   ;;  %4216 = vperm.xlu0 %5935, %v7765_v52   ;;  %v3698_v30 = vld [vmem:[%s8408_s9 + $0x38] sm:$0xff] }
 0x895   : > { %5926 = vset.pattern.permute.xlu1 %v6046_v63  ;;  %4208 = vperm.xlu0 %5935, %v7760_v13  }
 0x896   : > { %4082 = vperm.xlu1 %5926, %v7735_v53  }
 0x899   : > { %5941 = vset.pattern.permute.xlu0 %v6042_v54  ;;  %v3693_v54 = vld [vmem:[%s8408_s9 + $0x10] sm:$0xff] }
 0x89a   : > { %5927 = vset.pattern.permute.xlu1 %v6045_v17 }
 0x89b   : > { %4306 = vperm.xlu1 %5927, %v7730_v27  }
 0x89f   : > { %5929 = vset.pattern.permute.xlu1 %v6046_v63 }
 0x8a0   : > { %4086 = vperm.xlu1 %5929, %v7753_v43  }
 0x8a4   : > { %5930 = vset.pattern.permute.xlu1 %v6047_v14 }
 0x8a5   : > { %4200 = vperm.xlu1 %5930, %v7735_v53  }
 0x8a9   : > { %5932 = vset.pattern.permute.xlu1 %v6045_v17 }
 0x8aa   : > { %4318 = vperm.xlu1 %5932, %v7735_v53  }
 0x8ae   : > { %5933 = vset.pattern.permute.xlu1 %v6046_v63 }
 0x8af   : > { %4094 = vperm.xlu1 %5933, %v7748_v16  }
 0x8b3   : > { %5934 = vset.pattern.permute.xlu1 %v6045_v17 }
 0x8b4   : > { %4322 = vperm.xlu1 %5934, %v7753_v43  }
 0x8b8   : > { %v3720_v39 = vpop.permute.xlu1 %3719  ;;  %5936 = vset.pattern.permute.xlu1 %v6047_v14  ;;  %v4508_v14 = vld [vmem:[%s8412_s13 + $0x8] sm:$0xff] }
 0x8b9   : > { %v7804_v31 = vpop.permute.xlu0 %3834  ;;  %4212 = vperm.xlu1 %5936, %v7748_v16   ;;  %v3752_v36 = vmul.f32 %v3720_v39, %v3696_v32  ;;  %v3751_v3 = vmul.f32 %v3720_v39, %v3695_v18  ;;  %v4921_v39 = vld [vmem:[%s8408_s9 + $0xc8] sm:$0xff] }
 0x8ba   : > { %v3865_v57 = vmul.f32 %v4912_v15, %v7804_v31 }
 0x8bb   : > { %v3779_v53 = vsel %vm1410_vm13, %v3752_v36, 0.0 }
 0x8bd   : > { %v7807_v60 = vpop.permute.xlu1 %3842  ;;  %v7809_v28 = vpop.permute.xlu0 %3846  ;;  %5937 = vset.pattern.permute.xlu1 %v6045_v17 }
 0x8be   : > { %4330 = vperm.xlu1 %5937, %v7748_v16   ;;  %v4913_v16 = vld [vmem:[%s8408_s9 + $0x88] sm:$0xff]  ;;  %v3870_v6 = vmul.f32 %v4917_v62, %v7807_v60 }
 0x8bf   : > { %v3866_v43 = vmul.f32 %v4913_v16, %v7804_v31 }
 0x8c1   : > { %v3894_v31 = vsel %vm1410_vm13, %v3866_v43, 0.0 }
 0x8c2   : > { %v7813_v42 = vpop.permute.xlu1 %4535  ;;  %v3715_v21 = vpop.permute.xlu0 %3714  ;;  %5938 = vset.pattern.permute.xlu1 %v6044_v37  ;;  %v4918_v37 = vld [vmem:[%s8408_s9 + $0xb0] sm:$0xff] }
 0x8c3   : > { %3972 = vperm.xlu1 %5938, %v7760_v13   ;;  %v3750_v51 = vmul.f32 %v3715_v21, %v3694_v45  ;;  %v3749_v1 = vmul.f32 %v3715_v21, %v3693_v54  ;;  %v3869_v45 = vmul.f32 %v4916_v10, %v7807_v60  ;;  %v3897_v54 = vsel %vm1410_vm13, %v3870_v6, 0.0  ;;  %v4920_v60 = vld [vmem:[%s8408_s9 + $0xc0] sm:$0xff] }
 0x8c5   : > { %v3777_v20 = vsel %vm1410_vm13, %v3750_v51, 0.0  ;;  %v4510_v51 = vld [vmem:[%s8412_s13 + $0x18] sm:$0xff] }
 0x8c6   : > { %v3710_v61 = vpop.permute.xlu1 %3709  ;;  %v7834_v41 = vpop.permute.xlu0 %4530 }
 0x8c7   : > { %v3747_v44 = vmul.f32 %v3710_v61, %v3691_v59  ;;  %v3748_v9 = vmul.f32 %v3710_v61, %v3692_v12  ;;  %5939 = vset.pattern.permute.xlu1 %v6046_v63  ;;  %v4507_v63 = vld [vmem:[%s8412_s13] sm:$0xff]  ;;  %v3871_v59 = vmul.f32 %v4918_v37, %v7809_v28  ;;  %v4509_v12 = vld [vmem:[%s8412_s13 + $0x10] sm:$0xff] }
 0x8c8   : > { %4090 = vperm.xlu1 %5939, %v7760_v13  }
 0x8c9   : > { %v3763_v35 = vadd.f32 %v3749_v1, %v3747_v44  ;;  %v3776_v27 = vsel %vm1410_vm13, %v3748_v9, 0.0 }
 0x8ca   : > { %v3778_v55 = vadd.f32 %v3777_v20, %v3776_v27  ;;  %v4526_v38 = vpop.permute.xlu1 %4525  ;;  %v4565_v27 = vmul.f32 %v7834_v41, %v4509_v12 }
 0x8cb   : > { %v3764_v26 = vadd.f32 %v3763_v35, %v3751_v3  ;;  %v7840_v34 = vpop.permute.xlu0 %3739  ;;  %v4563_v36 = vmul.f32 %v4526_v38, %v4507_v63  ;;  %v4564_v1 = vmul.f32 %v4526_v38, %v4508_v14  ;;  %v4511_v35 = vld [vmem:[%s8412_s13 + $0x20] sm:$0xff]  ;;  %v4512_v38 = vld [vmem:[%s8412_s13 + $0x28] sm:$0xff]  ;;  %v3705_v63 = vld [vmem:[%s8408_s9 + $0x70] sm:$0xff] }
 0x8cc   : > { %5940 = vset.pattern.permute.xlu1 %v6045_v17  ;;  %v3780_v56 = vadd.f32 %v3779_v53, %v3778_v55  ;;  %v3872_v17 = vmul.f32 %v4919_v46, %v7809_v28  ;;  %v4566_v55 = vmul.f32 %v7834_v41, %v4510_v51  ;;  %v3704_v41 = vld [vmem:[%s8408_s9 + $0x68] sm:$0xff]  ;;  %v4567_v16 = vmul.f32 %v7813_v42, %v4511_v35  ;;  %v4517_v14 = vld [vmem:[%s8412_s13 + $0x50] sm:$0xff] }
 0x8cd   : > { %4326 = vperm.xlu1 %5940, %v7760_v13   ;;  %v4568_v62 = vmul.f32 %v7813_v42, %v4512_v38 }
 0x8ce   : > { %v3725_v19 = vpop.permute.xlu1 %3724  ;;  %v3899_v28 = vsel %vm1410_vm13, %v3872_v17, 0.0 }
 0x8cf   : > { %v3753_v47 = vmul.f32 %v3725_v19, %v3697_v40  ;;  %v3754_v58 = vmul.f32 %v3725_v19, %v3698_v30  ;;  %v7850_v0 = vpop.permute.xlu0 %4555  ;;  %v4513_v40 = vld [vmem:[%s8412_s13 + $0x30] sm:$0xff]  ;;  %v4514_v30 = vld [vmem:[%s8412_s13 + $0x38] sm:$0xff]  ;;  %v4579_v19 = vadd.f32 %v4565_v27, %v4563_v36 }
 0x8d1   : > { %v3765_v2 = vadd.f32 %v3764_v26, %v3753_v47  ;;  %v3781_v25 = vsel %vm1410_vm13, %v3754_v58, 0.0  ;;  %4334 = vperm.xlu1 %5940, %v7765_v52   ;;  %v4592_v47 = vadd.f32 %v4566_v55, %v4564_v1  ;;  %v4580_v42 = vadd.f32 %v4579_v19, %v4567_v16 }
 0x8d2   : > { %v3782_v50 = vadd.f32 %v3781_v25, %v3780_v56  ;;  %v7854_v5 = vpop.permute.xlu1 %4540 }
 0x8d3   : > { %v3730_v33 = vpop.permute.xlu0 %3729  ;;  %v4570_v15 = vmul.f32 %v7854_v5, %v4514_v30  ;;  %v4593_v46 = vadd.f32 %v4592_v47, %v4568_v62 }
 0x8d4   : > { %v3755_v49 = vmul.f32 %v3730_v33, %v3699_v8  ;;  %v3756_v22 = vmul.f32 %v3730_v33, %v3700_v23  ;;  %v4516_v8 = vld [vmem:[%s8412_s13 + $0x48] sm:$0xff]  ;;  %v4569_v33 = vmul.f32 %v7854_v5, %v4513_v40  ;;  %v3706_v5 = vld [vmem:[%s8408_s9 + $0x78] sm:$0xff] }
 0x8d5   : > { %v4594_v17 = vadd.f32 %v4593_v46, %v4570_v15  ;;  %v4927_v46 = vld [vmem:[%s8408_s9 + $0xf8] sm:$0xff] }
 0x8d6   : > { %v7885_v7 = vadd.f32 %v3765_v2, %v3755_v49  ;;  %v3783_v13 = vsel %vm1410_vm13, %v3756_v22, 0.0  ;;  %v3701_v49 = vld [vmem:[%s8408_s9 + $0x50] sm:$0xff]  ;;  %v3702_v22 = vld [vmem:[%s8408_s9 + $0x58] sm:$0xff] }
 0x8d7   : > { %v3839_v52 = vpop.permute.xlu1 %3838  ;;  %v7892_v4 = vadd.f32 %v3783_v13, %v3782_v50  ;;  %v4546_v20 = vpop.permute.xlu0 %4545  ;;  %v4515_v50 = vld [vmem:[%s8412_s13 + $0x40] sm:$0xff] }
 0x8d8   : > { %v3867_v24 = vmul.f32 %v4914_v11, %v3839_v52  ;;  %v3868_v48 = vmul.f32 %v4915_v29, %v3839_v52  ;;  %v3703_v11 = vld [vmem:[%s8408_s9 + $0x60] sm:$0xff]  ;;  %v3760_v29 = vmul.f32 %v7840_v34, %v3704_v41  ;;  %v4571_v10 = vmul.f32 %v4546_v20, %v4515_v50 }
 0x8d9   : > { %v4572_v6 = vmul.f32 %v4546_v20, %v4516_v8  ;;  %v4519_v52 = vld [vmem:[%s8412_s13 + $0x60] sm:$0xff] }
 0x8da   : > { %v3881_v21 = vadd.f32 %v3867_v24, %v3865_v57  ;;  %v3895_v32 = vsel %vm1410_vm13, %v3868_v48, 0.0  ;;  %v3759_v24 = vmul.f32 %v7840_v34, %v3703_v11  ;;  %v4581_v48 = vadd.f32 %v4580_v42, %v4569_v33  ;;  %v4520_v34 = vld [vmem:[%s8412_s13 + $0x68] sm:$0xff]  ;;  %v4926_v42 = vld [vmem:[%s8408_s9 + $0xf0] sm:$0xff] }
 0x8db   : > { %v3896_v18 = vadd.f32 %v3895_v32, %v3894_v31  ;;  %v3851_v61 = vpop.permute.xlu1 %3850  ;;  %v3803_v31 = vlaneseq  ;;  %v4923_v32 = vld [vmem:[%s8408_s9 + $0xd8] sm:$0xff]  ;;  %v4575_v51 = vmul.f32 %v7850_v0, %v4519_v52  ;;  %v4576_v35 = vmul.f32 %v7850_v0, %v4520_v34 }
 0x8dc   : > { %v3882_v44 = vadd.f32 %v3881_v21, %v3869_v45  ;;  %v3874_v9 = vmul.f32 %v4921_v39, %v3851_v61  ;;  %v3873_v26 = vmul.f32 %v4920_v60, %v3851_v61  ;;  %v3855_v43 = vpop.permute.xlu0 %3854  ;;  %v4518_v39 = vld [vmem:[%s8412_s13 + $0x58] sm:$0xff]  ;;  %v3787_v45 = vsel %vm1410_vm13, %v3760_v29, 0.0  ;;  %v4922_v21 = vld [vmem:[%s8408_s9 + $0xd0] sm:$0xff] }
 0x8dd   : > { %v3898_v3 = vadd.f32 %v3897_v54, %v3896_v18  ;;  %v4582_v18 = vadd.f32 %v4581_v48, %v4571_v10  ;;  %v4595_v60 = vadd.f32 %v4594_v17, %v4572_v6  ;;  %v3875_v27 = vmul.f32 %v4922_v21, %v3855_v43 }
 0x8de   : > { %v3883_v53 = vadd.f32 %v3882_v44, %v3871_v59  ;;  %v3901_v2 = vsel %vm1410_vm13, %v3874_v9, 0.0  ;;  %v4924_v44 = vld [vmem:[%s8408_s9 + $0xe0] sm:$0xff]  ;;  %v4925_v9 = vld [vmem:[%s8408_s9 + $0xe8] sm:$0xff]  ;;  %v3876_v55 = vmul.f32 %v4923_v32, %v3855_v43  ;;  %v6048_v43 = vmov 1966171168  }
 0x8df   : > { %v3900_v56 = vadd.f32 %v3899_v28, %v3898_v3  ;;  %vm4408_vm15 = vcmp.lt.s32.totalorder %v3803_v31, 192 }
 0x8e0   : > { %v3884_v58 = vadd.f32 %v3883_v53, %v3873_v26  ;;  %v3745_v25 = vpop.permute.xlu1 %3744  ;;  %v3859_v28 = vpop.permute.xlu0 %3858  ;;  %v3903_v62 = vsel %vm1410_vm13, %v3876_v55, 0.0 }
 0x8e1   : > { %v7943_v23 = vadd.f32 %v3901_v2, %v3900_v56  ;;  %v3762_v54 = vmul.f32 %v3745_v25, %v3706_v5  ;;  %v3761_v1 = vmul.f32 %v3745_v25, %v3705_v63  ;;  %v4522_v56 = vld [vmem:[%s8412_s13 + $0x78] sm:$0xff]  ;;  %v3877_v47 = vmul.f32 %v4924_v44, %v3859_v28 }
 0x8e2   : > { %v3885_v19 = vadd.f32 %v3884_v58, %v3875_v27  ;;  %v3878_v41 = vmul.f32 %v4925_v9, %v3859_v28  ;;  %v3801_v58 = vunpack.c.l.s4 %v6048_v43 }
 0x8e3   : > { %v3789_v26 = vsel %vm1410_vm13, %v3762_v54, 0.0 }
 0x8e4   : > { %v3735_v13 = vpop.permute.xlu1 %3734  ;;  %v3905_v10 = vsel %vm1410_vm13, %v3878_v41, 0.0  ;;  %v3802_v34 = vunpack.c.0.s8 %v3801_v58 }
 0x8e5   : > { %v3757_v57 = vmul.f32 %v3735_v13, %v3701_v49  ;;  %v3758_v37 = vmul.f32 %v3735_v13, %v3702_v22  ;;  %v3904_v49 = vadd.f32 %v3903_v62, %v7943_v23  ;;  %v8005_v11 = vpop.permute.xlu0 %3956  ;;  %v3886_v13 = vadd.f32 %v3885_v19, %v3877_v47  ;;  %v4605_v19 = vld [vmem:[%s8413_s14] sm:$0x3] }
 0x8e7   : > { %v3767_v59 = vadd.f32 %v7885_v7, %v3757_v57  ;;  %v3785_v12 = vsel %vm1410_vm13, %v3758_v37, 0.0  ;;  %v3804_v57 = vshrl.u32 %v3803_v31, 7 }
 0x8e8   : > { %v3786_v61 = vadd.f32 %v3785_v12, %v7892_v4  ;;  %v4551_v36 = vpop.permute.xlu1 %4550  ;;  %v4521_v4 = vld [vmem:[%s8412_s13 + $0x70] sm:$0xff] }
 0x8e9   : > { %v3768_v7 = vadd.f32 %v3767_v59, %v3759_v24  ;;  %v4573_v3 = vmul.f32 %v4551_v36, %v4517_v14  ;;  %v4574_v20 = vmul.f32 %v4551_v36, %v4518_v39  ;;  %v3906_v14 = vadd.f32 %v3905_v10, %v3904_v49 }
 0x8ea   : > { %v3788_v53 = vadd.f32 %v3787_v45, %v3786_v61 }
 0x8eb   : > { %v3769_v38 = vadd.f32 %v3768_v7, %v3761_v1  ;;  %v4583_v40 = vadd.f32 %v4582_v18, %v4573_v3  ;;  %v4596_v30 = vadd.f32 %v4595_v60, %v4574_v20 }
 0x8ec   : > { %v3790_v0 = vadd.f32 %v3789_v26, %v3788_v53  ;;  %v4561_v2 = vpop.permute.xlu1 %4560  ;;  %v4609_v53 = vsub.s32 0, %v3804_v57 }
 0x8ed   : > { %v3770_v25 = vrot.slane %v3769_v38, 4  ;;  %v4584_v50 = vadd.f32 %v4583_v40, %v4575_v51  ;;  %v4597_v8 = vadd.f32 %v4596_v30, %v4576_v35  ;;  %v4577_v16 = vmul.f32 %v4561_v2, %v4521_v4  ;;  %v8016_v51 = vpop.permute.xlu0 %3968 }
 0x8ee   : > { %v3791_v33 = vrot.slane %v3790_v0, 4  ;;  %v4578_v15 = vmul.f32 %v4561_v2, %v4522_v56  ;;  %v8020_v35 = vsub.s32 %v3802_v34, %v3804_v57  ;;  %v4613_v4 = vsub.s32 1, %v3804_v57 }
 0x8ef   : > { %v3771_v22 = vadd.f32 %v3770_v25, %v3769_v38  ;;  %v4585_v29 = vadd.f32 %v4584_v50, %v4577_v16  ;;  %v4610_v50 = vrot.slane %v4605_v19, %v4609_v53 }
 0x8f0   : > { %v3792_v6 = vadd.f32 %v3791_v33, %v3790_v0  ;;  %v4598_v5 = vadd.f32 %v4597_v8, %v4578_v15  ;;  %v4614_v8 = vrot.slane %v4605_v19, %v4613_v4 }
 0x8f1   : > { %v3772_v23 = vrot.slane %v3771_v22, 2  ;;  %v4586_v52 = vrot.slane %v4585_v29, 4  ;;  %v3863_v37 = vpop.permute.xlu1 %3862  ;;  %v8027_v47 = vpop.permute.xlu0 %3976 }
 0x8f2   : > { %v3793_v24 = vrot.slane %v3792_v6, 2  ;;  %v4599_v48 = vrot.slane %v4598_v5, 4  ;;  %v3879_v17 = vmul.f32 %v4926_v42, %v3863_v37  ;;  %v3880_v63 = vmul.f32 %v4927_v46, %v3863_v37 }
 0x8f3   : > { %v3773_v39 = vadd.f32 %v3772_v23, %v3771_v22  ;;  %v4587_v45 = vadd.f32 %v4586_v52, %v4585_v29  ;;  %v4621_v29 = vld [vmem:[%s8414_s15] sm:$0x3] }
 0x8f4   : > { %v3794_v21 = vadd.f32 %v3793_v24, %v3792_v6  ;;  %v4600_v32 = vadd.f32 %v4599_v48, %v4598_v5  ;;  %v3887_v54 = vadd.f32 %v3886_v13, %v3879_v17  ;;  %v3907_v59 = vsel %vm1410_vm13, %v3880_v63, 0.0  ;;  %v3690_v52 = vld [vmem:[%s8409_s10] sm:$0x3] }
 0x8f5   : > { %v3774_v12 = vrot.slane %v3773_v39, 1  ;;  %v4588_v18 = vrot.slane %v4587_v45, 2  ;;  %v3908_v60 = vadd.f32 %v3907_v59, %v3906_v14  ;;  %v8036_v42 = vpop.permute.xlu0 %4310  ;;  %v4626_v5 = vrot.slane %v4621_v29, %v4609_v53 }
 0x8f6   : > { %v3795_v61 = vrot.slane %v3794_v21, 1  ;;  %v4601_v36 = vrot.slane %v4600_v32, 2  ;;  %v3888_v1 = vrot.slane %v3887_v54, 4  ;;  %v8018_v44 = vpop.permute.xlu1 %3952  ;;  %v4630_v13 = vrot.slane %v4621_v29, %v4613_v4 }
 0x8f7   : > { %v3775_v9 = vadd.f32 %v3774_v12, %v3773_v39  ;;  %v4589_v28 = vadd.f32 %v4588_v18, %v4587_v45  ;;  %v3909_v7 = vrot.slane %v3908_v60, 4 }
 0x8f8   : > { %v3796_v3 = vadd.f32 %v3795_v61, %v3794_v21  ;;  %v4602_v20 = vadd.f32 %v4601_v36, %v4600_v32  ;;  %v3889_v27 = vadd.f32 %v3888_v1, %v3887_v54 }
 0x8f9   : > { %v3910_v55 = vadd.f32 %v3909_v7, %v3908_v60  ;;  %v4590_v38 = vrot.slane %v4589_v28, 1  ;;  %v8045_v39 = vpop.permute.xlu0 %4314  ;;  %v4963_v7 = vld [vmem:[%s8408_s9 + $0x218] sm:$0xff] }
 0x8fa   : > { %v3799_v26 = vcombine.low %v3775_v9, %v3796_v3  ;;  %v4603_v40 = vrot.slane %v4602_v20, 1  ;;  %v3890_v30 = vrot.slane %v3889_v27, 2  ;;  %v8022_v56 = vpop.permute.xlu1 %3960  ;;  %v4961_v3 = vld [vmem:[%s8408_s9 + $0x208] sm:$0xff] }
 0x8fb   : > { %v3911_v41 = vrot.slane %v3910_v55, 2  ;;  %v4591_v16 = vadd.f32 %v4590_v38, %v4589_v28  ;;  %v4960_v38 = vld [vmem:[%s8408_s9 + $0x200] sm:$0xff] }
 0x8fc   : > { %v3806_v0 = vrot.slane %v3799_v26, %v8020_v35  ;;  %v3891_v2 = vadd.f32 %v3890_v30, %v3889_v27  ;;  %v4604_v62 = vadd.f32 %v4603_v40, %v4602_v20  ;;  %v4962_v20 = vld [vmem:[%s8408_s9 + $0x210] sm:$0xff]  ;;  %v4937_v26 = vld [vmem:[%s8408_s9 + $0x148] sm:$0xff] }
 0x8fd   : > { %v3912_v25 = vadd.f32 %v3911_v41, %v3910_v55  ;;  %v4617_v10 = vadd.f32 %v4610_v50, %v4591_v16  ;;  %v8055_v12 = vpop.permute.xlu0 %4070  ;;  %v4931_v55 = vld [vmem:[%s8408_s9 + $0x118] sm:$0xff]  ;;  %v4930_v40 = vld [vmem:[%s8408_s9 + $0x110] sm:$0xff]  ;;  %v4941_v30 = vld [vmem:[%s8408_s9 + $0x168] sm:$0xff] }
 0x8fe   : > { %v3813_v33 = vrot.slane %v3806_v0, %v8020_v35  ;;  %v3892_v15 = vrot.slane %v3891_v2, 1  ;;  %v8031_v49 = vpop.permute.xlu1 %3964  ;;  %v4618_v6 = vadd.f32 %v4614_v8, %v4604_v62  ;;  %v3986_v0 = vmul.f32 %v4931_v55, %v8005_v11  ;;  %v4936_v50 = vld [vmem:[%s8408_s9 + $0x140] sm:$0xff]  ;;  %v4929_v16 = vld [vmem:[%s8408_s9 + $0x108] sm:$0xff] }
 0x8ff   : > { %v3913_v22 = vrot.slane %v3912_v25, 1  ;;  %v4619_v57 = vmax.f32 %v4617_v10, 0.0  ;;  %v3992_v8 = vmul.f32 %v4937_v26, %v8016_v51  ;;  %v3996_v29 = vmul.f32 %v4941_v30, %v8027_v47  ;;  %v4966_v10 = vld [vmem:[%s8408_s9 + $0x230] sm:$0xff]  ;;  %v4969_v26 = vld [vmem:[%s8408_s9 + $0x248] sm:$0xff] }
 0x900   : > { %v3893_v43 = vadd.f32 %v3892_v15, %v3891_v2  ;;  %v4620_v37 = vmax.f32 %v4618_v6, 0.0  ;;  %v3815_v63 = vadd.f32 %v3813_v33, %v3690_v52  ;;  %v4965_v2 = vld [vmem:[%s8408_s9 + $0x228] sm:$0xff]  ;;  %v4940_v6 = vld [vmem:[%s8408_s9 + $0x160] sm:$0xff] }
 0x901   : > { %v3914_v58 = vadd.f32 %v3913_v22, %v3912_v25  ;;  %v4633_v48 = vmul.f32 %v4626_v5, %v4619_v57  ;;  %v8057_v60 = vpop.permute.xlu0 %4098  ;;  %v4967_v25 = vld [vmem:[%s8408_s9 + $0x238] sm:$0xff]  ;;  %v3985_v22 = vmul.f32 %v4930_v40, %v8005_v11  ;;  %v4928_v11 = vld [vmem:[%s8408_s9 + $0x100] sm:$0xff]  ;;  %v4933_v5 = vld [vmem:[%s8408_s9 + $0x128] sm:$0xff] }
 0x902   : > { %v8038_v46 = vpop.permute.xlu1 %3980  ;;  %v4634_v17 = vmul.f32 %v4630_v13, %v4620_v37  ;;  %v3988_v55 = vmul.f32 %v4933_v5, %v8022_v56 }
 0x903   : > { %v3917_v23 = vcombine.low %v3893_v43, %v3914_v58  ;;  %v4635_v34 = vsel %vm629_vm0, %v4633_v48, 0.0  ;;  %v4979_v43 = vld [vmem:[%s8408_s9 + $0x298] sm:$0xff]  ;;  %v4964_v58 = vld [vmem:[%s8408_s9 + $0x220] sm:$0xff]  ;;  %v8133_v48 = vmul.f32 %v4936_v50, %v8016_v51 }
 0x904   : > { %v4636_v21 = vsel %vm629_vm0, %v4634_v17, 0.0  ;;  %v4978_v17 = vld [vmem:[%s8408_s9 + $0x290] sm:$0xff]  ;;  %v4932_v51 = vld [vmem:[%s8408_s9 + $0x120] sm:$0xff]  ;;  %vm4643_vm0 = vcmask 0  }
 0x905   : > { %v3924_v24 = vrot.slane %v3917_v23, %v8020_v35  ;;  %v4637_v54 = vadd.f32 %v4636_v21, %v4635_v34  ;;  %v4189_v36 = vpop.permute.xlu0 %4188  ;;  %v8140_v34 = vsel %vm1410_vm13, %v3992_v8, 0.0  ;;  %v4340_v21 = vmul.f32 %v4979_v43, %v8036_v42  ;;  %v4944_v8 = vld [vmem:[%s8408_s9 + $0x180] sm:$0xff] }
 0x906   : > { %v4220_v19 = vmul.f32 %v4961_v3, %v4189_v36  ;;  %v4219_v62 = vmul.f32 %v4960_v38, %v4189_v36  ;;  %v8153_v3 = vsel %vm1410_vm13, %v3996_v29, 0.0 }
 0x907   : > { %v3931_v14 = vrot.slane %v3924_v24, %v8020_v35  ;;  %v8047_v45 = vpop.permute.xlu1 %4074  ;;  %4638 = vadd.xlane.f32.xlu0 %v4637_v54  ;;  %v4013_v24 = vsel %vm1410_vm13, %v3986_v0, 0.0  ;;  %v4981_v54 = vld [vmem:[%s8408_s9 + $0x2a8] sm:$0xff]  ;;  %v4935_v0 = vld [vmem:[%s8408_s9 + $0x138] sm:$0xff]  ;;  %v8186_v50 = vsel %vm1410_vm13, %v4340_v21, 0.0 }
 0x908   : > { %v4248_v13 = vsel %vm1410_vm13, %v4220_v19, 0.0  ;;  %v4980_v19 = vld [vmem:[%s8408_s9 + $0x2a0] sm:$0xff] }
 0x909   : > { %v8051_v32 = vadd.f32 %v3931_v14, %v3815_v63  ;;  %v4197_v9 = vpop.permute.xlu0 %4196  ;;  %v3984_v63 = vmul.f32 %v4929_v16, %v8018_v44  ;;  %v8199_v5 = vmul.f32 %v4980_v19, %v8045_v39 }
 0x90a   : > { %v4224_v23 = vmul.f32 %v4965_v2, %v4197_v9  ;;  %v4968_v2 = vld [vmem:[%s8408_s9 + $0x240] sm:$0xff] }
 0x90b   : > { %v8053_v59 = vpop.permute.xlu1 %4078  ;;  %v4012_v30 = vsel %vm1410_vm13, %v3984_v63, 0.0  ;;  %v4943_v63 = vld [vmem:[%s8408_s9 + $0x178] sm:$0xff] }
 0x90d   : > { %v8077_v53 = vpop.permute.xlu0 %4204 }
 0x910   : > { %v4193_v18 = vpop.permute.xlu1 %4192 }
 0x911   : > { %v4222_v4 = vmul.f32 %v4963_v7, %v4193_v18  ;;  %v4221_v41 = vmul.f32 %v4962_v20, %v4193_v18  ;;  %v8129_v57 = vpop.permute.xlu0 %4216  ;;  %v4223_v18 = vmul.f32 %v4964_v58, %v4197_v9  ;;  %v8150_v7 = vmul.f32 %v4940_v6, %v8027_v47 }
 0x912   : > { %v3983_v20 = vmul.f32 %v4928_v11, %v8018_v44  ;;  %v8166_v47 = vmul.f32 %v4978_v17, %v8036_v42  ;;  %v4251_v44 = vsel %vm1410_vm13, %v4224_v23, 0.0  ;;  %v3987_v42 = vmul.f32 %v4932_v51, %v8022_v56  ;;  %v4958_v23 = vld [vmem:[%s8408_s9 + $0x1f0] sm:$0xff]  ;;  %v4949_v51 = vld [vmem:[%s8408_s9 + $0x1a8] sm:$0xff] }
 0x913   : > { %v4249_v33 = vsel %vm1410_vm13, %v4222_v4, 0.0  ;;  %v4235_v52 = vadd.f32 %v4221_v41, %v4219_v62  ;;  %v4945_v4 = vld [vmem:[%s8408_s9 + $0x188] sm:$0xff]  ;;  %v4342_v41 = vmul.f32 %v4981_v54, %v8045_v39  ;;  %v4228_v56 = vmul.f32 %v4969_v26, %v8077_v53  ;;  %v4971_v62 = vld [vmem:[%s8408_s9 + $0x258] sm:$0xff] }
 0x914   : > { %v4250_v14 = vadd.f32 %v4249_v33, %v4248_v13  ;;  %v4102_v16 = vmul.f32 %v4945_v4, %v8055_v12  ;;  %v3999_v43 = vadd.f32 %v3985_v22, %v3983_v20  ;;  %v4015_v58 = vsel %vm1410_vm13, %v3988_v55, 0.0 }
 0x915   : > { %v8059_v61 = vpop.permute.xlu1 %4082  ;;  %v4236_v38 = vadd.f32 %v4235_v52, %v4223_v18  ;;  %v4209_v33 = vpop.permute.xlu0 %4208  ;;  %v4014_v11 = vadd.f32 %v4013_v24, %v4012_v30  ;;  %v3990_v13 = vmul.f32 %v4935_v0, %v8031_v49  ;;  %v4947_v52 = vld [vmem:[%s8408_s9 + $0x198] sm:$0xff]  ;;  %v4227_v22 = vmul.f32 %v4968_v2, %v8077_v53  ;;  %v4970_v53 = vld [vmem:[%s8408_s9 + $0x250] sm:$0xff] }
 0x916   : > { %v8212_v17 = vsel %vm1410_vm13, %v4342_v41, 0.0  ;;  %v4000_v24 = vadd.f32 %v3999_v43, %v3987_v42  ;;  %v4101_v39 = vmul.f32 %v4944_v8, %v8055_v12  ;;  %v4130_v54 = vsel %vm1410_vm13, %v4102_v16, 0.0  ;;  %v4946_v12 = vld [vmem:[%s8408_s9 + $0x190] sm:$0xff]  ;;  %v4948_v42 = vld [vmem:[%s8408_s9 + $0x1a0] sm:$0xff] }
 0x917   : > { %v4016_v21 = vadd.f32 %v4015_v58, %v4014_v11  ;;  %v4255_v18 = vsel %vm1410_vm13, %v4228_v56, 0.0  ;;  %v8238_v4 = vmul.f32 %v4958_v23, %v8057_v60  ;;  %v4104_v26 = vmul.f32 %v4947_v52, %v8047_v45  ;;  %v4974_v8 = vld [vmem:[%s8408_s9 + $0x270] sm:$0xff] }
 0x918   : > { %v4017_v30 = vsel %vm1410_vm13, %v3990_v13, 0.0  ;;  %v3998_v41 = vmul.f32 %v4943_v63, %v8038_v46  ;;  %v4229_v0 = vmul.f32 %v4970_v53, %v4209_v33  ;;  %v4103_v2 = vmul.f32 %v4946_v12, %v8047_v45  ;;  %v4942_v23 = vld [vmem:[%s8408_s9 + $0x170] sm:$0xff] }
 0x919   : > { %v4105_v11 = vmul.f32 %v4948_v42, %v8053_v59  ;;  %v4233_v52 = vmul.f32 %v4974_v8, %v8129_v57  ;;  %v4938_v8 = vld [vmem:[%s8408_s9 + $0x150] sm:$0xff] }
 0x91a   : > { %v8061_v1 = vpop.permute.xlu1 %4306  ;;  %v4117_v53 = vadd.f32 %v4103_v2, %v4101_v39  ;;  %v4985_v2 = vld [vmem:[%s8408_s9 + $0x2c8] sm:$0xff] }
 0x91f   : > { %v8063_v28 = vpop.permute.xlu1 %4086 }
 0x924   : > { %v4201_v27 = vpop.permute.xlu1 %4200 }
 0x925   : > { %v4226_v37 = vmul.f32 %v4967_v25, %v4201_v27  ;;  %v4225_v36 = vmul.f32 %v4966_v10, %v4201_v27  ;;  %v4934_v27 = vld [vmem:[%s8408_s9 + $0x130] sm:$0xff]  ;;  %v4252_v25 = vadd.f32 %v4251_v44, %v4250_v14  ;;  %v4230_v14 = vmul.f32 %v4971_v62, %v4209_v33  ;;  %v4976_v33 = vld [vmem:[%s8408_s9 + $0x280] sm:$0xff] }
 0x926   : > { %v3989_v10 = vmul.f32 %v4934_v27, %v8031_v49  ;;  %v4959_v49 = vld [vmem:[%s8408_s9 + $0x1f8] sm:$0xff]  ;;  %v4977_v27 = vld [vmem:[%s8408_s9 + $0x288] sm:$0xff] }
 0x927   : > { %v4253_v40 = vsel %vm1410_vm13, %v4226_v37, 0.0  ;;  %v4237_v29 = vadd.f32 %v4236_v38, %v4225_v36  ;;  %v4975_v36 = vld [vmem:[%s8408_s9 + $0x278] sm:$0xff]  ;;  %v4972_v38 = vld [vmem:[%s8408_s9 + $0x260] sm:$0xff]  ;;  %v4116_v19 = vmul.f32 %v4959_v49, %v8057_v60  ;;  %v4257_v56 = vsel %vm1410_vm13, %v4230_v14, 0.0 }
 0x928   : > { %v4254_v6 = vadd.f32 %v4253_v40, %v4252_v25  ;;  %v8235_v55 = vadd.f32 %v4000_v24, %v3989_v10  ;;  %v4973_v40 = vld [vmem:[%s8408_s9 + $0x268] sm:$0xff]  ;;  %v4106_v25 = vmul.f32 %v4949_v51, %v8053_v59  ;;  %v4234_v16 = vmul.f32 %v4975_v36, %v8129_v57  ;;  %v4951_v60 = vld [vmem:[%s8408_s9 + $0x1b8] sm:$0xff] }
 0x929   : > { %v8106_v15 = vpop.permute.xlu1 %4318  ;;  %v4238_v20 = vadd.f32 %v4237_v29, %v4227_v22  ;;  %v4338_v45 = vmul.f32 %v4977_v27, %v8061_v1  ;;  %v4018_v10 = vadd.f32 %v4017_v30, %v4016_v21  ;;  %v4950_v22 = vld [vmem:[%s8408_s9 + $0x1b0] sm:$0xff]  ;;  %v4108_v24 = vmul.f32 %v4951_v60, %v8059_v61  ;;  %v4953_v21 = vld [vmem:[%s8408_s9 + $0x1c8] sm:$0xff]  ;;  %v4983_v36 = vld [vmem:[%s8408_s9 + $0x2b8] sm:$0xff] }
 0x92a   : > { %v4256_v44 = vadd.f32 %v4255_v18, %v4254_v6  ;;  %v4131_v6 = vsel %vm1410_vm13, %v4104_v26, 0.0  ;;  %v4133_v14 = vsel %vm1410_vm13, %v4106_v25, 0.0  ;;  %v4337_v59 = vmul.f32 %v4976_v33, %v8061_v1 }
 0x92b   : > { %v4239_v29 = vadd.f32 %v4238_v20, %v4229_v0  ;;  %v4132_v57 = vadd.f32 %v4131_v6, %v4130_v54  ;;  %v4261_v51 = vsel %vm1410_vm13, %v4234_v16, 0.0  ;;  %v4366_v18 = vsel %vm1410_vm13, %v4338_v45, 0.0  ;;  %v4952_v54 = vld [vmem:[%s8408_s9 + $0x1c0] sm:$0xff]  ;;  %v4939_v16 = vld [vmem:[%s8408_s9 + $0x158] sm:$0xff] }
 0x92c   : > { %v4258_v13 = vadd.f32 %v4257_v56, %v4256_v44  ;;  %v8294_v26 = vsel %vm1410_vm13, %v4116_v19, 0.0  ;;  %v3997_v1 = vmul.f32 %v4942_v23, %v8038_v46  ;;  %v4107_v27 = vmul.f32 %v4950_v22, %v8059_v61  ;;  %v4982_v19 = vld [vmem:[%s8408_s9 + $0x2b0] sm:$0xff] }
 0x92d   : > { %v4135_v30 = vsel %vm1410_vm13, %v4108_v24, 0.0  ;;  %v4110_v42 = vmul.f32 %v4953_v21, %v8063_v28  ;;  %v4353_v0 = vadd.f32 %v8166_v47, %v4337_v59  ;;  %v4368_v46 = vadd.f32 %v8186_v50, %v4366_v18  ;;  %v4954_v24 = vld [vmem:[%s8408_s9 + $0x1d0] sm:$0xff] }
 0x92e   : > { %v8163_v9 = vpop.permute.xlu1 %4094  ;;  %v4344_v61 = vmul.f32 %v4983_v36, %v8106_v15  ;;  %v4025_v56 = vsel %vm1410_vm13, %v3998_v41, 0.0  ;;  %v4109_v47 = vmul.f32 %v4952_v54, %v8063_v28  ;;  %v4002_v50 = vadd.f32 %v8235_v55, %v8133_v48 }
 0x92f   : > { %v4020_v60 = vadd.f32 %v8140_v34, %v4018_v10  ;;  %v4343_v45 = vmul.f32 %v4982_v19, %v8106_v15  ;;  %v4137_v6 = vsel %vm1410_vm13, %v4110_v42, 0.0  ;;  %v4354_v48 = vadd.f32 %v4353_v0, %v8199_v5  ;;  %v4984_v15 = vld [vmem:[%s8408_s9 + $0x2c0] sm:$0xff]  ;;  %v4955_v5 = vld [vmem:[%s8408_s9 + $0x1d8] sm:$0xff] }
 0x930   : > { %v4370_v34 = vadd.f32 %v8212_v17, %v4368_v46  ;;  %v4371_v55 = vsel %vm1410_vm13, %v4344_v61, 0.0 }
 0x932   : > { %v4372_v21 = vadd.f32 %v4371_v55, %v4370_v34 }
 0x933   : > { %v8209_v37 = vpop.permute.xlu1 %4322 }
 0x934   : > { %v4346_v41 = vmul.f32 %v4985_v2, %v8209_v37 }
 0x938   : > { %v4213_v62 = vpop.permute.xlu1 %4212 }
 0x939   : > { %v4231_v43 = vmul.f32 %v4972_v38, %v4213_v62  ;;  %v4232_v58 = vmul.f32 %v4973_v40, %v4213_v62  ;;  %v4118_v38 = vadd.f32 %v4117_v53, %v4105_v11  ;;  %v4134_v40 = vadd.f32 %v4133_v14, %v4132_v57  ;;  %v4989_v14 = vld [vmem:[%s8408_s9 + $0x2e8] sm:$0xff] }
 0x93a   : > { %v4373_v57 = vsel %vm1410_vm13, %v4346_v41, 0.0 }
 0x93b   : > { %v4240_v49 = vadd.f32 %v4239_v29, %v4231_v43  ;;  %v4259_v63 = vsel %vm1410_vm13, %v4232_v58, 0.0  ;;  %v4119_v62 = vadd.f32 %v4118_v38, %v4107_v27  ;;  %v4136_v33 = vadd.f32 %v4135_v30, %v4134_v40  ;;  %v4957_v29 = vld [vmem:[%s8408_s9 + $0x1e8] sm:$0xff]  ;;  %v4988_v40 = vld [vmem:[%s8408_s9 + $0x2e0] sm:$0xff] }
 0x93c   : > { %v4260_v12 = vadd.f32 %v4259_v63, %v4258_v13  ;;  %v4114_v23 = vmul.f32 %v4957_v29, %v8163_v9  ;;  %v4956_v63 = vld [vmem:[%s8408_s9 + $0x1e0] sm:$0xff]  ;;  %v4374_v61 = vadd.f32 %v4373_v57, %v4372_v21 }
 0x93d   : > { %v4241_v20 = vadd.f32 %v4240_v49, %v4233_v52  ;;  %v8291_v39 = vpop.permute.xlu1 %4330  ;;  %v4120_v13 = vadd.f32 %v4119_v62, %v4109_v47  ;;  %v4138_v17 = vadd.f32 %v4137_v6, %v4136_v33  ;;  %v4355_v49 = vadd.f32 %v4354_v48, %v4343_v45  ;;  %v4990_v6 = vld [vmem:[%s8408_s9 + $0x2f0] sm:$0xff]  ;;  %v4991_v48 = vld [vmem:[%s8408_s9 + $0x2f8] sm:$0xff] }
 0x93e   : > { %v4262_v44 = vadd.f32 %v4261_v51, %v4260_v12  ;;  %v4345_v12 = vmul.f32 %v4984_v15, %v8209_v37  ;;  %v4141_v38 = vsel %vm1410_vm13, %v4114_v23, 0.0  ;;  %v4350_v37 = vmul.f32 %v4989_v14, %v8291_v39 }
 0x93f   : > { %v4242_v25 = vrot.slane %v4241_v20, 4 }
 0x940   : > { %v4263_v43 = vrot.slane %v4262_v44, 4  ;;  %v4356_v46 = vadd.f32 %v4355_v49, %v4345_v12  ;;  %v4377_v29 = vsel %vm1410_vm13, %v4350_v37, 0.0 }
 0x941   : > { %v4243_v10 = vadd.f32 %v4242_v25, %v4241_v20 }
 0x942   : > { %v3973_v58 = vpop.permute.xlu1 %3972  ;;  %v4264_v53 = vadd.f32 %v4263_v43, %v4262_v44  ;;  %v4113_v44 = vmul.f32 %v4956_v63, %v8163_v9  ;;  %v4987_v9 = vld [vmem:[%s8408_s9 + $0x2d8] sm:$0xff] }
 0x943   : > { %v3993_v28 = vmul.f32 %v4938_v8, %v3973_v58  ;;  %v3994_v11 = vmul.f32 %v4939_v16, %v3973_v58  ;;  %v4244_v36 = vrot.slane %v4243_v10, 2 }
 0x944   : > { %v4265_v42 = vrot.slane %v4264_v53, 2 }
 0x945   : > { %v4003_v52 = vadd.f32 %v4002_v50, %v3993_v28  ;;  %v4021_v22 = vsel %vm1410_vm13, %v3994_v11, 0.0  ;;  %v4245_v8 = vadd.f32 %v4244_v36, %v4243_v10 }
 0x946   : > { %v4022_v59 = vadd.f32 %v4021_v22, %v4020_v60  ;;  %v4266_v45 = vadd.f32 %v4265_v42, %v4264_v53 }
 0x947   : > { %v4004_v51 = vadd.f32 %v4003_v52, %v8150_v7  ;;  %v4091_v18 = vpop.permute.xlu1 %4090  ;;  %v4246_v34 = vrot.slane %v4245_v8, 1 }
 0x948   : > { %v4024_v20 = vadd.f32 %v8153_v3, %v4022_v59  ;;  %v4111_v27 = vmul.f32 %v4954_v24, %v4091_v18  ;;  %v4112_v54 = vmul.f32 %v4955_v5, %v4091_v18  ;;  %v4986_v3 = vld [vmem:[%s8408_s9 + $0x2d0] sm:$0xff]  ;;  %v4267_v49 = vrot.slane %v4266_v45, 1 }
 0x949   : > { %v4005_v30 = vadd.f32 %v4004_v51, %v3997_v1  ;;  %v4349_v1 = vmul.f32 %v4988_v40, %v8291_v39 }
 0x94a   : > { %v4026_v19 = vadd.f32 %v4025_v56, %v4024_v20  ;;  %v4121_v7 = vadd.f32 %v4120_v13, %v4111_v27  ;;  %v4139_v0 = vsel %vm1410_vm13, %v4112_v54, 0.0  ;;  %v4247_v20 = vadd.f32 %v4246_v34, %v4245_v8 }
 0x94b   : > { %v4006_v2 = vrot.slane %v4005_v30, 4  ;;  %v4140_v25 = vadd.f32 %v4139_v0, %v4138_v17 }
 0x94c   : > { %v4027_v16 = vrot.slane %v4026_v19, 4  ;;  %v4122_v56 = vadd.f32 %v4121_v7, %v4113_v44  ;;  %v4327_v47 = vpop.permute.xlu1 %4326  ;;  %v4268_v44 = vadd.f32 %v4267_v49, %v4266_v45 }
 0x94d   : > { %v4007_v50 = vadd.f32 %v4006_v2, %v4005_v30  ;;  %v4142_v60 = vadd.f32 %v4141_v38, %v4140_v25  ;;  %v4347_v62 = vmul.f32 %v4986_v3, %v4327_v47  ;;  %v4348_v33 = vmul.f32 %v4987_v9, %v4327_v47 }
 0x94e   : > { %v4028_v43 = vadd.f32 %v4027_v16, %v4026_v19  ;;  %v4123_v58 = vadd.f32 %v4122_v56, %v8238_v4 }
 0x94f   : > { %v4008_v41 = vrot.slane %v4007_v50, 2  ;;  %v4144_v39 = vadd.f32 %v8294_v26, %v4142_v60  ;;  %v4357_v28 = vadd.f32 %v4356_v46, %v4347_v62  ;;  %v4375_v11 = vsel %vm1410_vm13, %v4348_v33, 0.0 }
 0x950   : > { %v4029_v55 = vrot.slane %v4028_v43, 2  ;;  %v4124_v15 = vrot.slane %v4123_v58, 4  ;;  %v4376_v10 = vadd.f32 %v4375_v11, %v4374_v61  ;;  %v4335_v13 = vpop.permute.xlu1 %4334  ;;  %v4271_v46 = vcombine.low %v4247_v20, %v4268_v44  ;;  %v4640_v11 = vld [vmem:[#allocation3] sm:$0x1] }
 0x951   : > { %v4009_v4 = vadd.f32 %v4008_v41, %v4007_v50  ;;  %v4145_v23 = vrot.slane %v4144_v39, 4  ;;  %v4358_v52 = vadd.f32 %v4357_v28, %v4349_v1  ;;  %v4351_v22 = vmul.f32 %v4990_v6, %v4335_v13 }
 0x952   : > { %v4030_v24 = vadd.f32 %v4029_v55, %v4028_v43  ;;  %v4125_v5 = vadd.f32 %v4124_v15, %v4123_v58  ;;  %v4378_v17 = vadd.f32 %v4377_v29, %v4376_v10  ;;  %v4352_v26 = vmul.f32 %v4991_v48, %v4335_v13 }
 0x953   : > { %v4010_v63 = vrot.slane %v4009_v4, 1  ;;  %v4146_v53 = vadd.f32 %v4145_v23, %v4144_v39  ;;  %v4359_v14 = vadd.f32 %v4358_v52, %v4351_v22  ;;  %v4278_v50 = vrot.slane %v4271_v46, %v8020_v35 }
 0x954   : > { %v4031_v59 = vrot.slane %v4030_v24, 1  ;;  %v4126_v21 = vrot.slane %v4125_v5, 2  ;;  %v4379_v12 = vsel %vm1410_vm13, %v4352_v26, 0.0 }
 0x955   : > { %v4011_v57 = vadd.f32 %v4010_v63, %v4009_v4  ;;  %v4147_v51 = vrot.slane %v4146_v53, 2  ;;  %v4360_v18 = vrot.slane %v4359_v14, 4  ;;  %v4380_v36 = vadd.f32 %v4379_v12, %v4378_v17 }
 0x956   : > { %v4032_v27 = vadd.f32 %v4031_v59, %v4030_v24  ;;  %v4127_v54 = vadd.f32 %v4126_v21, %v4125_v5  ;;  %v4285_v43 = vrot.slane %v4278_v50, %v8020_v35 }
 0x957   : > { %v4148_v38 = vadd.f32 %v4147_v51, %v4146_v53  ;;  %v4361_v40 = vadd.f32 %v4360_v18, %v4359_v14  ;;  %v4381_v37 = vrot.slane %v4380_v36, 4 }
 0x958   : > { %v4035_v30 = vcombine.low %v4011_v57, %v4032_v27  ;;  %v4128_v42 = vrot.slane %v4127_v54, 1 }
 0x959   : > { %v4149_v19 = vrot.slane %v4148_v38, 1  ;;  %v4362_v7 = vrot.slane %v4361_v40, 2  ;;  %v4382_v0 = vadd.f32 %v4381_v37, %v4380_v36 }
 0x95a   : > { %v4042_v3 = vrot.slane %v4035_v30, %v8020_v35  ;;  %v4129_v9 = vadd.f32 %v4128_v42, %v4127_v54 }
 0x95b   : > { %v4150_v61 = vadd.f32 %v4149_v19, %v4148_v38  ;;  %v4363_v2 = vadd.f32 %v4362_v7, %v4361_v40  ;;  %v4383_v25 = vrot.slane %v4382_v0, 2 }
 0x95c   : > { %v4049_v8 = vrot.slane %v4042_v3, %v8020_v35 }
 0x95d   : > { %v4153_v1 = vcombine.low %v4129_v9, %v4150_v61  ;;  %v4364_v16 = vrot.slane %v4363_v2, 1  ;;  %v4384_v56 = vadd.f32 %v4383_v25, %v4382_v0 }
 0x95e   : > { %v4051_v47 = vadd.f32 %v4049_v8, %v8051_v32 }
 0x95f   : > { %v4160_v60 = vrot.slane %v4153_v1, %v8020_v35  ;;  %v4365_v62 = vadd.f32 %v4364_v16, %v4363_v2  ;;  %v4385_v33 = vrot.slane %v4384_v56, 1 }
 0x961   : > { %v4167_v45 = vrot.slane %v4160_v60, %v8020_v35  ;;  %v4386_v29 = vadd.f32 %v4385_v33, %v4384_v56 }
 0x963   : > { %v4169_v58 = vadd.f32 %v4167_v45, %v4051_v47  ;;  %v4389_v6 = vcombine.low %v4365_v62, %v4386_v29 }
 0x965   : > { %v4287_v41 = vadd.f32 %v4285_v43, %v4169_v58  ;;  %v4396_v39 = vrot.slane %v4389_v6, %v8020_v35 }
 0x967   : > { %v4403_v32 = vrot.slane %v4396_v39, %v8020_v35 }
 0x969   : > { %v4405_v28 = vadd.f32 %v4403_v32, %v4287_v41 }
 0x96b   : > { %4410 = vst.msk [vmem:[%s583_s1] sm:$0x3] %vm4408_vm15, %v4405_v28 }
 0x994   : > { %v4639_v48 = vpop.xlane.xlu0 %4638 }
 0x995   : > { %v4641_v34 = vadd.f32 %v4640_v11, %v4639_v48 }
 0x997   : > { %6021 = vtanh.f32 %v4641_v34 }
 0x9a1   : > { %v6022_v55 = vpop.eup %6021 }
 0x9a2   : > { %4644 = vst.msk [vmem:[%s586_s23] sm:$0x1] %vm4643_vm0, %v6022_v55 }
 0x9a3 PF: > { %s33_s0 = sadd.s32 1, %s6029_s0  }
 0x9a4   : > { %p30_p4 = scmp.ge.s32.totalorder %s33_s0, 4  }
 0x9a6   :  { %32 = sbr.rel (!%p30_p4) target bundleno = 4 (0x4), region = 139 }

</bundles_post_ra>
